<compile_context>
chip_gen: v7x
topology: tpu7x:2x2x1
jax: 0.10.0
libtpu: 0.0.40
codegen_flags: <defaults>
</compile_context>

<pallas_src>
import functools

import numpy as np
import jax
import jax.numpy as jnp
from jax import lax
from jax.experimental import pallas as pl
from jax.experimental.pallas import tpu as pltpu

NDF = 16      # module default is 128; reduced here for a small runnable demo
ISIZE = 30    # fixed by LayerNorm([14,14,14]/[6,6,6]) and fc1a(30^3)
BATCH = 2

MXU_DTYPE = jnp.bfloat16     # MXU operand dtype (accumulation stays f32)
ACT_DTYPE = jnp.bfloat16     # inter-layer activation / patch dtype in HBM

# fc1a K-streaming: 30^3 = 27000 zero-padded to 8 chunks of 27*128 lanes.
K_CHUNK = 27 * 128           # 3456 (multiple of 128 -> legal streamed block)
N_KSTEPS = 8
K_PAD = K_CHUNK * N_KSTEPS   # 27648 >= 27000

# 48 MiB scoped VMEM: above the 32 MiB default (v5e/v6e have 128 MiB physical)
# and still within v7x's 64 MiB physical VMEM.
VMEM_LIMIT = 48 * 1024 * 1024

# On v7x switch to pltpu.CORE_PARALLEL so the two branches shard across the
# chip's two TensorCores; "parallel" compiles on every generation (1 TC on
# v5e/v6e) which is why it is the default here.
BRANCH_SEMANTICS = "parallel"


# --------------------------- Pallas kernels ---------------------------------

def _conv_branch_kernel(p_ref, w_ref, *rest, slope, eps, log_branch):
    """One conv step:  out = leaky_relu(LayerNorm(W @ P)).

    p_ref : (K, N)        K-major bf16 patch matrix (K = 27*Cin)
    w_ref : (Cout, K)     per-branch bf16 weight matrix
    rest  : (g_ref, b_ref, o_ref) when LayerNorm is fused, else (o_ref,)
            g/b : (1, N)  f32 gamma/beta indexed by spatial position
            o   : (Cout, N) lane-dense bf16 output in NC(spatial) layout
    """
    o_ref = rest[-1]
    ln_refs = rest[:-1]

    p = p_ref[...]
    if log_branch:
        # Branch 1 (the "c" branch) consumes log(x + 1); log commutes with the
        # patch gather, so apply it to the shared bf16 patch block here (EUP,
        # f32 math) instead of materializing a second image in HBM.
        p_log = jnp.log(p.astype(jnp.float32) + 1.0).astype(p.dtype)
        p = jnp.where(pl.program_id(0) == 1, p_log, p)

    # bf16 x bf16 MXU matmul with f32 accumulation.
    acc = jnp.dot(w_ref[...], p, preferred_element_type=jnp.float32)  # (Cout,N)

    if ln_refs:
        g_ref, b_ref = ln_refs
        # LayerNorm over the spatial volume == per-row lane reduction (f32).
        mean = jnp.mean(acc, axis=-1, keepdims=True)
        var = jnp.mean(jnp.square(acc - mean), axis=-1, keepdims=True)
        acc = (acc - mean) * lax.rsqrt(var + eps)
        acc = acc * g_ref[...] + b_ref[...]

    acc = jnp.where(acc >= 0, acc, slope * acc)
    o_ref[...] = acc.astype(o_ref.dtype)


def _fc_fused_kernel(xb_ref, xc_ref, d_ref, wa_ref, e_ref,
                     wbc_ref, b1b_ref, b1c_ref, b1a_ref, w1e_ref, b1e_ref,
                     w2_ref, b2_ref, w3_ref, b3_ref, w4_ref, b4_ref,
                     w5_ref, b5_ref, o_ref, acc_ref):
    """FC head + tail.  Grid axis streams fc1a's K = 30^3 contraction in
    K_CHUNK-sized bf16 MXU partial matmuls into an f32 VMEM accumulator; the
    rest of the head/tail runs once at the last grid step, entirely in VMEM."""
    k = pl.program_id(0)

    @pl.when(k == 0)
    def _():
        acc_ref[...] = jnp.zeros_like(acc_ref)

    # fc1a partial matmul on the streamed (diff, weight) chunk.
    acc_ref[...] += jnp.dot(d_ref[...], wa_ref[...],
                            preferred_element_type=jnp.float32)

    @pl.when(k == pl.num_programs(0) - 1)
    def _():
        h = b1b_ref.shape[-1]

        def lrelu(v, s):
            return jnp.where(v >= 0, v, s * v)

        def mm(x, w):
            return jnp.dot(x, w, preferred_element_type=jnp.float32)

        # fc1b / fc1c share one lane-dense packed weight slab [W1b | W1c].
        zb = mm(xb_ref[...], wbc_ref[...])                   # (B, 2h) f32
        zc = mm(xc_ref[...], wbc_ref[...])
        xb = lrelu(zb[:, :h] + b1b_ref[...], 0.2)
        xc = lrelu(zc[:, h:] + b1c_ref[...], 0.2)
        xa = lrelu(acc_ref[...] + b1a_ref[...], 0.01)        # PyTorch default slope
        xe = lrelu(e_ref[...] * w1e_ref[...] + b1e_ref[...], 0.2)  # fc1e K == 1

        # fc2 via four row-block partial matmuls (no in-kernel concat/relayout).
        w2 = w2_ref[...]
        x = lrelu(mm(xb, w2[0 * h:1 * h, :]) + mm(xc, w2[1 * h:2 * h, :]) +
                  mm(xa, w2[2 * h:3 * h, :]) + mm(xe, w2[3 * h:4 * h, :]) +
                  b2_ref[...], 0.2)
        x = lrelu(mm(x, w3_ref[...]) + b3_ref[...], 0.2)
        x = lrelu(mm(x, w4_ref[...]) + b4_ref[...], 0.2)
        o_ref[...] = (mm(x, w5_ref[...]) + b5_ref[...]).astype(o_ref.dtype)


# ------------------------------ wrappers -------------------------------------

def conv_ln_pair(patches, w2, g2, b2, *, slope=0.2, log_branch=False):
    """conv + fused LayerNorm + LeakyReLU for BOTH branches; grid=(branch, batch).

    patches : (B, K, N) bf16   shared across branches (conv1), or
              (2, B, K, N) bf16 per-branch (conv2)
    w2      : (2, Cout, K) bf16
    g2 / b2 : (2, 1, N) f32
    returns : (2, B, Cout, N) bf16
    """
    shared = patches.ndim == 3
    if shared:
        B, K, N = patches.shape
        p_spec = pl.BlockSpec((None, K, N), lambda br, b: (b, 0, 0))
    else:
        _, B, K, N = patches.shape
        p_spec = pl.BlockSpec((None, None, K, N), lambda br, b: (br, b, 0, 0))
    cout = w2.shape[1]

    return pl.pallas_call(
        functools.partial(_conv_branch_kernel, slope=slope, eps=1e-5,
                          log_branch=log_branch),
        out_shape=jax.ShapeDtypeStruct((2, B, cout, N), ACT_DTYPE),
        grid=(2, B),
        in_specs=[p_spec,
                  pl.BlockSpec((None, cout, K), lambda br, b: (br, 0, 0)),
                  pl.BlockSpec((None, 1, N), lambda br, b: (br, 0, 0)),
                  pl.BlockSpec((None, 1, N), lambda br, b: (br, 0, 0))],
        out_specs=pl.BlockSpec((None, None, cout, N),
                               lambda br, b: (br, b, 0, 0)),
        compiler_params=pltpu.CompilerParams(
            dimension_semantics=(BRANCH_SEMANTICS, "parallel"),
            vmem_limit_bytes=VMEM_LIMIT),
    )(patches, w2, g2, b2)


def conv_pair_batch_merged(patches, w2, *, slope=0.2):
    """conv + LeakyReLU (no LN) with batch merged into the lane axis.

    patches : (2, K, B*Nout) bf16, w2 : (2, Cout, K) bf16
    returns : (2, Cout, B*Nout) bf16 (lane-dense unmasked stores when B*Nout>=128)
    """
    _, K, NB = patches.shape
    cout = w2.shape[1]
    return pl.pallas_call(
        functools.partial(_conv_branch_kernel, slope=slope, eps=1e-5,
                          log_branch=False),
        out_shape=jax.ShapeDtypeStruct((2, cout, NB), ACT_DTYPE),
        grid=(2,),
        in_specs=[pl.BlockSpec((None, K, NB), lambda br: (br, 0, 0)),
                  pl.BlockSpec((None, cout, K), lambda br: (br, 0, 0))],
        out_specs=pl.BlockSpec((None, cout, NB), lambda br: (br, 0, 0)),
        compiler_params=pltpu.CompilerParams(
            dimension_semantics=(BRANCH_SEMANTICS,),
            vmem_limit_bytes=VMEM_LIMIT),
    )(patches, w2)


def fused_fc(xb_feat, xc_feat, diff_pad, e_true, prep):
    """FC head + tail in one pallas_call with an N_KSTEPS reduction grid."""
    B = xb_feat.shape[0]
    half = prep['b1a'].shape[-1]

    def const(a):
        return pl.BlockSpec(a.shape, lambda k, _n=a.ndim: (0,) * _n)

    args = [xb_feat, xc_feat, diff_pad, prep['w1a'], e_true,
            prep['w1bc'], prep['b1b'], prep['b1c'], prep['b1a'],
            prep['w1e'], prep['b1e'], prep['w2'], prep['b2'],
            prep['w3'], prep['b3'], prep['w4'], prep['b4'],
            prep['w5'], prep['b5']]
    in_specs = ([const(xb_feat), const(xc_feat),
                 pl.BlockSpec((B, K_CHUNK), lambda k: (0, k)),     # diff chunk
                 pl.BlockSpec((K_CHUNK, half), lambda k: (k, 0))]  # fc1a chunk
                + [const(a) for a in args[4:]])

    return pl.pallas_call(
        _fc_fused_kernel,
        out_shape=jax.ShapeDtypeStruct((B, 1), jnp.float32),
        grid=(N_KSTEPS,),
        in_specs=in_specs,
        out_specs=pl.BlockSpec((B, 1), lambda k: (0, 0)),
        scratch_shapes=[pltpu.VMEM((B, half), jnp.float32)],
        compiler_params=pltpu.CompilerParams(
            dimension_semantics=("arbitrary",),
            vmem_limit_bytes=VMEM_LIMIT),
    )(*args)


# ------------------------- JAX glue (K-major im2col) --------------------------

def im2col_T(x, stride):
    """x: (..., C, D, H, W) -> K-major patch matrix (..., C*27, Do*Ho*Wo).

    Row order (ci, kd, kh, kw) matches W.reshape(Cout, Cin*27); column order is
    (do, ho, wo) row-major == the NC(spatial) layout consumed by the conv
    kernels, the fused LayerNorm and the channel-major flatten.
    """
    *lead, C, D, H, W = x.shape
    do = (D - 3) // stride + 1
    ho = (H - 3) // stride + 1
    wo = (W - 3) // stride + 1
    taps = []
    for kd in range(3):
        for kh in range(3):
            for kw in range(3):
                taps.append(x[..., kd:kd + (do - 1) * stride + 1:stride,
                                   kh:kh + (ho - 1) * stride + 1:stride,
                                   kw:kw + (wo - 1) * stride + 1:stride])
    p = jnp.stack(taps, axis=-4)                     # (..., C, 27, do, ho, wo)
    return p.reshape(*lead, C * 27, do * ho * wo), (do, ho, wo)


# ------------------------ one-time parameter prep -----------------------------

def prepare_params(p):
    """Convert PyTorch-layout params into kernel-ready tensors ONCE:
    branch-stacked matrices, MXU operands pre-cast to bf16, biases/LN in f32."""
    def stack_w(k1, k2):
        wa, wb = p[k1], p[k2]
        return jnp.stack([wa.reshape(wa.shape[0], -1),
                          wb.reshape(wb.shape[0], -1)]).astype(MXU_DTYPE)

    def stack_ln(k1, k2):
        return jnp.stack([p[k1].reshape(1, -1),
                          p[k2].reshape(1, -1)]).astype(jnp.float32)

    f32 = lambda a: a.astype(jnp.float32)
    row = lambda a: a.reshape(1, -1).astype(jnp.float32)

    return {
        'conv1_w': stack_w('conv1b_w', 'conv1c_w'),          # (2, NDF, 27)
        'conv2_w': stack_w('conv2b_w', 'conv2c_w'),          # (2, NDF, NDF*27)
        'conv3_w': stack_w('conv3b_w', 'conv3c_w'),
        'ln1_g': stack_ln('ln1b_g', 'ln1c_g'), 'ln1_b': stack_ln('ln1b_b', 'ln1c_b'),
        'ln2_g': stack_ln('ln2b_g', 'ln2c_g'), 'ln2_b': stack_ln('ln2b_b', 'ln2c_b'),
        # fc1b | fc1c packed into one lane-dense slab (K, 2*half).
        'w1bc': jnp.concatenate([p['fc1b_w'], p['fc1c_w']], axis=1).astype(MXU_DTYPE),
        'b1b': row(p['fc1b_b']), 'b1c': row(p['fc1c_b']),
        # fc1a weight zero-padded along K to the streamed-chunk grid.
        'w1a': jnp.pad(p['fc1a_w'],
                       ((0, K_PAD - ISIZE ** 3), (0, 0))).astype(MXU_DTYPE),
        'b1a': row(p['fc1a_b']),
        'w1e': f32(p['fc1e_w']), 'b1e': row(p['fc1e_b']),
        # fc2..fc5 are tiny; kept f32 (MXU cost negligible, preserves accuracy).
        'w2': f32(p['fc2_w']), 'b2': row(p['fc2_b']),
        'w3': f32(p['fc3_w']), 'b3': row(p['fc3_b']),
        'w4': f32(p['fc4_w']), 'b4': row(p['fc4_b']),
        'w5': f32(p['fc5_w']), 'b5': row(p['fc5_b']),
    }


# ------------------------------- forward --------------------------------------

def forward(prep, img, E_true):
    """img: (B, 2, 30, 30, 30) f32, E_true: (B, 1) -> (B,) f32"""
    B = img.shape[0]
    imga = img[:, 0]
    imgb = img[:, 1]

    # conv1 (k=3, s=2): branches share one bf16 patch matrix; c-branch log(x+1)
    # applied in-kernel.  Fused LayerNorm([14,14,14]) + LeakyReLU(0.2).
    p1, (d1, h1, w1) = im2col_T(imgb[:, None].astype(ACT_DTYPE), 2)  # (B,27,2744)
    a1 = conv_ln_pair(p1, prep['conv1_w'], prep['ln1_g'], prep['ln1_b'],
                      slope=0.2, log_branch=True)            # (2,B,NDF,2744)

    # conv2 (k=3, s=2) + LayerNorm([6,6,6]) + LeakyReLU(0.2)
    # TODO(synk): build the conv2/conv3 patch matrices inside the kernel via
    # tap-wise shifted-slice matmuls to remove the 27x im2col HBM amplification.
    p2, (d2, h2, w2) = im2col_T(a1.reshape(2, B, NDF, d1, h1, w1), 2)
    a2 = conv_ln_pair(p2, prep['conv2_w'], prep['ln2_g'], prep['ln2_b'])

    # conv3 (k=3, s=1) + LeakyReLU(0.2): merge batch into the lane axis so the
    # output last dim is B*64 (lane-dense unmasked stores) instead of 64.
    p3, (d3, h3, w3) = im2col_T(a2.reshape(2, B, NDF, d2, h2, w2), 1)
    nout3 = d3 * h3 * w3
    p3m = jnp.transpose(p3, (0, 2, 1, 3)).reshape(2, NDF * 27, B * nout3)
    a3 = conv_pair_batch_merged(p3m, prep['conv3_w'])        # (2, NDF, B*64)

    # per-batch channel-major flatten == PyTorch .view(-1, ndf*4*4*4)
    feats = jnp.transpose(a3.reshape(2, NDF, B, nout3),
                          (0, 2, 1, 3)).reshape(2, B, NDF * nout3)

    # fc1a input: f32 subtraction, then bf16 + zero-pad to the K-chunk grid.
    diff = (imgb - imga).reshape(B, -1)
    diff_pad = jnp.pad(diff, ((0, 0), (0, K_PAD - diff.shape[1])))

    out = fused_fc(feats[0], feats[1], diff_pad.astype(MXU_DTYPE),
                   E_true.astype(jnp.float32), prep)
    return out.reshape(-1)


# ------------------------- parameters (synthetic) ----------------------------

def init_params(key):
    ks = jax.random.split(key, 40)
    it = iter(ks)

    def nrm(shape, scale=0.05):
        return scale * jax.random.normal(next(it), shape, jnp.float32)

    p = {}
    for c in ('b', 'c'):
        p[f'conv1{c}_w'] = nrm((NDF, 1, 3, 3, 3))    # PyTorch OIDHW layout
        p[f'conv2{c}_w'] = nrm((NDF, NDF, 3, 3, 3))
        p[f'conv3{c}_w'] = nrm((NDF, NDF, 3, 3, 3))
        p[f'ln1{c}_g'] = 1.0 + nrm((14, 14, 14), 0.1)
        p[f'ln1{c}_b'] = nrm((14, 14, 14), 0.1)
        p[f'ln2{c}_g'] = 1.0 + nrm((6, 6, 6), 0.1)
        p[f'ln2{c}_b'] = nrm((6, 6, 6), 0.1)
    half = NDF // 2
    p['fc1a_w'] = nrm((ISIZE ** 3, half)); p['fc1a_b'] = nrm((half,), 0.1)
    p['fc1b_w'] = nrm((NDF * 64, half));   p['fc1b_b'] = nrm((half,), 0.1)
    p['fc1c_w'] = nrm((NDF * 64, half));   p['fc1c_b'] = nrm((half,), 0.1)
    p['fc1e_w'] = nrm((1, half));          p['fc1e_b'] = nrm((half,), 0.1)
    p['fc2_w'] = nrm((half * 4, NDF * 2)); p['fc2_b'] = nrm((NDF * 2,), 0.1)
    p['fc3_w'] = nrm((NDF * 2, NDF * 2));  p['fc3_b'] = nrm((NDF * 2,), 0.1)
    p['fc4_w'] = nrm((NDF * 2, NDF * 2));  p['fc4_b'] = nrm((NDF * 2,), 0.1)
    p['fc5_w'] = nrm((NDF * 2, 1));        p['fc5_b'] = nrm((1,), 0.1)
    return p


# ------------------------- pure-JAX reference --------------------------------

def reference_forward(params, img, E_true):
    hi = lax.Precision.HIGHEST

    def lrelu(x, s):
        return jnp.where(x >= 0, x, s * x)

    def dot(a, w):
        return jnp.dot(a, w, precision=hi)

    def conv3d(x, w_oidhw, stride):                  # x: NCDHW
        w = jnp.transpose(w_oidhw, (2, 3, 4, 1, 0))  # -> DHWIO
        return lax.conv_general_dilated(
            x, w, window_strides=(stride,) * 3, padding='VALID',
            dimension_numbers=('NCDHW', 'DHWIO', 'NCDHW'), precision=hi)

    def ln(x, g, b, eps=1e-5):
        m = jnp.mean(x, axis=(2, 3, 4), keepdims=True)
        v = jnp.mean((x - m) ** 2, axis=(2, 3, 4), keepdims=True)
        return (x - m) * lax.rsqrt(v + eps) * g + b

    B = img.shape[0]
    imga = img[:, 0:1]
    imgb = img[:, 1:2]
    diff = imgb - imga

    def branch(x, c):
        y = lrelu(ln(conv3d(x, params[f'conv1{c}_w'], 2),
                     params[f'ln1{c}_g'], params[f'ln1{c}_b']), 0.2)
        y = lrelu(ln(conv3d(y, params[f'conv2{c}_w'], 2),
                     params[f'ln2{c}_g'], params[f'ln2{c}_b']), 0.2)
        y = lrelu(conv3d(y, params[f'conv3{c}_w'], 1), 0.2)
        return y.reshape(B, -1)

    xb = lrelu(dot(branch(imgb, 'b'), params['fc1b_w']) + params['fc1b_b'], 0.2)
    xc = lrelu(dot(branch(jnp.log(imgb + 1.0), 'c'), params['fc1c_w']) + params['fc1c_b'], 0.2)
    xa = lrelu(dot(diff.reshape(B, -1), params['fc1a_w']) + params['fc1a_b'], 0.01)
    xe = lrelu(dot(E_true, params['fc1e_w']) + params['fc1e_b'], 0.2)
    x = jnp.concatenate([xb, xc, xa, xe], axis=1)
    x = lrelu(dot(x, params['fc2_w']) + params['fc2_b'], 0.2)
    x = lrelu(dot(x, params['fc3_w']) + params['fc3_b'], 0.2)
    x = lrelu(dot(x, params['fc4_w']) + params['fc4_b'], 0.2)
    x = dot(x, params['fc5_w']) + params['fc5_b']
    return x.reshape(-1)


# ------------------------------- main -----------------------------------------

if __name__ == "__main__":
    key = jax.random.PRNGKey(0)
    kp, ki, ke = jax.random.split(key, 3)
    params = init_params(kp)
    prep = prepare_params(params)          # one-time prep, outside jit(forward)

    img = jax.random.uniform(ki, (BATCH, 2, ISIZE, ISIZE, ISIZE), jnp.float32)
    E_true = jax.random.uniform(ke, (BATCH, 1), jnp.float32) * 10.0

    out = jax.jit(forward)(prep, img, E_true)
    out = jax.block_until_ready(out)

    ref = reference_forward(params, img, E_true)
    # bf16 MXU operands / bf16 inter-layer activations (f32 accumulation and
    # f32 LayerNorm math) vs a pure-f32 reference: tolerance loosened vs v2.
    np.testing.assert_allclose(np.asarray(out), np.asarray(ref),
                               rtol=2e-2, atol=1.5e-2)

    print("KERNEL_OK")
</pallas_src>

<mosaic_0001>
module attributes {stable_mosaic.version = 11 : i64} {
  func.func @_conv_branch_kernel(%arg0: i32, %arg1: i32, %arg2: memref<1x27x2744xbf16, #tpu.memory_space<vmem>>, %arg3: memref<1x16x27xbf16, #tpu.memory_space<vmem>>, %arg4: memref<1x1x2744xf32, #tpu.memory_space<vmem>>, %arg5: memref<1x1x2744xf32, #tpu.memory_space<vmem>>, %arg6: memref<1x1x16x2744xbf16, #tpu.memory_space<vmem>>) attributes {dimension_semantics = [#tpu.dimension_semantics<parallel>, #tpu.dimension_semantics<parallel>], iteration_bounds = array<i64: 2, 2>, scalar_prefetch = 0 : i64, scratch_operands = 0 : i64, tpu.core_type = #tpu.core_type<tc>, window_params = [{transform_indices = @transform_0, window_bounds = array<i64: 1, 27, 2744>}, {transform_indices = @transform_1, window_bounds = array<i64: 1, 16, 27>}, {transform_indices = @transform_2, window_bounds = array<i64: 1, 1, 2744>}, {transform_indices = @transform_3, window_bounds = array<i64: 1, 1, 2744>}, {transform_indices = @transform_4, window_bounds = array<i64: 1, 1, 16, 2744>}]} {
    %c0 = arith.constant 0 : index
    %c0_0 = arith.constant 0 : index
    %c0_1 = arith.constant 0 : index
    %0 = vector.load %arg2[%c0, %c0_0, %c0_1] : memref<1x27x2744xbf16, #tpu.memory_space<vmem>>, vector<1x27x2744xbf16>
    %1 = vector.shape_cast %0 : vector<1x27x2744xbf16> to vector<27x2744xbf16>
    %2 = arith.extf %1 : vector<27x2744xbf16> to vector<27x2744xf32>
    %cst = arith.constant 1.000000e+00 : f32
    %3 = vector.broadcast %cst : f32 to vector<27x2744xf32>
    %4 = arith.addf %2, %3 : vector<27x2744xf32>
    %5 = math.log %4 : vector<27x2744xf32>
    %6 = arith.truncf %5 : vector<27x2744xf32> to vector<27x2744xbf16>
    %c1_i32 = arith.constant 1 : i32
    %7 = arith.cmpi eq, %arg0, %c1_i32 : i32
    %8 = arith.select %7, %6, %1 : vector<27x2744xbf16>
    %c0_2 = arith.constant 0 : index
    %c0_3 = arith.constant 0 : index
    %c0_4 = arith.constant 0 : index
    %9 = vector.load %arg3[%c0_2, %c0_3, %c0_4] : memref<1x16x27xbf16, #tpu.memory_space<vmem>>, vector<1x16x27xbf16>
    %10 = vector.shape_cast %9 : vector<1x16x27xbf16> to vector<16x27xbf16>
    %cst_5 = arith.constant dense<0.000000e+00> : vector<16x2744xf32>
    %11 = tpu.matmul %10, %8, %cst_5 {dimension_numbers = #tpu.dot_dimension_numbers<[1], [0], [0], [1], [0, 0, 1, 1], [], []>} : vector<16x27xbf16>, vector<27x2744xbf16>, vector<16x2744xf32> -> vector<16x2744xf32>
    %cst_6 = arith.constant dense<0.000000e+00> : vector<16xf32>
    %12 = vector.multi_reduction <add>, %11, %cst_6 [1] : vector<16x2744xf32> to vector<16xf32>
    %13 = vector.shape_cast %12 : vector<16xf32> to vector<16x1xf32>
    %cst_7 = arith.constant 2.744000e+03 : f32
    %14 = vector.broadcast %cst_7 : f32 to vector<16x1xf32>
    %15 = arith.divf %13, %14 : vector<16x1xf32>
    %16 = vector.broadcast %15 : vector<16x1xf32> to vector<16x2744xf32>
    %17 = arith.subf %11, %16 : vector<16x2744xf32>
    %18 = arith.mulf %17, %17 : vector<16x2744xf32>
    %cst_8 = arith.constant dense<0.000000e+00> : vector<16xf32>
    %19 = vector.multi_reduction <add>, %18, %cst_8 [1] : vector<16x2744xf32> to vector<16xf32>
    %20 = vector.shape_cast %19 : vector<16xf32> to vector<16x1xf32>
    %cst_9 = arith.constant 2.744000e+03 : f32
    %21 = vector.broadcast %cst_9 : f32 to vector<16x1xf32>
    %22 = arith.divf %20, %21 : vector<16x1xf32>
    %23 = vector.broadcast %15 : vector<16x1xf32> to vector<16x2744xf32>
    %24 = arith.subf %11, %23 : vector<16x2744xf32>
    %cst_10 = arith.constant 9.99999974E-6 : f32
    %25 = vector.broadcast %cst_10 : f32 to vector<16x1xf32>
    %26 = arith.addf %22, %25 : vector<16x1xf32>
    %27 = math.rsqrt %26 : vector<16x1xf32>
    %28 = vector.broadcast %27 : vector<16x1xf32> to vector<16x2744xf32>
    %29 = arith.mulf %24, %28 : vector<16x2744xf32>
    %c0_11 = arith.constant 0 : index
    %c0_12 = arith.constant 0 : index
    %c0_13 = arith.constant 0 : index
    %30 = vector.load %arg4[%c0_11, %c0_12, %c0_13] : memref<1x1x2744xf32, #tpu.memory_space<vmem>>, vector<1x1x2744xf32>
    %31 = vector.shape_cast %30 : vector<1x1x2744xf32> to vector<1x2744xf32>
    %32 = vector.broadcast %31 : vector<1x2744xf32> to vector<16x2744xf32>
    %33 = arith.mulf %29, %32 : vector<16x2744xf32>
    %c0_14 = arith.constant 0 : index
    %c0_15 = arith.constant 0 : index
    %c0_16 = arith.constant 0 : index
    %34 = vector.load %arg5[%c0_14, %c0_15, %c0_16] : memref<1x1x2744xf32, #tpu.memory_space<vmem>>, vector<1x1x2744xf32>
    %35 = vector.shape_cast %34 : vector<1x1x2744xf32> to vector<1x2744xf32>
    %36 = vector.broadcast %35 : vector<1x2744xf32> to vector<16x2744xf32>
    %37 = arith.addf %33, %36 : vector<16x2744xf32>
    %cst_17 = arith.constant 0.000000e+00 : f32
    %38 = vector.broadcast %cst_17 : f32 to vector<16x2744xf32>
    %39 = arith.cmpf oge, %37, %38 : vector<16x2744xf32>
    %cst_18 = arith.constant 2.000000e-01 : f32
    %40 = vector.broadcast %cst_18 : f32 to vector<16x2744xf32>
    %41 = arith.mulf %40, %37 : vector<16x2744xf32>
    %42 = arith.select %39, %37, %41 : vector<16x2744xi1>, vector<16x2744xf32>
    %43 = arith.truncf %42 : vector<16x2744xf32> to vector<16x2744xbf16>
    %c0_19 = arith.constant 0 : index
    %c0_20 = arith.constant 0 : index
    %c0_21 = arith.constant 0 : index
    %c0_22 = arith.constant 0 : index
    %44 = vector.load %arg6[%c0_19, %c0_20, %c0_21, %c0_22] : memref<1x1x16x2744xbf16, #tpu.memory_space<vmem>>, vector<1x1x16x2744xbf16>
    %45 = vector.shape_cast %44 : vector<1x1x16x2744xbf16> to vector<16x2744xbf16>
    %46 = vector.shape_cast %43 : vector<16x2744xbf16> to vector<1x1x16x2744xbf16>
    tpu.vector_store %arg6[%c0_19, %c0_20, %c0_21, %c0_22], %46 {strides = array<i32>} : memref<1x1x16x2744xbf16, #tpu.memory_space<vmem>>, vector<1x1x16x2744xbf16>,
    return
  }
  func.func @transform_0(%arg0: i32, %arg1: i32) -> (i32, i32, i32) {
    %c0_i32 = arith.constant 0 : i32
    %c0_i32_0 = arith.constant 0 : i32
    %c0_i32_1 = arith.constant 0 : i32
    return %arg1, %c0_i32, %c0_i32_0 : i32, i32, i32
  }
  func.func @transform_1(%arg0: i32, %arg1: i32) -> (i32, i32, i32) {
    %c0_i32 = arith.constant 0 : i32
    %c0_i32_0 = arith.constant 0 : i32
    %c0_i32_1 = arith.constant 0 : i32
    return %arg0, %c0_i32, %c0_i32_0 : i32, i32, i32
  }
  func.func @transform_2(%arg0: i32, %arg1: i32) -> (i32, i32, i32) {
    %c0_i32 = arith.constant 0 : i32
    %c0_i32_0 = arith.constant 0 : i32
    %c0_i32_1 = arith.constant 0 : i32
    return %arg0, %c0_i32, %c0_i32_0 : i32, i32, i32
  }
  func.func @transform_3(%arg0: i32, %arg1: i32) -> (i32, i32, i32) {
    %c0_i32 = arith.constant 0 : i32
    %c0_i32_0 = arith.constant 0 : i32
    %c0_i32_1 = arith.constant 0 : i32
    return %arg0, %c0_i32, %c0_i32_0 : i32, i32, i32
  }
  func.func @transform_4(%arg0: i32, %arg1: i32) -> (i32, i32, i32, i32) {
    %c0_i32 = arith.constant 0 : i32
    %c0_i32_0 = arith.constant 0 : i32
    %c0_i32_1 = arith.constant 0 : i32
    return %arg0, %arg1, %c0_i32, %c0_i32_0 : i32, i32, i32, i32
  }
}

module attributes {stable_mosaic.version = 11 : i64} {
  func.func @_conv_branch_kernel(%arg0: i32, %arg1: i32, %arg2: memref<1x1x432x216xbf16, #tpu.memory_space<vmem>>, %arg3: memref<1x16x432xbf16, #tpu.memory_space<vmem>>, %arg4: memref<1x1x216xf32, #tpu.memory_space<vmem>>, %arg5: memref<1x1x216xf32, #tpu.memory_space<vmem>>, %arg6: memref<1x1x16x216xbf16, #tpu.memory_space<vmem>>) attributes {dimension_semantics = [#tpu.dimension_semantics<parallel>, #tpu.dimension_semantics<parallel>], iteration_bounds = array<i64: 2, 2>, scalar_prefetch = 0 : i64, scratch_operands = 0 : i64, tpu.core_type = #tpu.core_type<tc>, window_params = [{transform_indices = @transform_0, window_bounds = array<i64: 1, 1, 432, 216>}, {transform_indices = @transform_1, window_bounds = array<i64: 1, 16, 432>}, {transform_indices = @transform_2, window_bounds = array<i64: 1, 1, 216>}, {transform_indices = @transform_3, window_bounds = array<i64: 1, 1, 216>}, {transform_indices = @transform_4, window_bounds = array<i64: 1, 1, 16, 216>}]} {
    %c0 = arith.constant 0 : index
    %c0_0 = arith.constant 0 : index
    %c0_1 = arith.constant 0 : index
    %c0_2 = arith.constant 0 : index
    %0 = vector.load %arg2[%c0, %c0_0, %c0_1, %c0_2] : memref<1x1x432x216xbf16, #tpu.memory_space<vmem>>, vector<1x1x432x216xbf16>
    %1 = vector.shape_cast %0 : vector<1x1x432x216xbf16> to vector<432x216xbf16>
    %c0_3 = arith.constant 0 : index
    %c0_4 = arith.constant 0 : index
    %c0_5 = arith.constant 0 : index
    %2 = vector.load %arg3[%c0_3, %c0_4, %c0_5] : memref<1x16x432xbf16, #tpu.memory_space<vmem>>, vector<1x16x432xbf16>
    %3 = vector.shape_cast %2 : vector<1x16x432xbf16> to vector<16x432xbf16>
    %cst = arith.constant dense<0.000000e+00> : vector<16x216xf32>
    %4 = tpu.matmul %3, %1, %cst {dimension_numbers = #tpu.dot_dimension_numbers<[1], [0], [0], [1], [0, 0, 1, 1], [], []>} : vector<16x432xbf16>, vector<432x216xbf16>, vector<16x216xf32> -> vector<16x216xf32>
    %cst_6 = arith.constant dense<0.000000e+00> : vector<16xf32>
    %5 = vector.multi_reduction <add>, %4, %cst_6 [1] : vector<16x216xf32> to vector<16xf32>
    %6 = vector.shape_cast %5 : vector<16xf32> to vector<16x1xf32>
    %cst_7 = arith.constant 2.160000e+02 : f32
    %7 = vector.broadcast %cst_7 : f32 to vector<16x1xf32>
    %8 = arith.divf %6, %7 : vector<16x1xf32>
    %9 = vector.broadcast %8 : vector<16x1xf32> to vector<16x216xf32>
    %10 = arith.subf %4, %9 : vector<16x216xf32>
    %11 = arith.mulf %10, %10 : vector<16x216xf32>
    %cst_8 = arith.constant dense<0.000000e+00> : vector<16xf32>
    %12 = vector.multi_reduction <add>, %11, %cst_8 [1] : vector<16x216xf32> to vector<16xf32>
    %13 = vector.shape_cast %12 : vector<16xf32> to vector<16x1xf32>
    %cst_9 = arith.constant 2.160000e+02 : f32
    %14 = vector.broadcast %cst_9 : f32 to vector<16x1xf32>
    %15 = arith.divf %13, %14 : vector<16x1xf32>
    %16 = vector.broadcast %8 : vector<16x1xf32> to vector<16x216xf32>
    %17 = arith.subf %4, %16 : vector<16x216xf32>
    %cst_10 = arith.constant 9.99999974E-6 : f32
    %18 = vector.broadcast %cst_10 : f32 to vector<16x1xf32>
    %19 = arith.addf %15, %18 : vector<16x1xf32>
    %20 = math.rsqrt %19 : vector<16x1xf32>
    %21 = vector.broadcast %20 : vector<16x1xf32> to vector<16x216xf32>
    %22 = arith.mulf %17, %21 : vector<16x216xf32>
    %c0_11 = arith.constant 0 : index
    %c0_12 = arith.constant 0 : index
    %c0_13 = arith.constant 0 : index
    %23 = vector.load %arg4[%c0_11, %c0_12, %c0_13] : memref<1x1x216xf32, #tpu.memory_space<vmem>>, vector<1x1x216xf32>
    %24 = vector.shape_cast %23 : vector<1x1x216xf32> to vector<1x216xf32>
    %25 = vector.broadcast %24 : vector<1x216xf32> to vector<16x216xf32>
    %26 = arith.mulf %22, %25 : vector<16x216xf32>
    %c0_14 = arith.constant 0 : index
    %c0_15 = arith.constant 0 : index
    %c0_16 = arith.constant 0 : index
    %27 = vector.load %arg5[%c0_14, %c0_15, %c0_16] : memref<1x1x216xf32, #tpu.memory_space<vmem>>, vector<1x1x216xf32>
    %28 = vector.shape_cast %27 : vector<1x1x216xf32> to vector<1x216xf32>
    %29 = vector.broadcast %28 : vector<1x216xf32> to vector<16x216xf32>
    %30 = arith.addf %26, %29 : vector<16x216xf32>
    %cst_17 = arith.constant 0.000000e+00 : f32
    %31 = vector.broadcast %cst_17 : f32 to vector<16x216xf32>
    %32 = arith.cmpf oge, %30, %31 : vector<16x216xf32>
    %cst_18 = arith.constant 2.000000e-01 : f32
    %33 = vector.broadcast %cst_18 : f32 to vector<16x216xf32>
    %34 = arith.mulf %33, %30 : vector<16x216xf32>
    %35 = arith.select %32, %30, %34 : vector<16x216xi1>, vector<16x216xf32>
    %36 = arith.truncf %35 : vector<16x216xf32> to vector<16x216xbf16>
    %c0_19 = arith.constant 0 : index
    %c0_20 = arith.constant 0 : index
    %c0_21 = arith.constant 0 : index
    %c0_22 = arith.constant 0 : index
    %37 = vector.load %arg6[%c0_19, %c0_20, %c0_21, %c0_22] : memref<1x1x16x216xbf16, #tpu.memory_space<vmem>>, vector<1x1x16x216xbf16>
    %38 = vector.shape_cast %37 : vector<1x1x16x216xbf16> to vector<16x216xbf16>
    %39 = vector.shape_cast %36 : vector<16x216xbf16> to vector<1x1x16x216xbf16>
    tpu.vector_store %arg6[%c0_19, %c0_20, %c0_21, %c0_22], %39 {strides = array<i32>} : memref<1x1x16x216xbf16, #tpu.memory_space<vmem>>, vector<1x1x16x216xbf16>,
    return
  }
  func.func @transform_0(%arg0: i32, %arg1: i32) -> (i32, i32, i32, i32) {
    %c0_i32 = arith.constant 0 : i32
    %c0_i32_0 = arith.constant 0 : i32
    %c0_i32_1 = arith.constant 0 : i32
    return %arg0, %arg1, %c0_i32, %c0_i32_0 : i32, i32, i32, i32
  }
  func.func @transform_1(%arg0: i32, %arg1: i32) -> (i32, i32, i32) {
    %c0_i32 = arith.constant 0 : i32
    %c0_i32_0 = arith.constant 0 : i32
    %c0_i32_1 = arith.constant 0 : i32
    return %arg0, %c0_i32, %c0_i32_0 : i32, i32, i32
  }
  func.func @transform_2(%arg0: i32, %arg1: i32) -> (i32, i32, i32) {
    %c0_i32 = arith.constant 0 : i32
    %c0_i32_0 = arith.constant 0 : i32
    %c0_i32_1 = arith.constant 0 : i32
    return %arg0, %c0_i32, %c0_i32_0 : i32, i32, i32
  }
  func.func @transform_3(%arg0: i32, %arg1: i32) -> (i32, i32, i32) {
    %c0_i32 = arith.constant 0 : i32
    %c0_i32_0 = arith.constant 0 : i32
    %c0_i32_1 = arith.constant 0 : i32
    return %arg0, %c0_i32, %c0_i32_0 : i32, i32, i32
  }
  func.func @transform_4(%arg0: i32, %arg1: i32) -> (i32, i32, i32, i32) {
    %c0_i32 = arith.constant 0 : i32
    %c0_i32_0 = arith.constant 0 : i32
    %c0_i32_1 = arith.constant 0 : i32
    return %arg0, %arg1, %c0_i32, %c0_i32_0 : i32, i32, i32, i32
  }
}

module attributes {stable_mosaic.version = 11 : i64} {
  func.func @_conv_branch_kernel(%arg0: i32, %arg1: memref<1x432x128xbf16, #tpu.memory_space<vmem>>, %arg2: memref<1x16x432xbf16, #tpu.memory_space<vmem>>, %arg3: memref<1x16x128xbf16, #tpu.memory_space<vmem>>) attributes {dimension_semantics = [#tpu.dimension_semantics<parallel>], iteration_bounds = array<i64: 2>, scalar_prefetch = 0 : i64, scratch_operands = 0 : i64, tpu.core_type = #tpu.core_type<tc>, window_params = [{transform_indices = @transform_0, window_bounds = array<i64: 1, 432, 128>}, {transform_indices = @transform_1, window_bounds = array<i64: 1, 16, 432>}, {transform_indices = @transform_2, window_bounds = array<i64: 1, 16, 128>}]} {
    %c0 = arith.constant 0 : index
    %c0_0 = arith.constant 0 : index
    %c0_1 = arith.constant 0 : index
    %0 = vector.load %arg1[%c0, %c0_0, %c0_1] : memref<1x432x128xbf16, #tpu.memory_space<vmem>>, vector<1x432x128xbf16>
    %1 = vector.shape_cast %0 : vector<1x432x128xbf16> to vector<432x128xbf16>
    %c0_2 = arith.constant 0 : index
    %c0_3 = arith.constant 0 : index
    %c0_4 = arith.constant 0 : index
    %2 = vector.load %arg2[%c0_2, %c0_3, %c0_4] : memref<1x16x432xbf16, #tpu.memory_space<vmem>>, vector<1x16x432xbf16>
    %3 = vector.shape_cast %2 : vector<1x16x432xbf16> to vector<16x432xbf16>
    %cst = arith.constant dense<0.000000e+00> : vector<16x128xf32>
    %4 = tpu.matmul %3, %1, %cst {dimension_numbers = #tpu.dot_dimension_numbers<[1], [0], [0], [1], [0, 0, 1, 1], [], []>} : vector<16x432xbf16>, vector<432x128xbf16>, vector<16x128xf32> -> vector<16x128xf32>
    %cst_5 = arith.constant 0.000000e+00 : f32
    %5 = vector.broadcast %cst_5 : f32 to vector<16x128xf32>
    %6 = arith.cmpf oge, %4, %5 : vector<16x128xf32>
    %cst_6 = arith.constant 2.000000e-01 : f32
    %7 = vector.broadcast %cst_6 : f32 to vector<16x128xf32>
    %8 = arith.mulf %7, %4 : vector<16x128xf32>
    %9 = arith.select %6, %4, %8 : vector<16x128xi1>, vector<16x128xf32>
    %10 = arith.truncf %9 : vector<16x128xf32> to vector<16x128xbf16>
    %c0_7 = arith.constant 0 : index
    %c0_8 = arith.constant 0 : index
    %c0_9 = arith.constant 0 : index
    %11 = vector.load %arg3[%c0_7, %c0_8, %c0_9] : memref<1x16x128xbf16, #tpu.memory_space<vmem>>, vector<1x16x128xbf16>
    %12 = vector.shape_cast %11 : vector<1x16x128xbf16> to vector<16x128xbf16>
    %13 = vector.shape_cast %10 : vector<16x128xbf16> to vector<1x16x128xbf16>
    tpu.vector_store %arg3[%c0_7, %c0_8, %c0_9], %13 {strides = array<i32>} : memref<1x16x128xbf16, #tpu.memory_space<vmem>>, vector<1x16x128xbf16>,
    return
  }
  func.func @transform_0(%arg0: i32) -> (i32, i32, i32) {
    %c0_i32 = arith.constant 0 : i32
    %c0_i32_0 = arith.constant 0 : i32
    %c0_i32_1 = arith.constant 0 : i32
    return %arg0, %c0_i32, %c0_i32_0 : i32, i32, i32
  }
  func.func @transform_1(%arg0: i32) -> (i32, i32, i32) {
    %c0_i32 = arith.constant 0 : i32
    %c0_i32_0 = arith.constant 0 : i32
    %c0_i32_1 = arith.constant 0 : i32
    return %arg0, %c0_i32, %c0_i32_0 : i32, i32, i32
  }
  func.func @transform_2(%arg0: i32) -> (i32, i32, i32) {
    %c0_i32 = arith.constant 0 : i32
    %c0_i32_0 = arith.constant 0 : i32
    %c0_i32_1 = arith.constant 0 : i32
    return %arg0, %c0_i32, %c0_i32_0 : i32, i32, i32
  }
}

module attributes {stable_mosaic.version = 11 : i64} {
  func.func @_fc_fused_kernel(%arg0: i32, %arg1: memref<2x1024xbf16, #tpu.memory_space<vmem>>, %arg2: memref<2x1024xbf16, #tpu.memory_space<vmem>>, %arg3: memref<2x3456xbf16, #tpu.memory_space<vmem>>, %arg4: memref<3456x8xbf16, #tpu.memory_space<vmem>>, %arg5: memref<2x1xf32, #tpu.memory_space<vmem>>, %arg6: memref<1024x16xbf16, #tpu.memory_space<vmem>>, %arg7: memref<1x8xf32, #tpu.memory_space<vmem>>, %arg8: memref<1x8xf32, #tpu.memory_space<vmem>>, %arg9: memref<1x8xf32, #tpu.memory_space<vmem>>, %arg10: memref<1x8xf32, #tpu.memory_space<vmem>>, %arg11: memref<1x8xf32, #tpu.memory_space<vmem>>, %arg12: memref<32x32xf32, #tpu.memory_space<vmem>>, %arg13: memref<1x32xf32, #tpu.memory_space<vmem>>, %arg14: memref<32x32xf32, #tpu.memory_space<vmem>>, %arg15: memref<1x32xf32, #tpu.memory_space<vmem>>, %arg16: memref<32x32xf32, #tpu.memory_space<vmem>>, %arg17: memref<1x32xf32, #tpu.memory_space<vmem>>, %arg18: memref<32x1xf32, #tpu.memory_space<vmem>>, %arg19: memref<1x1xf32, #tpu.memory_space<vmem>>, %arg20: memref<2x1xf32, #tpu.memory_space<vmem>>, %arg21: memref<2x8xf32, #tpu.memory_space<vmem>>) attributes {dimension_semantics = [#tpu.dimension_semantics<arbitrary>], iteration_bounds = array<i64: 8>, scalar_prefetch = 0 : i64, scratch_operands = 1 : i64, tpu.core_type = #tpu.core_type<tc>, window_params = [{pipeline_mode = #tpu.pipeline_mode<synchronous>, transform_indices = @transform_0, window_bounds = array<i64: 2, 1024>}, {pipeline_mode = #tpu.pipeline_mode<synchronous>, transform_indices = @transform_1, window_bounds = array<i64: 2, 1024>}, {transform_indices = @transform_2, window_bounds = array<i64: 2, 3456>}, {transform_indices = @transform_3, window_bounds = array<i64: 3456, 8>}, {pipeline_mode = #tpu.pipeline_mode<synchronous>, transform_indices = @transform_4, window_bounds = array<i64: 2, 1>}, {pipeline_mode = #tpu.pipeline_mode<synchronous>, transform_indices = @transform_5, window_bounds = array<i64: 1024, 16>}, {pipeline_mode = #tpu.pipeline_mode<synchronous>, transform_indices = @transform_6, window_bounds = array<i64: 1, 8>}, {pipeline_mode = #tpu.pipeline_mode<synchronous>, transform_indices = @transform_7, window_bounds = array<i64: 1, 8>}, {pipeline_mode = #tpu.pipeline_mode<synchronous>, transform_indices = @transform_8, window_bounds = array<i64: 1, 8>}, {pipeline_mode = #tpu.pipeline_mode<synchronous>, transform_indices = @transform_9, window_bounds = array<i64: 1, 8>}, {pipeline_mode = #tpu.pipeline_mode<synchronous>, transform_indices = @transform_10, window_bounds = array<i64: 1, 8>}, {pipeline_mode = #tpu.pipeline_mode<synchronous>, transform_indices = @transform_11, window_bounds = array<i64: 32, 32>}, {pipeline_mode = #tpu.pipeline_mode<synchronous>, transform_indices = @transform_12, window_bounds = array<i64: 1, 32>}, {pipeline_mode = #tpu.pipeline_mode<synchronous>, transform_indices = @transform_13, window_bounds = array<i64: 32, 32>}, {pipeline_mode = #tpu.pipeline_mode<synchronous>, transform_indices = @transform_14, window_bounds = array<i64: 1, 32>}, {pipeline_mode = #tpu.pipeline_mode<synchronous>, transform_indices = @transform_15, window_bounds = array<i64: 32, 32>}, {pipeline_mode = #tpu.pipeline_mode<synchronous>, transform_indices = @transform_16, window_bounds = array<i64: 1, 32>}, {pipeline_mode = #tpu.pipeline_mode<synchronous>, transform_indices = @transform_17, window_bounds = array<i64: 32, 1>}, {pipeline_mode = #tpu.pipeline_mode<synchronous>, transform_indices = @transform_18, window_bounds = array<i64: 1, 1>}, {pipeline_mode = #tpu.pipeline_mode<synchronous>, transform_indices = @transform_19, window_bounds = array<i64: 2, 1>}]} {
    %c0_i32 = arith.constant 0 : i32
    %0 = arith.cmpi eq, %arg0, %c0_i32 : i32
    %1 = arith.extui %0 : i1 to i32
    %c0_i32_0 = arith.constant 0 : i32
    %2 = arith.cmpi ne, %1, %c0_i32_0 : i32
    scf.if %2 {
      %cst_9 = arith.constant 0.000000e+00 : f32
      %12 = vector.broadcast %cst_9 : f32 to vector<2x8xf32>
      %c0_10 = arith.constant 0 : index
      %c0_11 = arith.constant 0 : index
      %13 = vector.load %arg21[%c0_10, %c0_11] : memref<2x8xf32, #tpu.memory_space<vmem>>, vector<2x8xf32>
      tpu.vector_store %arg21[%c0_10, %c0_11], %12 {strides = array<i32>} : memref<2x8xf32, #tpu.memory_space<vmem>>, vector<2x8xf32>,
    } else {
    }
    %c0 = arith.constant 0 : index
    %c0_1 = arith.constant 0 : index
    %3 = vector.load %arg21[%c0, %c0_1] : memref<2x8xf32, #tpu.memory_space<vmem>>, vector<2x8xf32>
    %c0_2 = arith.constant 0 : index
    %c0_3 = arith.constant 0 : index
    %4 = vector.load %arg3[%c0_2, %c0_3] : memref<2x3456xbf16, #tpu.memory_space<vmem>>, vector<2x3456xbf16>
    %c0_4 = arith.constant 0 : index
    %c0_5 = arith.constant 0 : index
    %5 = vector.load %arg4[%c0_4, %c0_5] : memref<3456x8xbf16, #tpu.memory_space<vmem>>, vector<3456x8xbf16>
    %cst = arith.constant dense<0.000000e+00> : vector<2x8xf32>
    %6 = tpu.matmul %4, %5, %cst {dimension_numbers = #tpu.dot_dimension_numbers<[1], [0], [0], [1], [0, 0, 1, 1], [], []>} : vector<2x3456xbf16>, vector<3456x8xbf16>, vector<2x8xf32> -> vector<2x8xf32>
    %7 = arith.addf %3, %6 : vector<2x8xf32>
    %c0_6 = arith.constant 0 : index
    %c0_7 = arith.constant 0 : index
    %8 = vector.load %arg21[%c0_6, %c0_7] : memref<2x8xf32, #tpu.memory_space<vmem>>, vector<2x8xf32>
    tpu.vector_store %arg21[%c0_6, %c0_7], %7 {strides = array<i32>} : memref<2x8xf32, #tpu.memory_space<vmem>>, vector<2x8xf32>,
    %c7_i32 = arith.constant 7 : i32
    %9 = arith.cmpi eq, %arg0, %c7_i32 : i32
    %10 = arith.extui %9 : i1 to i32
    %c0_i32_8 = arith.constant 0 : i32
    %11 = arith.cmpi ne, %10, %c0_i32_8 : i32
    scf.if %11 {
      %c0_9 = arith.constant 0 : index
      %c0_10 = arith.constant 0 : index
      %12 = vector.load %arg1[%c0_9, %c0_10] : memref<2x1024xbf16, #tpu.memory_space<vmem>>, vector<2x1024xbf16>
      %c0_11 = arith.constant 0 : index
      %c0_12 = arith.constant 0 : index
      %13 = vector.load %arg6[%c0_11, %c0_12] : memref<1024x16xbf16, #tpu.memory_space<vmem>>, vector<1024x16xbf16>
      %cst_13 = arith.constant dense<0.000000e+00> : vector<2x16xf32>
      %14 = tpu.matmul %12, %13, %cst_13 {dimension_numbers = #tpu.dot_dimension_numbers<[1], [0], [0], [1], [0, 0, 1, 1], [], []>} : vector<2x1024xbf16>, vector<1024x16xbf16>, vector<2x16xf32> -> vector<2x16xf32>
      %c0_14 = arith.constant 0 : index
      %c0_15 = arith.constant 0 : index
      %15 = vector.load %arg2[%c0_14, %c0_15] : memref<2x1024xbf16, #tpu.memory_space<vmem>>, vector<2x1024xbf16>
      %c0_16 = arith.constant 0 : index
      %c0_17 = arith.constant 0 : index
      %16 = vector.load %arg6[%c0_16, %c0_17] : memref<1024x16xbf16, #tpu.memory_space<vmem>>, vector<1024x16xbf16>
      %cst_18 = arith.constant dense<0.000000e+00> : vector<2x16xf32>
      %17 = tpu.matmul %15, %16, %cst_18 {dimension_numbers = #tpu.dot_dimension_numbers<[1], [0], [0], [1], [0, 0, 1, 1], [], []>} : vector<2x1024xbf16>, vector<1024x16xbf16>, vector<2x16xf32> -> vector<2x16xf32>
      %18 = vector.extract_strided_slice %14 {offsets = [0, 0], sizes = [2, 8], strides = [1, 1]} : vector<2x16xf32> to vector<2x8xf32>
      %c0_19 = arith.constant 0 : index
      %c0_20 = arith.constant 0 : index
      %19 = vector.load %arg7[%c0_19, %c0_20] : memref<1x8xf32, #tpu.memory_space<vmem>>, vector<1x8xf32>
      %20 = vector.broadcast %19 : vector<1x8xf32> to vector<2x8xf32>
      %21 = arith.addf %18, %20 : vector<2x8xf32>
      %cst_21 = arith.constant 0.000000e+00 : f32
      %22 = vector.broadcast %cst_21 : f32 to vector<2x8xf32>
      %23 = arith.cmpf oge, %21, %22 : vector<2x8xf32>
      %cst_22 = arith.constant 2.000000e-01 : f32
      %24 = vector.broadcast %cst_22 : f32 to vector<2x8xf32>
      %25 = arith.mulf %24, %21 : vector<2x8xf32>
      %26 = arith.select %23, %21, %25 : vector<2x8xi1>, vector<2x8xf32>
      %27 = vector.extract_strided_slice %17 {offsets = [0, 8], sizes = [2, 8], strides = [1, 1]} : vector<2x16xf32> to vector<2x8xf32>
      %c0_23 = arith.constant 0 : index
      %c0_24 = arith.constant 0 : index
      %28 = vector.load %arg8[%c0_23, %c0_24] : memref<1x8xf32, #tpu.memory_space<vmem>>, vector<1x8xf32>
      %29 = vector.broadcast %28 : vector<1x8xf32> to vector<2x8xf32>
      %30 = arith.addf %27, %29 : vector<2x8xf32>
      %cst_25 = arith.constant 0.000000e+00 : f32
      %31 = vector.broadcast %cst_25 : f32 to vector<2x8xf32>
      %32 = arith.cmpf oge, %30, %31 : vector<2x8xf32>
      %cst_26 = arith.constant 2.000000e-01 : f32
      %33 = vector.broadcast %cst_26 : f32 to vector<2x8xf32>
      %34 = arith.mulf %33, %30 : vector<2x8xf32>
      %35 = arith.select %32, %30, %34 : vector<2x8xi1>, vector<2x8xf32>
      %c0_27 = arith.constant 0 : index
      %c0_28 = arith.constant 0 : index
      %36 = vector.load %arg21[%c0_27, %c0_28] : memref<2x8xf32, #tpu.memory_space<vmem>>, vector<2x8xf32>
      %c0_29 = arith.constant 0 : index
      %c0_30 = arith.constant 0 : index
      %37 = vector.load %arg9[%c0_29, %c0_30] : memref<1x8xf32, #tpu.memory_space<vmem>>, vector<1x8xf32>
      %38 = vector.broadcast %37 : vector<1x8xf32> to vector<2x8xf32>
      %39 = arith.addf %36, %38 : vector<2x8xf32>
      %cst_31 = arith.constant 0.000000e+00 : f32
      %40 = vector.broadcast %cst_31 : f32 to vector<2x8xf32>
      %41 = arith.cmpf oge, %39, %40 : vector<2x8xf32>
      %cst_32 = arith.constant 0.00999999977 : f32
      %42 = vector.broadcast %cst_32 : f32 to vector<2x8xf32>
      %43 = arith.mulf %42, %39 : vector<2x8xf32>
      %44 = arith.select %41, %39, %43 : vector<2x8xi1>, vector<2x8xf32>
      %c0_33 = arith.constant 0 : index
      %c0_34 = arith.constant 0 : index
      %45 = vector.load %arg5[%c0_33, %c0_34] : memref<2x1xf32, #tpu.memory_space<vmem>>, vector<2x1xf32>
      %c0_35 = arith.constant 0 : index
      %c0_36 = arith.constant 0 : index
      %46 = vector.load %arg10[%c0_35, %c0_36] : memref<1x8xf32, #tpu.memory_space<vmem>>, vector<1x8xf32>
      %47 = vector.broadcast %45 : vector<2x1xf32> to vector<2x8xf32>
      %48 = vector.broadcast %46 : vector<1x8xf32> to vector<2x8xf32>
      %49 = arith.mulf %47, %48 : vector<2x8xf32>
      %c0_37 = arith.constant 0 : index
      %c0_38 = arith.constant 0 : index
      %50 = vector.load %arg11[%c0_37, %c0_38] : memref<1x8xf32, #tpu.memory_space<vmem>>, vector<1x8xf32>
      %51 = vector.broadcast %50 : vector<1x8xf32> to vector<2x8xf32>
      %52 = arith.addf %49, %51 : vector<2x8xf32>
      %cst_39 = arith.constant 0.000000e+00 : f32
      %53 = vector.broadcast %cst_39 : f32 to vector<2x8xf32>
      %54 = arith.cmpf oge, %52, %53 : vector<2x8xf32>
      %cst_40 = arith.constant 2.000000e-01 : f32
      %55 = vector.broadcast %cst_40 : f32 to vector<2x8xf32>
      %56 = arith.mulf %55, %52 : vector<2x8xf32>
      %57 = arith.select %54, %52, %56 : vector<2x8xi1>, vector<2x8xf32>
      %c0_41 = arith.constant 0 : index
      %c0_42 = arith.constant 0 : index
      %58 = vector.load %arg12[%c0_41, %c0_42] : memref<32x32xf32, #tpu.memory_space<vmem>>, vector<32x32xf32>
      %59 = vector.extract_strided_slice %58 {offsets = [0, 0], sizes = [8, 32], strides = [1, 1]} : vector<32x32xf32> to vector<8x32xf32>
      %cst_43 = arith.constant dense<0.000000e+00> : vector<2x32xf32>
      %60 = tpu.matmul %26, %59, %cst_43 {dimension_numbers = #tpu.dot_dimension_numbers<[1], [0], [0], [1], [0, 0, 1, 1], [], []>} : vector<2x8xf32>, vector<8x32xf32>, vector<2x32xf32> -> vector<2x32xf32>
      %61 = vector.extract_strided_slice %58 {offsets = [8, 0], sizes = [8, 32], strides = [1, 1]} : vector<32x32xf32> to vector<8x32xf32>
      %cst_44 = arith.constant dense<0.000000e+00> : vector<2x32xf32>
      %62 = tpu.matmul %35, %61, %cst_44 {dimension_numbers = #tpu.dot_dimension_numbers<[1], [0], [0], [1], [0, 0, 1, 1], [], []>} : vector<2x8xf32>, vector<8x32xf32>, vector<2x32xf32> -> vector<2x32xf32>
      %63 = arith.addf %60, %62 : vector<2x32xf32>
      %64 = vector.extract_strided_slice %58 {offsets = [16, 0], sizes = [8, 32], strides = [1, 1]} : vector<32x32xf32> to vector<8x32xf32>
      %cst_45 = arith.constant dense<0.000000e+00> : vector<2x32xf32>
      %65 = tpu.matmul %44, %64, %cst_45 {dimension_numbers = #tpu.dot_dimension_numbers<[1], [0], [0], [1], [0, 0, 1, 1], [], []>} : vector<2x8xf32>, vector<8x32xf32>, vector<2x32xf32> -> vector<2x32xf32>
      %66 = arith.addf %63, %65 : vector<2x32xf32>
      %67 = vector.extract_strided_slice %58 {offsets = [24, 0], sizes = [8, 32], strides = [1, 1]} : vector<32x32xf32> to vector<8x32xf32>
      %cst_46 = arith.constant dense<0.000000e+00> : vector<2x32xf32>
      %68 = tpu.matmul %57, %67, %cst_46 {dimension_numbers = #tpu.dot_dimension_numbers<[1], [0], [0], [1], [0, 0, 1, 1], [], []>} : vector<2x8xf32>, vector<8x32xf32>, vector<2x32xf32> -> vector<2x32xf32>
      %69 = arith.addf %66, %68 : vector<2x32xf32>
      %c0_47 = arith.constant 0 : index
      %c0_48 = arith.constant 0 : index
      %70 = vector.load %arg13[%c0_47, %c0_48] : memref<1x32xf32, #tpu.memory_space<vmem>>, vector<1x32xf32>
      %71 = vector.broadcast %70 : vector<1x32xf32> to vector<2x32xf32>
      %72 = arith.addf %69, %71 : vector<2x32xf32>
      %cst_49 = arith.constant 0.000000e+00 : f32
      %73 = vector.broadcast %cst_49 : f32 to vector<2x32xf32>
      %74 = arith.cmpf oge, %72, %73 : vector<2x32xf32>
      %cst_50 = arith.constant 2.000000e-01 : f32
      %75 = vector.broadcast %cst_50 : f32 to vector<2x32xf32>
      %76 = arith.mulf %75, %72 : vector<2x32xf32>
      %77 = arith.select %74, %72, %76 : vector<2x32xi1>, vector<2x32xf32>
      %c0_51 = arith.constant 0 : index
      %c0_52 = arith.constant 0 : index
      %78 = vector.load %arg14[%c0_51, %c0_52] : memref<32x32xf32, #tpu.memory_space<vmem>>, vector<32x32xf32>
      %cst_53 = arith.constant dense<0.000000e+00> : vector<2x32xf32>
      %79 = tpu.matmul %77, %78, %cst_53 {dimension_numbers = #tpu.dot_dimension_numbers<[1], [0], [0], [1], [0, 0, 1, 1], [], []>} : vector<2x32xf32>, vector<32x32xf32>, vector<2x32xf32> -> vector<2x32xf32>
      %c0_54 = arith.constant 0 : index
      %c0_55 = arith.constant 0 : index
      %80 = vector.load %arg15[%c0_54, %c0_55] : memref<1x32xf32, #tpu.memory_space<vmem>>, vector<1x32xf32>
      %81 = vector.broadcast %80 : vector<1x32xf32> to vector<2x32xf32>
      %82 = arith.addf %79, %81 : vector<2x32xf32>
      %cst_56 = arith.constant 0.000000e+00 : f32
      %83 = vector.broadcast %cst_56 : f32 to vector<2x32xf32>
      %84 = arith.cmpf oge, %82, %83 : vector<2x32xf32>
      %cst_57 = arith.constant 2.000000e-01 : f32
      %85 = vector.broadcast %cst_57 : f32 to vector<2x32xf32>
      %86 = arith.mulf %85, %82 : vector<2x32xf32>
      %87 = arith.select %84, %82, %86 : vector<2x32xi1>, vector<2x32xf32>
      %c0_58 = arith.constant 0 : index
      %c0_59 = arith.constant 0 : index
      %88 = vector.load %arg16[%c0_58, %c0_59] : memref<32x32xf32, #tpu.memory_space<vmem>>, vector<32x32xf32>
      %cst_60 = arith.constant dense<0.000000e+00> : vector<2x32xf32>
      %89 = tpu.matmul %87, %88, %cst_60 {dimension_numbers = #tpu.dot_dimension_numbers<[1], [0], [0], [1], [0, 0, 1, 1], [], []>} : vector<2x32xf32>, vector<32x32xf32>, vector<2x32xf32> -> vector<2x32xf32>
      %c0_61 = arith.constant 0 : index
      %c0_62 = arith.constant 0 : index
      %90 = vector.load %arg17[%c0_61, %c0_62] : memref<1x32xf32, #tpu.memory_space<vmem>>, vector<1x32xf32>
      %91 = vector.broadcast %90 : vector<1x32xf32> to vector<2x32xf32>
      %92 = arith.addf %89, %91 : vector<2x32xf32>
      %cst_63 = arith.constant 0.000000e+00 : f32
      %93 = vector.broadcast %cst_63 : f32 to vector<2x32xf32>
      %94 = arith.cmpf oge, %92, %93 : vector<2x32xf32>
      %cst_64 = arith.constant 2.000000e-01 : f32
      %95 = vector.broadcast %cst_64 : f32 to vector<2x32xf32>
      %96 = arith.mulf %95, %92 : vector<2x32xf32>
      %97 = arith.select %94, %92, %96 : vector<2x32xi1>, vector<2x32xf32>
      %c0_65 = arith.constant 0 : index
      %c0_66 = arith.constant 0 : index
      %98 = vector.load %arg18[%c0_65, %c0_66] : memref<32x1xf32, #tpu.memory_space<vmem>>, vector<32x1xf32>
      %cst_67 = arith.constant dense<0.000000e+00> : vector<2x1xf32>
      %99 = tpu.matmul %97, %98, %cst_67 {dimension_numbers = #tpu.dot_dimension_numbers<[1], [0], [0], [1], [0, 0, 1, 1], [], []>} : vector<2x32xf32>, vector<32x1xf32>, vector<2x1xf32> -> vector<2x1xf32>
      %c0_68 = arith.constant 0 : index
      %c0_69 = arith.constant 0 : index
      %100 = vector.load %arg19[%c0_68, %c0_69] : memref<1x1xf32, #tpu.memory_space<vmem>>, vector<1x1xf32>
      %101 = vector.broadcast %100 : vector<1x1xf32> to vector<2x1xf32>
      %102 = arith.addf %99, %101 : vector<2x1xf32>
      %c0_70 = arith.constant 0 : index
      %c0_71 = arith.constant 0 : index
      %103 = vector.load %arg20[%c0_70, %c0_71] : memref<2x1xf32, #tpu.memory_space<vmem>>, vector<2x1xf32>
      tpu.vector_store %arg20[%c0_70, %c0_71], %102 {strides = array<i32>} : memref<2x1xf32, #tpu.memory_space<vmem>>, vector<2x1xf32>,
    } else {
    }
    return
  }
  func.func @transform_0(%arg0: i32) -> (i32, i32) {
    %c0_i32 = arith.constant 0 : i32
    %c0_i32_0 = arith.constant 0 : i32
    %c0_i32_1 = arith.constant 0 : i32
    return %c0_i32, %c0_i32_0 : i32, i32
  }
  func.func @transform_1(%arg0: i32) -> (i32, i32) {
    %c0_i32 = arith.constant 0 : i32
    %c0_i32_0 = arith.constant 0 : i32
    %c0_i32_1 = arith.constant 0 : i32
    return %c0_i32, %c0_i32_0 : i32, i32
  }
  func.func @transform_2(%arg0: i32) -> (i32, i32) {
    %c0_i32 = arith.constant 0 : i32
    %c0_i32_0 = arith.constant 0 : i32
    return %c0_i32, %arg0 : i32, i32
  }
  func.func @transform_3(%arg0: i32) -> (i32, i32) {
    %c0_i32 = arith.constant 0 : i32
    %c0_i32_0 = arith.constant 0 : i32
    return %arg0, %c0_i32 : i32, i32
  }
  func.func @transform_4(%arg0: i32) -> (i32, i32) {
    %c0_i32 = arith.constant 0 : i32
    %c0_i32_0 = arith.constant 0 : i32
    %c0_i32_1 = arith.constant 0 : i32
    return %c0_i32, %c0_i32_0 : i32, i32
  }
  func.func @transform_5(%arg0: i32) -> (i32, i32) {
    %c0_i32 = arith.constant 0 : i32
    %c0_i32_0 = arith.constant 0 : i32
    %c0_i32_1 = arith.constant 0 : i32
    return %c0_i32, %c0_i32_0 : i32, i32
  }
  func.func @transform_6(%arg0: i32) -> (i32, i32) {
    %c0_i32 = arith.constant 0 : i32
    %c0_i32_0 = arith.constant 0 : i32
    %c0_i32_1 = arith.constant 0 : i32
    return %c0_i32, %c0_i32_0 : i32, i32
  }
  func.func @transform_7(%arg0: i32) -> (i32, i32) {
    %c0_i32 = arith.constant 0 : i32
    %c0_i32_0 = arith.constant 0 : i32
    %c0_i32_1 = arith.constant 0 : i32
    return %c0_i32, %c0_i32_0 : i32, i32
  }
  func.func @transform_8(%arg0: i32) -> (i32, i32) {
    %c0_i32 = arith.constant 0 : i32
    %c0_i32_0 = arith.constant 0 : i32
    %c0_i32_1 = arith.constant 0 : i32
    return %c0_i32, %c0_i32_0 : i32, i32
  }
  func.func @transform_9(%arg0: i32) -> (i32, i32) {
    %c0_i32 = arith.constant 0 : i32
    %c0_i32_0 = arith.constant 0 : i32
    %c0_i32_1 = arith.constant 0 : i32
    return %c0_i32, %c0_i32_0 : i32, i32
  }
  func.func @transform_10(%arg0: i32) -> (i32, i32) {
    %c0_i32 = arith.constant 0 : i32
    %c0_i32_0 = arith.constant 0 : i32
    %c0_i32_1 = arith.constant 0 : i32
    return %c0_i32, %c0_i32_0 : i32, i32
  }
  func.func @transform_11(%arg0: i32) -> (i32, i32) {
    %c0_i32 = arith.constant 0 : i32
    %c0_i32_0 = arith.constant 0 : i32
    %c0_i32_1 = arith.constant 0 : i32
    return %c0_i32, %c0_i32_0 : i32, i32
  }
  func.func @transform_12(%arg0: i32) -> (i32, i32) {
    %c0_i32 = arith.constant 0 : i32
    %c0_i32_0 = arith.constant 0 : i32
    %c0_i32_1 = arith.constant 0 : i32
    return %c0_i32, %c0_i32_0 : i32, i32
  }
  func.func @transform_13(%arg0: i32) -> (i32, i32) {
    %c0_i32 = arith.constant 0 : i32
    %c0_i32_0 = arith.constant 0 : i32
    %c0_i32_1 = arith.constant 0 : i32
    return %c0_i32, %c0_i32_0 : i32, i32
  }
  func.func @transform_14(%arg0: i32) -> (i32, i32) {
    %c0_i32 = arith.constant 0 : i32
    %c0_i32_0 = arith.constant 0 : i32
    %c0_i32_1 = arith.constant 0 : i32
    return %c0_i32, %c0_i32_0 : i32, i32
  }
  func.func @transform_15(%arg0: i32) -> (i32, i32) {
    %c0_i32 = arith.constant 0 : i32
    %c0_i32_0 = arith.constant 0 : i32
    %c0_i32_1 = arith.constant 0 : i32
    return %c0_i32, %c0_i32_0 : i32, i32
  }
  func.func @transform_16(%arg0: i32) -> (i32, i32) {
    %c0_i32 = arith.constant 0 : i32
    %c0_i32_0 = arith.constant 0 : i32
    %c0_i32_1 = arith.constant 0 : i32
    return %c0_i32, %c0_i32_0 : i32, i32
  }
  func.func @transform_17(%arg0: i32) -> (i32, i32) {
    %c0_i32 = arith.constant 0 : i32
    %c0_i32_0 = arith.constant 0 : i32
    %c0_i32_1 = arith.constant 0 : i32
    return %c0_i32, %c0_i32_0 : i32, i32
  }
  func.func @transform_18(%arg0: i32) -> (i32, i32) {
    %c0_i32 = arith.constant 0 : i32
    %c0_i32_0 = arith.constant 0 : i32
    %c0_i32_1 = arith.constant 0 : i32
    return %c0_i32, %c0_i32_0 : i32, i32
  }
  func.func @transform_19(%arg0: i32) -> (i32, i32) {
    %c0_i32 = arith.constant 0 : i32
    %c0_i32_0 = arith.constant 0 : i32
    %c0_i32_1 = arith.constant 0 : i32
    return %c0_i32, %c0_i32_0 : i32, i32
  }
}

</mosaic_0001>

<bundles_post_ra>
// kernel: forward.4
= control target key start
LH: loop header
LB: loop body
LE: loop exit
PB: predicated region body
PF: predicated region fallthrough
CT: control target
= control target key end

     0   :  { %s2957_s15 = smov 0   ;;  %s2959_s16 = smov 0   ;;  %s4465_s0 = inlined_call_operand.vmem [shape: bf16[2,27,2744], index: 0, kind: input, shape index: {}]   ;;  %s4466_s1 = inlined_call_operand.vmem [shape: bf16[2,16,27], index: 1, kind: input, shape index: {}]   ;;  %s4467_s2 = inlined_call_operand.vmem [shape: f32[2,1,2744], index: 2, kind: input, shape index: {}]   ;;  %s4468_s3 = inlined_call_operand.vmem [shape: f32[2,1,2744], index: 3, kind: input, shape index: {}]   ;;  %s4469_s4 = inlined_call_operand.vmem [shape: bf16[2,2,16,2744], index: 4, kind: output, shape index: {}]  }
   0x1   :  { %s2961_s17 = smov 0   ;;  %s2963_s18 = smov 0  }
   0x2   :  { %s2965_s19 = smov 0  }
   0x3 LB: > { %s23_s20 = sadd.s32 1, %s2920_s17  ;;  %s26_s21 = sadd.s32 1, %s2924_s18  ;;  %s2928_s19 = sphi %s2965_s19, %s14_s19   ;;  %s2924_s18 = sphi %s2963_s18, %s4659_s18   ;;  %s2920_s17 = sphi %s2961_s17, %s4658_s17   ;;  %s2916_s16 = sphi %s2959_s16, %s4657_s16   ;;  %s2912_s15 = sphi %s2957_s15, %s4656_s15  }
   0x4   : > { %p24_p0 = scmp.ge.s32.totalorder %s23_s20, 2  ;;  %p2510_p1 = scmp.ge.s32.totalorder %s2928_s19, 1 }
   0x5   : > { %p204_p2 = scmp.lt.s32.totalorder %s2928_s19, 5 }
   0x6   : > { %s4661_s20 = smov (%p24_p0, %s23_s20), 0  ;;  %s4663_s21 = smov (!%p24_p0, %s26_s21), %s2924_s18 }
   0x7   : > { %p205_p3 = pnand %p2510_p1, %p204_p2  ;;  %p28_p4 = scmp.ge.s32.totalorder %s4663_s21, 2 }
   0x9   : > { %s4665_s21 = smov (%p28_p4, %s4663_s21), 0  ;;  %208 = sbr.rel (%p205_p3) target bundleno = 820 (0x334), region = 36 }
  0x10   : > { %p247_p5 = scmp.lt.s32.totalorder %s2912_s15, 1  ;;  %v2930_v0 = vmov 0   ;;  %p252_p6 = scmp.lt.s32.totalorder %s2916_s16, 1  ;;  %vm994_vm0 = vcmask 1044480   ;;  %vm995_vm2 = vcmask 1045504   ;;  %vm990_vm3 = vcmask 220160  }
  0x11   : > { %1096 = vmatprep.mubr.bf16.mxu0 %v2930_v0  ;;  %1139 = vmatprep.mubr.bf16.mxu1 %v2930_v0  ;;  %p715_p7 = scmp.eq.s32.totalorder %s2916_s16, 1  ;;  %vm1557_vm4 = vcmask 457728   ;;  %vm2369_vm11 = vcmask 1043456  }
  0x12   : > { %s4667_s15 = smov (!%p247_p5, %s2912_s15), 1 }
  0x13   : > { %s2618_s22 = smul.u32 352, %s4667_s15 }
  0x14   : > { %s2993_s23 = scalar_select %p252_p6, %s2916_s16, 1 }
  0x15   : > { %s2998_s26 = scalar_lea.vmem %s4465_s0, %s2618_s22  ;;  %s2620_s27 = smul.u32 44, %s4667_s15 }
  0x16   : > { %v3001_v1 = vld [vmem:[%s2998_s26] sm:$0xff]  ;;  %v3004_v2 = vld [vmem:[%s2998_s26 + $0x58] sm:$0xff]  ;;  %v3007_v3 = vld [vmem:[%s2998_s26 + $0x8] sm:$0xff]  ;;  %s2595_s28 = sshll.u32 %s2993_s23, 3  ;;  %s2621_s6 = smul.u32 88, %s2993_s23 }
  0x17   : > { %v320_v4 = vunpack.c.h.bf16 %v3001_v1  ;;  %v342_v5 = vunpack.c.h.bf16 %v3004_v2  ;;  %v319_v6 = vunpack.c.l.bf16 %v3001_v1  ;;  %v3014_v7 = vld [vmem:[%s2998_s26 + $0x60] sm:$0xff]  ;;  %s3019_s5 = scalar_lea.vmem %s4466_s1, %s2595_s28  ;;  %v341_v8 = vunpack.c.l.bf16 %v3004_v2  ;;  %v3026_v11 = vld [vmem:[%s2998_s26 + $0xb0] sm:$0xff]  ;;  %v3029_v12 = vld [vmem:[%s2998_s26 + $0x108] sm:$0x33]  ;;  %s2619_s9 = smul.u32 22, %s2993_s23 }
  0x18   : > { %v322_v9 = vunpack.c.h.bf16 %v3007_v3  ;;  %v344_v10 = vunpack.c.h.bf16 %v3014_v7  ;;  %s3031_s7 = sadd.s32 %s2621_s6, %s2620_s27  ;;  %v321_v17 = vunpack.c.l.bf16 %v3007_v3  ;;  %v343_v19 = vunpack.c.l.bf16 %v3014_v7  ;;  %v3038_v23 = vld [vmem:[%s2998_s26 + $0xb8] sm:$0xff]  ;;  %v3043_v26 = vld [vmem:[%s2998_s26 + $0x110] sm:$0x33] }
  0x19   : > { %v408_v13 = vadd.f32 1.0, %v320_v4  ;;  %v430_v14 = vadd.f32 1.0, %v342_v5  ;;  %v407_v15 = vadd.f32 1.0, %v319_v6  ;;  %v429_v16 = vadd.f32 1.0, %v341_v8  ;;  %s716_s8 = scalar_select %p715_p7, 1, 0 }
  0x1a   : > { %v410_v18 = vadd.f32 1.0, %v322_v9  ;;  %v364_v20 = vunpack.c.h.bf16 %v3026_v11  ;;  %v432_v21 = vadd.f32 1.0, %v344_v10  ;;  %v386_v22 = vunpack.c.h.bf16 %v3029_v12  ;;  %s260_s12 = scalar_lea.vmem %s4467_s2, %s2619_s9  ;;  %s264_s15 = scalar_lea.vmem %s4468_s3, %s2619_s9 }
  0x1b   : > { %2709 = vlog2.f32 %v408_v13  ;;  %v409_v24 = vadd.f32 1.0, %v321_v17  ;;  %v363_v25 = vunpack.c.l.bf16 %v3026_v11  ;;  %v431_v27 = vadd.f32 1.0, %v343_v19  ;;  %s2514_s16 = sshll.u32 %s3031_s7, 2 }
  0x1c   : > { %2711 = vlog2.f32 %v430_v14  ;;  %v385_v28 = vunpack.c.l.bf16 %v3029_v12  ;;  %v452_v29 = vadd.f32 1.0, %v364_v20  ;;  %v366_v30 = vunpack.c.h.bf16 %v3038_v23  ;;  %s4195_s24 = scalar_lea.vmem %s4469_s4, %s2514_s16 }
  0x1d   : > { %2713 = vlog2.f32 %v407_v15  ;;  %v474_v31 = vadd.f32 1.0, %v386_v22  ;;  %v388_v32 = vunpack.c.h.bf16 %v3043_v26  ;;  %v451_v33 = vadd.f32 1.0, %v363_v25 }
  0x1e   : > { %2715 = vlog2.f32 %v429_v16  ;;  %v365_v34 = vunpack.c.l.bf16 %v3038_v23  ;;  %v473_v35 = vadd.f32 1.0, %v385_v28  ;;  %v387_v36 = vunpack.c.l.bf16 %v3043_v26 }
  0x1f   : > { %2717 = vlog2.f32 %v410_v18  ;;  %v454_v37 = vadd.f32 1.0, %v366_v30  ;;  %v476_v38 = vadd.f32 1.0, %v388_v32  ;;  %v717_v40 = vstv %s716_s8 }
  0x20   : > { %2719 = vlog2.f32 %v432_v21  ;;  %v453_v41 = vadd.f32 1.0, %v365_v34  ;;  %v475_v44 = vadd.f32 1.0, %v387_v36  ;;  %v2516_v47 = vcombine.high %v3001_v1, %v3004_v2 }
  0x21   : > { %2721 = vlog2.f32 %v409_v24  ;;  %vm3054_vm1 = vcmp.eq.s32.totalorder %v717_v40, 1  ;;  %v2515_v54 = vcombine.low %v3001_v1, %v3004_v2  ;;  %v2518_v61 = vcombine.high %v3007_v3, %v3014_v7 }
  0x22   : > { %2723 = vlog2.f32 %v431_v27  ;;  %v2931_v4 = vmov 65535   ;;  %v2517_v9 = vcombine.low %v3007_v3, %v3014_v7  ;;  %v2538_v18 = vcombine.high %v3026_v11, %v3029_v12 }
  0x23   : > { %2725 = vlog2.f32 %v452_v29  ;;  %v996_v1 = vsel %vm994_vm0, 4294967295, %v2931_v4  ;;  %v2537_v25 = vcombine.low %v3026_v11, %v3029_v12 }
  0x24   : > { %2727 = vlog2.f32 %v474_v31  ;;  %v3074_v20 = vsel %vm995_vm2, %v996_v1, 0 }
  0x25   : > { %v2710_v39 = vpop.eup %2709  ;;  %2729 = vlog2.f32 %v451_v33  ;;  %v2540_v33 = vcombine.high %v3038_v23, %v3043_v26 }
  0x26   : > { %v2712_v42 = vpop.eup %2711  ;;  %v498_v43 = vmul.f32 0.6931472, %v2710_v39  ;;  %2731 = vlog2.f32 %v473_v35  ;;  %v3090_v39 = vld [vmem:[%s2998_s26 + $0x10] sm:$0xff] }
  0x27   : > { %v2714_v45 = vpop.eup %2713  ;;  %v542_v46 = vmul.f32 0.6931472, %v2712_v42  ;;  %2733 = vlog2.f32 %v454_v37 }
  0x28   : > { %v2716_v48 = vpop.eup %2715  ;;  %v496_v50 = vmul.f32 0.6931472, %v2714_v45  ;;  %2735 = vlog2.f32 %v476_v38  ;;  %v2539_v38 = vcombine.low %v3038_v23, %v3043_v26  ;;  %v324_v23 = vunpack.c.h.bf16 %v3090_v39  ;;  %v3104_v26 = vld [vmem:[%s2998_s26 + $0x18] sm:$0xff] }
  0x29   : > { %v2718_v51 = vpop.eup %2717  ;;  %v672_v52 = vpack.c.bf16 %v542_v46, %v498_v43  ;;  %v540_v53 = vmul.f32 0.6931472, %v2716_v48  ;;  %2737 = vlog2.f32 %v453_v41  ;;  %v3094_v41 = vld [vmem:[%s2998_s26 + $0x68] sm:$0xff]  ;;  %v3107_v46 = vld [vmem:[%s2998_s26 + $0x70] sm:$0xff] }
  0x2a   : > { %v2720_v55 = vpop.eup %2719  ;;  %v502_v56 = vmul.f32 0.6931472, %v2718_v51  ;;  %2739 = vlog2.f32 %v475_v44  ;;  %v3099_v44 = vld [vmem:[%s3019_s5] sm:$0xff]   ;;  %v346_v48 = vunpack.c.h.bf16 %v3094_v41  ;;  %v347_v4 = vunpack.c.l.bf16 %v3107_v46 }
  0x2b   : > { %v2722_v57 = vpop.eup %2721  ;;  %v940_v58 = vsel %vm3054_vm1, %v672_v52, %v2516_v47  ;;  %v671_v59 = vpack.c.bf16 %v540_v53, %v496_v50  ;;  %v546_v60 = vmul.f32 0.6931472, %v2720_v55  ;;  %v323_v50 = vunpack.c.l.bf16 %v3090_v39 }
  0x2c   : > { %v2724_v62 = vpop.eup %2723  ;;  %1064 = vmatprep.subr.bf16.mxu0 %v940_v58  ;;  %v500_v63 = vmul.f32 0.6931472, %v2722_v57  ;;  %v412_v52 = vadd.f32 1.0, %v324_v23  ;;  %v345_v53 = vunpack.c.l.bf16 %v3094_v41  ;;  %v348_v57 = vunpack.c.h.bf16 %v3107_v46  ;;  %v3120_v58 = vld [vmem:[%s2998_s26 + $0xc0] sm:$0xff] }
  0x2d   : > { %v2726_v2 = vpop.eup %2725  ;;  %v939_v5 = vsel %vm3054_vm1, %v671_v59, %v2515_v54  ;;  %v674_v6 = vpack.c.bf16 %v546_v60, %v502_v56  ;;  %v544_v8 = vmul.f32 0.6931472, %v2724_v62  ;;  %v434_v54 = vadd.f32 1.0, %v346_v48 }
  0x2e   : > { %v2728_v10 = vpop.eup %2727  ;;  %1065 = vmatpush1.bf16.msra.mxu0 %v939_v5  ;;  %v586_v13 = vmul.f32 0.6931472, %v2726_v2  ;;  %v411_v55 = vadd.f32 1.0, %v323_v50  ;;  %v326_v56 = vunpack.c.h.bf16 %v3104_v26  ;;  %2741 = vlog2.f32 %v412_v52  ;;  %v3175_v50 = vld [vmem:[%s2998_s26 + $0x80] sm:$0xff] }
  0x2f   : > { %v2730_v14 = vpop.eup %2729  ;;  %v942_v15 = vsel %vm3054_vm1, %v674_v6, %v2518_v61  ;;  %v673_v16 = vpack.c.bf16 %v544_v8, %v500_v63  ;;  %v630_v17 = vmul.f32 0.6931472, %v2728_v10  ;;  %v433_v59 = vadd.f32 1.0, %v345_v53  ;;  %v3124_v61 = vld [vmem:[%s2998_s26 + $0x118] sm:$0x33]  ;;  %v3136_v10 = vld [vmem:[%s2998_s26 + $0xc8] sm:$0xff] }
  0x30   : > { %v2732_v19 = vpop.eup %2731  ;;  %1107 = vmatprep.subr.bf16.mxu1 %v942_v15  ;;  %v584_v21 = vmul.f32 0.6931472, %v2730_v14  ;;  %v325_v60 = vunpack.c.l.bf16 %v3104_v26  ;;  %2743 = vlog2.f32 %v434_v54  ;;  %v414_v62 = vadd.f32 1.0, %v326_v56 }
  0x31   : > { %v2734_v22 = vpop.eup %2733  ;;  %v941_v3 = vsel %vm3054_vm1, %v673_v16, %v2517_v9  ;;  %v694_v7 = vpack.c.bf16 %v630_v17, %v586_v13  ;;  %v628_v24 = vmul.f32 0.6931472, %v2732_v19  ;;  %v436_v63 = vadd.f32 1.0, %v348_v57  ;;  %v3144_v16 = vld [vmem:[%s2998_s26 + $0x120] sm:$0x33] }
  0x32   : > { %v2736_v27 = vpop.eup %2735  ;;  %1108 = vmatpush1.bf16.msra.mxu1 %v941_v3  ;;  %v590_v28 = vmul.f32 0.6931472, %v2734_v22  ;;  %v2520_v1 = vcombine.high %v3090_v39, %v3094_v41  ;;  %2745 = vlog2.f32 %v411_v55  ;;  %v413_v2 = vadd.f32 1.0, %v325_v60 }
  0x33   : > { %v2738_v29 = vpop.eup %2737  ;;  %v962_v30 = vsel %vm3054_vm1, %v694_v7, %v2538_v18  ;;  %v693_v31 = vpack.c.bf16 %v628_v24, %v584_v21  ;;  %v634_v32 = vmul.f32 0.6931472, %v2736_v27  ;;  %v367_v5 = vunpack.c.l.bf16 %v3120_v58  ;;  %v3152_v7 = vld [vmem:[%s2998_s26 + $0x20] sm:$0xff] }
  0x34   : > { %v2740_v34 = vpop.eup %2739  ;;  %v1002_v35 = vand.u32 %v3074_v20, %v962_v30  ;;  %v588_v36 = vmul.f32 0.6931472, %v2738_v29  ;;  %2747 = vlog2.f32 %v433_v59  ;;  %v435_v6 = vadd.f32 1.0, %v347_v4 }
  0x35   : > { %v961_v11 = vsel %vm3054_vm1, %v693_v31, %v2537_v25  ;;  %v696_v12 = vpack.c.bf16 %v634_v32, %v590_v28  ;;  %v632_v37 = vmul.f32 0.6931472, %v2740_v34  ;;  %v368_v8 = vunpack.c.h.bf16 %v3120_v58  ;;  %v3157_v28 = vld [vmem:[%s2998_s26 + $0x78] sm:$0xff] }
  0x36   : > { %1066 = vmatprep.subr.bf16.mxu0 %v1002_v35  ;;  %v999_v40 = vand.u32 %v3074_v20, %v961_v11  ;;  %v389_v9 = vunpack.c.l.bf16 %v3124_v61  ;;  %v2519_v13 = vcombine.low %v3090_v39, %v3094_v41  ;;  %2749 = vlog2.f32 %v414_v62 }
  0x37   : > { %v964_v42 = vsel %vm3054_vm1, %v696_v12, %v2540_v33  ;;  %v695_v43 = vpack.c.bf16 %v632_v37, %v588_v36  ;;  %v2522_v14 = vcombine.high %v3104_v26, %v3107_v46  ;;  %v390_v15 = vunpack.c.h.bf16 %v3124_v61 }
  0x38   : > { %1067 = vmatpush1.bf16.msra.mxu0 %v999_v40  ;;  %v1008_v45 = vand.u32 %v3074_v20, %v964_v42  ;;  %2751 = vlog2.f32 %v436_v63  ;;  %v2521_v17 = vcombine.low %v3104_v26, %v3107_v46  ;;  %v455_v18 = vadd.f32 1.0, %v367_v5  ;;  %v2742_v35 = vpop.eup %2741 }
  0x39   : > { %v963_v47 = vsel %vm3054_vm1, %v695_v43, %v2539_v38  ;;  %v456_v19 = vadd.f32 1.0, %v368_v8  ;;  %2753 = vlog2.f32 %v413_v2  ;;  %v478_v21 = vadd.f32 1.0, %v390_v15  ;;  %v3170_v43 = vld [vmem:[%s2998_s26 + $0x28] sm:$0xff] }
  0x3a   : > { %1109 = vmatprep.subr.bf16.mxu1 %v1008_v45  ;;  %v1005_v51 = vand.u32 %v3074_v20, %v963_v47  ;;  %v369_v22 = vunpack.c.l.bf16 %v3136_v10  ;;  %v370_v3 = vunpack.c.h.bf16 %v3136_v10  ;;  %2755 = vlog2.f32 %v435_v6  ;;  %v2744_v37 = vpop.eup %2743 }
  0x3b   : > { %2560 = vmatmul.mubr.msk.bf16.vlgmr.msra.gmra.mrb[0].mxu0 %vm990_vm3, %v3099_v44  ;;  %v477_v24 = vadd.f32 1.0, %v389_v9  ;;  %v391_v25 = vunpack.c.l.bf16 %v3144_v16  ;;  %v392_v27 = vunpack.c.h.bf16 %v3144_v16  ;;  %2757 = vlog2.f32 %v456_v19 }
  0x3c   : > { %1110 = vmatpush1.bf16.msra.mxu1 %v1005_v51  ;;  %1182 = vmatprep.mubr.bf16.mxu0 %v2930_v0  ;;  %v2542_v29 = vcombine.high %v3120_v58, %v3124_v61  ;;  %v2541_v30 = vcombine.low %v3120_v58, %v3124_v61  ;;  %v458_v31 = vadd.f32 1.0, %v370_v3  ;;  %2759 = vlog2.f32 %v478_v21  ;;  %v2746_v45 = vpop.eup %2745 }
  0x3d   : > { %v480_v32 = vadd.f32 1.0, %v392_v27  ;;  %v2544_v33 = vcombine.high %v3136_v10, %v3144_v16  ;;  %v328_v34 = vunpack.c.h.bf16 %v3152_v7  ;;  %2761 = vlog2.f32 %v455_v18 }
  0x3e   : > { %v457_v36 = vadd.f32 1.0, %v369_v22  ;;  %v350_v11 = vunpack.c.h.bf16 %v3157_v28  ;;  %v327_v12 = vunpack.c.l.bf16 %v3152_v7  ;;  %v506_v38 = vmul.f32 0.6931472, %v2742_v35  ;;  %v2748_v51 = vpop.eup %2747 }
  0x3f   : > { %2561 = vmatmul.mubr.msk.bf16.vlgmr.msra.gmra.mrb[0].mxu1 %vm990_vm3, %v3099_v44  ;;  %2763 = vlog2.f32 %v477_v24  ;;  %v479_v40 = vadd.f32 1.0, %v391_v25  ;;  %v349_v42 = vunpack.c.l.bf16 %v3157_v28  ;;  %v550_v23 = vmul.f32 0.6931472, %v2744_v37 }
  0x40   : > { %1225 = vmatprep.mubr.bf16.mxu1 %v2930_v0  ;;  %2765 = vlog2.f32 %v458_v31  ;;  %v2543_v47 = vcombine.low %v3136_v10, %v3144_v16  ;;  %v416_v48 = vadd.f32 1.0, %v328_v34  ;;  %v504_v52 = vmul.f32 0.6931472, %v2746_v45  ;;  %v2750_v55 = vpop.eup %2749  ;;  %v3197_v34 = vld [vmem:[%s2998_s26 + $0xd0] sm:$0xff]  ;;  %v3207_v45 = vld [vmem:[%s2998_s26 + $0x128] sm:$0x33] }
  0x41   : > { %2767 = vlog2.f32 %v480_v32  ;;  %v438_v53 = vadd.f32 1.0, %v350_v11  ;;  %v415_v54 = vadd.f32 1.0, %v327_v12  ;;  %v676_v56 = vpack.c.bf16 %v550_v23, %v506_v38 }
  0x42   : > { %v548_v57 = vmul.f32 0.6931472, %v2748_v51  ;;  %2769 = vlog2.f32 %v457_v36  ;;  %v330_v59 = vunpack.c.h.bf16 %v3170_v43  ;;  %v2752_v60 = vpop.eup %2751  ;;  %v510_v62 = vmul.f32 0.6931472, %v2750_v55 }
  0x43   : > { %2771 = vlog2.f32 %v479_v40  ;;  %v437_v63 = vadd.f32 1.0, %v349_v42  ;;  %v352_v4 = vunpack.c.h.bf16 %v3175_v50  ;;  %v2754_v2 = vpop.eup %2753  ;;  %v944_v5 = vsel %vm3054_vm1, %v676_v56, %v2520_v1 }
  0x44   : > { %v675_v6 = vpack.c.bf16 %v548_v57, %v504_v52  ;;  %v554_v8 = vmul.f32 0.6931472, %v2752_v60  ;;  %2773 = vlog2.f32 %v416_v48  ;;  %v2756_v9 = vpop.eup %2755  ;;  %1150 = vmatprep.subr.bf16.mxu0 %v944_v5  ;;  %v508_v15 = vmul.f32 0.6931472, %v2754_v2 }
  0x45   : > { %2775 = vlog2.f32 %v438_v53  ;;  %v418_v18 = vadd.f32 1.0, %v330_v59  ;;  %v440_v19 = vadd.f32 1.0, %v352_v4  ;;  %v2758_v21 = vpop.eup %2757  ;;  %v552_v24 = vmul.f32 0.6931472, %v2756_v9 }
  0x46   : > { %v943_v22 = vsel %vm3054_vm1, %v675_v6, %v2519_v13  ;;  %v678_v3 = vpack.c.bf16 %v554_v8, %v510_v62  ;;  %2777 = vlog2.f32 %v415_v54  ;;  %v2760_v1 = vpop.eup %2759  ;;  %v594_v25 = vmul.f32 0.6931472, %v2758_v21 }
  0x47   : > { %1151 = vmatpush1.bf16.msra.mxu0 %v943_v22  ;;  %2779 = vlog2.f32 %v437_v63  ;;  %v329_v27 = vunpack.c.l.bf16 %v3170_v43  ;;  %v351_v31 = vunpack.c.l.bf16 %v3175_v50  ;;  %v2762_v32 = vpop.eup %2761  ;;  %v677_v41 = vpack.c.bf16 %v552_v24, %v508_v15 }
  0x48   : > { %v946_v39 = vsel %vm3054_vm1, %v678_v3, %v2522_v14  ;;  %v638_v13 = vmul.f32 0.6931472, %v2760_v1  ;;  %2781 = vlog2.f32 %v418_v18  ;;  %v592_v36 = vmul.f32 0.6931472, %v2762_v32 }
  0x49   : > { %v2764_v35 = vpop.eup %2763  ;;  %1193 = vmatprep.subr.bf16.mxu1 %v946_v39  ;;  %2783 = vlog2.f32 %v440_v19  ;;  %v417_v11 = vadd.f32 1.0, %v329_v27  ;;  %v439_v12 = vadd.f32 1.0, %v351_v31  ;;  %v945_v38 = vsel %vm3054_vm1, %v677_v41, %v2521_v17  ;;  %v3239_v27 = vld [vmem:[%s2998_s26 + $0xd8] sm:$0xff]  ;;  %v3242_v31 = vld [vmem:[%s2998_s26 + $0x130] sm:$0x33] }
  0x4a   : > { %v2766_v37 = vpop.eup %2765  ;;  %v698_v14 = vpack.c.bf16 %v638_v13, %v594_v25  ;;  %v636_v40 = vmul.f32 0.6931472, %v2764_v35  ;;  %v2524_v42 = vcombine.high %v3152_v7, %v3157_v28  ;;  %1194 = vmatpush1.bf16.msra.mxu1 %v945_v38  ;;  %v371_v51 = vunpack.c.l.bf16 %v3197_v34 }
  0x4b   : > { %v2768_v23 = vpop.eup %2767  ;;  %v598_v48 = vmul.f32 0.6931472, %v2766_v37  ;;  %2785 = vlog2.f32 %v417_v11  ;;  %v372_v52 = vunpack.c.h.bf16 %v3197_v34  ;;  %v393_v57 = vunpack.c.l.bf16 %v3207_v45 }
  0x4c   : > { %v2770_v53 = vpop.eup %2769  ;;  %v966_v26 = vsel %vm3054_vm1, %v698_v14, %v2542_v29  ;;  %v697_v46 = vpack.c.bf16 %v636_v40, %v592_v36  ;;  %v642_v17 = vmul.f32 0.6931472, %v2768_v23  ;;  %2787 = vlog2.f32 %v439_v12  ;;  %v3256_v12 = vld [vmem:[%s2998_s26 + $0x30] sm:$0xff]  ;;  %v3264_v23 = vld [vmem:[%s2998_s26 + $0x88] sm:$0xff] }
  0x4d   : > { %v2772_v54 = vpop.eup %2771  ;;  %v1014_v55 = vand.u32 %v3074_v20, %v966_v26  ;;  %v596_v56 = vmul.f32 0.6931472, %v2770_v53  ;;  %v394_v59 = vunpack.c.h.bf16 %v3207_v45  ;;  %v459_v4 = vadd.f32 1.0, %v371_v51 }
  0x4e   : > { %v2774_v60 = vpop.eup %2773  ;;  %v965_v62 = vsel %vm3054_vm1, %v697_v46, %v2541_v30  ;;  %v700_v63 = vpack.c.bf16 %v642_v17, %v598_v48  ;;  %v640_v29 = vmul.f32 0.6931472, %v2772_v54  ;;  %v460_v8 = vadd.f32 1.0, %v372_v52 }
  0x4f   : > { %v2776_v2 = vpop.eup %2775  ;;  %1152 = vmatprep.subr.bf16.mxu0 %v1014_v55  ;;  %v1011_v5 = vand.u32 %v3074_v20, %v965_v62  ;;  %v514_v6 = vmul.f32 0.6931472, %v2774_v60  ;;  %v481_v9 = vadd.f32 1.0, %v393_v57  ;;  %v482_v18 = vadd.f32 1.0, %v394_v59  ;;  %v3280_v60 = vld [vmem:[%s2998_s26 + $0x38] sm:$0xff]  ;;  %v3283_v62 = vld [vmem:[%s2998_s26 + $0x90] sm:$0xff] }
  0x50   : > { %v2778_v15 = vpop.eup %2777  ;;  %v968_v58 = vsel %vm3054_vm1, %v700_v63, %v2544_v33  ;;  %v699_v61 = vpack.c.bf16 %v640_v29, %v596_v56  ;;  %v558_v30 = vmul.f32 0.6931472, %v2776_v2  ;;  %v2523_v3 = vcombine.low %v3152_v7, %v3157_v28 }
  0x51   : > { %v2780_v19 = vpop.eup %2779  ;;  %1153 = vmatpush1.bf16.msra.mxu0 %v1011_v5  ;;  %v1020_v21 = vand.u32 %v3074_v20, %v968_v58  ;;  %v512_v22 = vmul.f32 0.6931472, %v2778_v15  ;;  %2789 = vlog2.f32 %v460_v8  ;;  %v2526_v28 = vcombine.high %v3170_v43, %v3175_v50 }
  0x52   : > { %v2782_v24 = vpop.eup %2781  ;;  %v967_v33 = vsel %vm3054_vm1, %v699_v61, %v2543_v47  ;;  %v680_v1 = vpack.c.bf16 %v558_v30, %v514_v6  ;;  %v556_v25 = vmul.f32 0.6931472, %v2780_v19  ;;  %2791 = vlog2.f32 %v482_v18 }
  0x53   : > { %v2784_v32 = vpop.eup %2783  ;;  %1195 = vmatprep.subr.bf16.mxu1 %v1020_v21  ;;  %v1017_v39 = vand.u32 %v3074_v20, %v967_v33  ;;  %v518_v7 = vmul.f32 0.6931472, %v2782_v24  ;;  %2793 = vlog2.f32 %v459_v4  ;;  %v373_v13 = vunpack.c.l.bf16 %v3239_v27  ;;  %v3295_v24 = vld [vmem:[%s2998_s26 + $0xe0] sm:$0xff] }
  0x54   : > { %2562 = vmatmul.mubr.msk.bf16.vlgmr.msra.gmra.mrb[4].mxu0 %vm990_vm3, %v3099_v44  ;;  %v948_v10 = vsel %vm3054_vm1, %v680_v1, %v2524_v42  ;;  %v679_v16 = vpack.c.bf16 %v556_v25, %v512_v22  ;;  %v562_v47 = vmul.f32 0.6931472, %v2784_v32  ;;  %2795 = vlog2.f32 %v481_v9  ;;  %v3299_v32 = vld [vmem:[%s2998_s26 + $0x138] sm:$0x33] }
  0x55   : > { %v2786_v41 = vpop.eup %2785  ;;  %1196 = vmatpush1.bf16.msra.mxu1 %v1017_v39  ;;  %1236 = vmatprep.subr.bf16.mxu0 %v948_v10  ;;  %v374_v35 = vunpack.c.h.bf16 %v3239_v27  ;;  %v395_v36 = vunpack.c.l.bf16 %v3242_v31  ;;  %v396_v11 = vunpack.c.h.bf16 %v3242_v31  ;;  %v2525_v42 = vcombine.low %v3170_v43, %v3175_v50 }
  0x56   : > { %v2788_v37 = vpop.eup %2787  ;;  %v947_v38 = vsel %vm3054_vm1, %v679_v16, %v2523_v3  ;;  %v682_v14 = vpack.c.bf16 %v562_v47, %v518_v7  ;;  %v516_v40 = vmul.f32 0.6931472, %v2786_v41  ;;  %1268 = vmatprep.mubr.bf16.mxu0 %v2930_v0  ;;  %v2546_v51 = vcombine.high %v3197_v34, %v3207_v45 }
  0x57   : > { %1237 = vmatpush1.bf16.msra.mxu0 %v947_v38  ;;  %v560_v48 = vmul.f32 0.6931472, %v2788_v37  ;;  %v461_v52 = vadd.f32 1.0, %v373_v13  ;;  %v462_v53 = vadd.f32 1.0, %v374_v35  ;;  %v483_v43 = vadd.f32 1.0, %v395_v36 }
  0x58   : > { %2563 = vmatmul.mubr.msk.bf16.vlgmr.msra.gmra.mrb[4].mxu1 %vm990_vm3, %v3099_v44  ;;  %v950_v26 = vsel %vm3054_vm1, %v682_v14, %v2526_v28  ;;  %v484_v50 = vadd.f32 1.0, %v396_v11  ;;  %v332_v46 = vunpack.c.h.bf16 %v3256_v12  ;;  %v2545_v54 = vcombine.low %v3197_v34, %v3207_v45 }
  0x59   : > { %1279 = vmatprep.subr.bf16.mxu1 %v950_v26  ;;  %v681_v17 = vpack.c.bf16 %v560_v48, %v516_v40  ;;  %2797 = vlog2.f32 %v462_v53  ;;  %v354_v55 = vunpack.c.h.bf16 %v3264_v23  ;;  %1311 = vmatprep.mubr.bf16.mxu1 %v2930_v0  ;;  %v331_v57 = vunpack.c.l.bf16 %v3256_v12  ;;  %v3314_v40 = vld [vmem:[%s2998_s26 + $0xe8] sm:$0xff]  ;;  %v3319_v26 = vld [vmem:[%s2998_s26 + $0x140] sm:$0x33] }
  0x5a   : > { %2799 = vlog2.f32 %v484_v50  ;;  %v420_v56 = vadd.f32 1.0, %v332_v46  ;;  %v353_v59 = vunpack.c.l.bf16 %v3264_v23  ;;  %v2548_v34 = vcombine.high %v3239_v27, %v3242_v31 }
  0x5b   : > { %v2790_v63 = vpop.eup %2789  ;;  %v949_v29 = vsel %vm3054_vm1, %v681_v17, %v2525_v42  ;;  %2801 = vlog2.f32 %v461_v52  ;;  %v442_v45 = vadd.f32 1.0, %v354_v55  ;;  %v419_v5 = vadd.f32 1.0, %v331_v57 }
  0x5c   : > { %v2792_v4 = vpop.eup %2791  ;;  %1280 = vmatpush1.bf16.msra.mxu1 %v949_v29  ;;  %v602_v2 = vmul.f32 0.6931472, %v2790_v63  ;;  %2803 = vlog2.f32 %v483_v43  ;;  %v441_v6 = vadd.f32 1.0, %v353_v59  ;;  %v334_v15 = vunpack.c.h.bf16 %v3280_v60 }
  0x5d   : > { %v2794_v8 = vpop.eup %2793  ;;  %v646_v9 = vmul.f32 0.6931472, %v2792_v4  ;;  %2805 = vlog2.f32 %v420_v56  ;;  %v356_v58 = vunpack.c.h.bf16 %v3283_v62  ;;  %v2547_v18 = vcombine.low %v3239_v27, %v3242_v31 }
  0x5e   : > { %v2796_v61 = vpop.eup %2795  ;;  %v600_v30 = vmul.f32 0.6931472, %v2794_v8  ;;  %2807 = vlog2.f32 %v442_v45  ;;  %v333_v19 = vunpack.c.l.bf16 %v3280_v60  ;;  %v422_v3 = vadd.f32 1.0, %v334_v15 }
  0x5f   : > { %v702_v21 = vpack.c.bf16 %v646_v9, %v602_v2  ;;  %v644_v22 = vmul.f32 0.6931472, %v2796_v61  ;;  %2809 = vlog2.f32 %v419_v5  ;;  %v444_v33 = vadd.f32 1.0, %v356_v58 }
  0x60   : > { %2811 = vlog2.f32 %v441_v6  ;;  %v355_v1 = vunpack.c.l.bf16 %v3283_v62  ;;  %v421_v25 = vadd.f32 1.0, %v333_v19  ;;  %v2528_v28 = vcombine.high %v3256_v12, %v3264_v23 }
  0x61   : > { %v970_v39 = vsel %vm3054_vm1, %v702_v21, %v2546_v51  ;;  %v701_v7 = vpack.c.bf16 %v644_v22, %v600_v30  ;;  %2813 = vlog2.f32 %v422_v3  ;;  %v375_v47 = vunpack.c.l.bf16 %v3295_v24 }
  0x62   : > { %v1026_v10 = vand.u32 %v3074_v20, %v970_v39  ;;  %2815 = vlog2.f32 %v444_v33  ;;  %v443_v16 = vadd.f32 1.0, %v355_v1  ;;  %v376_v35 = vunpack.c.h.bf16 %v3295_v24 }
  0x63   : > { %v2798_v41 = vpop.eup %2797  ;;  %v969_v13 = vsel %vm3054_vm1, %v701_v7, %v2545_v54  ;;  %2817 = vlog2.f32 %v421_v25  ;;  %v397_v36 = vunpack.c.l.bf16 %v3299_v32  ;;  %v398_v14 = vunpack.c.h.bf16 %v3299_v32 }
  0x64   : > { %v2800_v11 = vpop.eup %2799  ;;  %1238 = vmatprep.subr.bf16.mxu0 %v1026_v10  ;;  %v1023_v37 = vand.u32 %v3074_v20, %v969_v13  ;;  %v606_v38 = vmul.f32 0.6931472, %v2798_v41  ;;  %2819 = vlog2.f32 %v443_v16  ;;  %v2527_v51 = vcombine.low %v3256_v12, %v3264_v23  ;;  %v3348_v16 = vld [vmem:[%s2998_s26 + $0x40] sm:$0xff] }
  0x65   : > { %v2802_v42 = vpop.eup %2801  ;;  %v650_v48 = vmul.f32 0.6931472, %v2800_v11  ;;  %v463_v52 = vadd.f32 1.0, %v375_v47  ;;  %v464_v53 = vadd.f32 1.0, %v376_v35  ;;  %v2530_v46 = vcombine.high %v3280_v60, %v3283_v62  ;;  %v3351_v47 = vld [vmem:[%s2998_s26 + $0x98] sm:$0xff] }
  0x66   : > { %v2804_v43 = vpop.eup %2803  ;;  %1239 = vmatpush1.bf16.msra.mxu0 %v1023_v37  ;;  %v604_v50 = vmul.f32 0.6931472, %v2802_v42  ;;  %v485_v17 = vadd.f32 1.0, %v397_v36  ;;  %v486_v54 = vadd.f32 1.0, %v398_v14  ;;  %v377_v59 = vunpack.c.l.bf16 %v3314_v40 }
  0x67   : > { %v2806_v55 = vpop.eup %2805  ;;  %v704_v56 = vpack.c.bf16 %v650_v48, %v606_v38  ;;  %v648_v57 = vmul.f32 0.6931472, %v2804_v43  ;;  %2821 = vlog2.f32 %v464_v53  ;;  %v378_v45 = vunpack.c.h.bf16 %v3314_v40  ;;  %v3369_v48 = vld [vmem:[%s2998_s26 + $0x48] sm:$0xff]  ;;  %v3374_v43 = vld [vmem:[%s2998_s26 + $0xa0] sm:$0xff] }
  0x68   : > { %v2808_v63 = vpop.eup %2807  ;;  %v522_v29 = vmul.f32 0.6931472, %v2806_v55  ;;  %2823 = vlog2.f32 %v486_v54  ;;  %v399_v4 = vunpack.c.l.bf16 %v3319_v26  ;;  %v400_v61 = vunpack.c.h.bf16 %v3319_v26 }
  0x69   : > { %v2810_v2 = vpop.eup %2809  ;;  %v972_v5 = vsel %vm3054_vm1, %v704_v56, %v2548_v34  ;;  %v703_v6 = vpack.c.bf16 %v648_v57, %v604_v50  ;;  %2564 = vmatmul.mubr.msk.bf16.vlgmr.msra.gmra.mrb[8].mxu0 %vm990_vm3, %v3099_v44  ;;  %v566_v8 = vmul.f32 0.6931472, %v2808_v63  ;;  %2825 = vlog2.f32 %v463_v52 }
  0x6a   : > { %v2812_v9 = vpop.eup %2811  ;;  %v1032_v15 = vand.u32 %v3074_v20, %v972_v5  ;;  %v520_v58 = vmul.f32 0.6931472, %v2810_v2  ;;  %2827 = vlog2.f32 %v485_v17  ;;  %1354 = vmatprep.mubr.bf16.mxu0 %v2930_v0  ;;  %v465_v22 = vadd.f32 1.0, %v377_v59 }
  0x6b   : > { %v2814_v30 = vpop.eup %2813  ;;  %v971_v34 = vsel %vm3054_vm1, %v703_v6, %v2547_v18  ;;  %v684_v19 = vpack.c.bf16 %v566_v8, %v522_v29  ;;  %v564_v21 = vmul.f32 0.6931472, %v2812_v9  ;;  %v466_v25 = vadd.f32 1.0, %v378_v45 }
  0x6c   : > { %v2816_v3 = vpop.eup %2815  ;;  %1281 = vmatprep.subr.bf16.mxu1 %v1032_v15  ;;  %v1029_v33 = vand.u32 %v3074_v20, %v971_v34  ;;  %v526_v1 = vmul.f32 0.6931472, %v2814_v30  ;;  %v487_v39 = vadd.f32 1.0, %v399_v4  ;;  %v488_v10 = vadd.f32 1.0, %v400_v61 }
  0x6d   : > { %v2818_v7 = vpop.eup %2817  ;;  %v952_v27 = vsel %vm3054_vm1, %v684_v19, %v2528_v28  ;;  %v683_v31 = vpack.c.bf16 %v564_v21, %v520_v58  ;;  %v570_v18 = vmul.f32 0.6931472, %v2816_v3  ;;  %v2529_v35 = vcombine.low %v3280_v60, %v3283_v62  ;;  %v3390_v19 = vld [vmem:[%s2998_s26 + $0xf0] sm:$0xff] }
  0x6e   : > { %v2820_v41 = vpop.eup %2819  ;;  %1282 = vmatpush1.bf16.msra.mxu1 %v1029_v33  ;;  %1322 = vmatprep.subr.bf16.mxu0 %v952_v27  ;;  %v524_v13 = vmul.f32 0.6931472, %v2818_v7  ;;  %v2550_v12 = vcombine.high %v3295_v24, %v3299_v32  ;;  %2829 = vlog2.f32 %v466_v25  ;;  %v2549_v11 = vcombine.low %v3295_v24, %v3299_v32 }
  0x6f   : > { %v951_v23 = vsel %vm3054_vm1, %v683_v31, %v2527_v51  ;;  %v686_v28 = vpack.c.bf16 %v570_v18, %v526_v1  ;;  %v568_v36 = vmul.f32 0.6931472, %v2820_v41  ;;  %2831 = vlog2.f32 %v488_v10 }
  0x70   : > { %1323 = vmatpush1.bf16.msra.mxu0 %v951_v23  ;;  %2833 = vlog2.f32 %v465_v22  ;;  %v336_v37 = vunpack.c.h.bf16 %v3348_v16  ;;  %v358_v60 = vunpack.c.h.bf16 %v3351_v47  ;;  %v335_v42 = vunpack.c.l.bf16 %v3348_v16 }
  0x71   : > { %v2822_v62 = vpop.eup %2821  ;;  %2565 = vmatmul.mubr.msk.bf16.vlgmr.msra.gmra.mrb[8].mxu1 %vm990_vm3, %v3099_v44  ;;  %v954_v38 = vsel %vm3054_vm1, %v686_v28, %v2530_v46  ;;  %v685_v14 = vpack.c.bf16 %v568_v36, %v524_v13  ;;  %2835 = vlog2.f32 %v487_v39  ;;  %v357_v53 = vunpack.c.l.bf16 %v3351_v47 }
  0x72   : > { %v2824_v24 = vpop.eup %2823  ;;  %1365 = vmatprep.subr.bf16.mxu1 %v954_v38  ;;  %v610_v32 = vmul.f32 0.6931472, %v2822_v62  ;;  %v424_v51 = vadd.f32 1.0, %v336_v37  ;;  %v446_v52 = vadd.f32 1.0, %v358_v60  ;;  %1397 = vmatprep.mubr.bf16.mxu1 %v2930_v0  ;;  %v2552_v54 = vcombine.high %v3314_v40, %v3319_v26 }
  0x73   : > { %v2826_v50 = vpop.eup %2825  ;;  %v953_v46 = vsel %vm3054_vm1, %v685_v14, %v2529_v35  ;;  %v654_v17 = vmul.f32 0.6931472, %v2824_v24  ;;  %v423_v55 = vadd.f32 1.0, %v335_v42  ;;  %v445_v59 = vadd.f32 1.0, %v357_v53  ;;  %v3414_v42 = vld [vmem:[%s2998_s26 + $0x150] sm:$0x33] }
  0x74   : > { %v2828_v56 = vpop.eup %2827  ;;  %1366 = vmatpush1.bf16.msra.mxu1 %v953_v46  ;;  %v608_v57 = vmul.f32 0.6931472, %v2826_v50  ;;  %2837 = vlog2.f32 %v424_v51  ;;  %v338_v63 = vunpack.c.h.bf16 %v3369_v48  ;;  %v360_v4 = vunpack.c.h.bf16 %v3374_v43 }
  0x75   : > { %v706_v29 = vpack.c.bf16 %v654_v17, %v610_v32  ;;  %v652_v45 = vmul.f32 0.6931472, %v2828_v56  ;;  %2839 = vlog2.f32 %v446_v52  ;;  %v2551_v2 = vcombine.low %v3314_v40, %v3319_v26  ;;  %v3393_v40 = vld [vmem:[%s2998_s26 + $0x148] sm:$0x33] }
  0x76   : > { %2841 = vlog2.f32 %v423_v55  ;;  %v426_v5 = vadd.f32 1.0, %v338_v63  ;;  %v337_v6 = vunpack.c.l.bf16 %v3369_v48  ;;  %v448_v15 = vadd.f32 1.0, %v360_v4 }
  0x77   : > { %v974_v8 = vsel %vm3054_vm1, %v706_v29, %v2550_v12  ;;  %v705_v9 = vpack.c.bf16 %v652_v45, %v608_v57  ;;  %2843 = vlog2.f32 %v445_v59  ;;  %v359_v30 = vunpack.c.l.bf16 %v3374_v43  ;;  %v3405_v12 = vld [vmem:[%s2998_s26 + $0xf8] sm:$0xff] }
  0x78   : > { %v2830_v58 = vpop.eup %2829  ;;  %v1038_v61 = vand.u32 %v3074_v20, %v974_v8  ;;  %2845 = vlog2.f32 %v426_v5  ;;  %v425_v34 = vadd.f32 1.0, %v337_v6  ;;  %v2532_v3 = vcombine.high %v3348_v16, %v3351_v47  ;;  %v3428_v6 = vld [vmem:[%s2998_s26 + $0x50] sm:$0xff] }
  0x79   : > { %v2832_v26 = vpop.eup %2831  ;;  %v973_v21 = vsel %vm3054_vm1, %v705_v9, %v2549_v11  ;;  %v614_v22 = vmul.f32 0.6931472, %v2830_v58  ;;  %2847 = vlog2.f32 %v448_v15  ;;  %v447_v39 = vadd.f32 1.0, %v359_v30  ;;  %v3433_v30 = vld [vmem:[%s2998_s26 + $0xa8] sm:$0xff] }
  0x7a   : > { %v2834_v33 = vpop.eup %2833  ;;  %1324 = vmatprep.subr.bf16.mxu0 %v1038_v61  ;;  %v1035_v1 = vand.u32 %v3074_v20, %v973_v21  ;;  %v658_v25 = vmul.f32 0.6931472, %v2832_v26  ;;  %2849 = vlog2.f32 %v425_v34  ;;  %v379_v31 = vunpack.c.l.bf16 %v3390_v19 }
  0x7b   : > { %v2836_v7 = vpop.eup %2835  ;;  %v612_v27 = vmul.f32 0.6931472, %v2834_v33  ;;  %v380_v18 = vunpack.c.h.bf16 %v3390_v19  ;;  %v401_v10 = vunpack.c.l.bf16 %v3393_v40  ;;  %2851 = vlog2.f32 %v447_v39 }
  0x7c   : > { %1325 = vmatpush1.bf16.msra.mxu0 %v1035_v1  ;;  %v708_v41 = vpack.c.bf16 %v658_v25, %v614_v22  ;;  %v656_v13 = vmul.f32 0.6931472, %v2836_v7  ;;  %v402_v35 = vunpack.c.h.bf16 %v3393_v40  ;;  %v2531_v23 = vcombine.low %v3348_v16, %v3351_v47  ;;  %v3447_v7 = vld [vmem:[%s2998_s26 + $0x100] sm:$0xff] }
  0x7d   : > { %v2534_v28 = vcombine.high %v3369_v48, %v3374_v43  ;;  %v467_v36 = vadd.f32 1.0, %v379_v31  ;;  %v468_v11 = vadd.f32 1.0, %v380_v18  ;;  %v489_v38 = vadd.f32 1.0, %v401_v10 }
  0x7e   : > { %v2838_v37 = vpop.eup %2837  ;;  %v976_v60 = vsel %vm3054_vm1, %v708_v41, %v2552_v54  ;;  %v707_v62 = vpack.c.bf16 %v656_v13, %v612_v27  ;;  %v490_v14 = vadd.f32 1.0, %v402_v35  ;;  %v381_v47 = vunpack.c.l.bf16 %v3405_v12 }
  0x7f   : > { %v2840_v24 = vpop.eup %2839  ;;  %v1044_v32 = vand.u32 %v3074_v20, %v976_v60  ;;  %2566 = vmatmul.mubr.msk.bf16.vlgmr.msra.gmra.mrb[12].mxu0 %vm990_vm3, %v3099_v44  ;;  %v530_v16 = vmul.f32 0.6931472, %v2838_v37  ;;  %2853 = vlog2.f32 %v468_v11  ;;  %v382_v50 = vunpack.c.h.bf16 %v3405_v12 }
  0x80   : > { %v2842_v51 = vpop.eup %2841  ;;  %v975_v52 = vsel %vm3054_vm1, %v707_v62, %v2551_v2  ;;  %v574_v53 = vmul.f32 0.6931472, %v2840_v24  ;;  %2855 = vlog2.f32 %v490_v14  ;;  %1440 = vmatprep.mubr.bf16.mxu0 %v2930_v0  ;;  %v403_v55 = vunpack.c.l.bf16 %v3414_v42 }
  0x81   : > { %v2844_v46 = vpop.eup %2843  ;;  %1367 = vmatprep.subr.bf16.mxu1 %v1044_v32  ;;  %v1041_v17 = vand.u32 %v3074_v20, %v975_v52  ;;  %v528_v54 = vmul.f32 0.6931472, %v2842_v51  ;;  %2857 = vlog2.f32 %v467_v36  ;;  %v404_v63 = vunpack.c.h.bf16 %v3414_v42 }
  0x82   : > { %v2846_v56 = vpop.eup %2845  ;;  %v688_v57 = vpack.c.bf16 %v574_v53, %v530_v16  ;;  %v572_v59 = vmul.f32 0.6931472, %v2844_v46  ;;  %2859 = vlog2.f32 %v489_v38  ;;  %v469_v4 = vadd.f32 1.0, %v381_v47 }
  0x83   : > { %v2848_v29 = vpop.eup %2847  ;;  %1368 = vmatpush1.bf16.msra.mxu1 %v1041_v17  ;;  %v534_v45 = vmul.f32 0.6931472, %v2846_v56  ;;  %v470_v2 = vadd.f32 1.0, %v382_v50  ;;  %v491_v5 = vadd.f32 1.0, %v403_v55  ;;  %v492_v61 = vadd.f32 1.0, %v404_v63 }
  0x84   : > { %v2850_v8 = vpop.eup %2849  ;;  %v956_v9 = vsel %vm3054_vm1, %v688_v57, %v2532_v3  ;;  %v687_v15 = vpack.c.bf16 %v572_v59, %v528_v54  ;;  %v578_v58 = vmul.f32 0.6931472, %v2848_v29  ;;  %v2533_v26 = vcombine.low %v3369_v48, %v3374_v43 }
  0x85   : > { %1408 = vmatprep.subr.bf16.mxu0 %v956_v9  ;;  %v532_v34 = vmul.f32 0.6931472, %v2850_v8  ;;  %2861 = vlog2.f32 %v470_v2  ;;  %v2852_v21 = vpop.eup %2851  ;;  %v340_v33 = vunpack.c.h.bf16 %v3428_v6  ;;  %v2554_v25 = vcombine.high %v3390_v19, %v3393_v40 }
  0x86   : > { %v955_v22 = vsel %vm3054_vm1, %v687_v15, %v2531_v23  ;;  %2567 = vmatmul.mubr.msk.bf16.vlgmr.msra.gmra.mrb[12].mxu1 %vm990_vm3, %v3099_v44  ;;  %v690_v3 = vpack.c.bf16 %v578_v58, %v534_v45  ;;  %2863 = vlog2.f32 %v492_v61  ;;  %v576_v1 = vmul.f32 0.6931472, %v2852_v21  ;;  %v3459_v23 = vld [vmem:[%s2998_s26 + $0x158] sm:$0x33] }
  0x87   : > { %1409 = vmatpush1.bf16.msra.mxu0 %v955_v22  ;;  %2865 = vlog2.f32 %v469_v4  ;;  %v362_v39 = vunpack.c.h.bf16 %v3433_v30  ;;  %1483 = vmatprep.mubr.bf16.mxu1 %v2930_v0  ;;  %v428_v27 = vadd.f32 1.0, %v340_v33  ;;  %v339_v31 = vunpack.c.l.bf16 %v3428_v6 }
  0x88   : > { %v958_v44 = vsel %vm3054_vm1, %v690_v3, %v2534_v28  ;;  %2867 = vlog2.f32 %v491_v5  ;;  %v689_v10 = vpack.c.bf16 %v576_v1, %v532_v34  ;;  %v2553_v41 = vcombine.low %v3390_v19, %v3393_v40 }
  0x89   : > { %v2854_v18 = vpop.eup %2853  ;;  %1451 = vmatprep.subr.bf16.mxu1 %v958_v44  ;;  %v450_v13 = vadd.f32 1.0, %v362_v39  ;;  %v361_v35 = vunpack.c.l.bf16 %v3433_v30  ;;  %2869 = vlog2.f32 %v428_v27  ;;  %v427_v43 = vadd.f32 1.0, %v339_v31 }
  0x8a   : > { %v2856_v36 = vpop.eup %2855  ;;  %v618_v48 = vmul.f32 0.6931472, %v2854_v18  ;;  %v383_v28 = vunpack.c.l.bf16 %v3447_v7  ;;  %v957_v37 = vsel %vm3054_vm1, %v689_v10, %v2533_v26  ;;  %v384_v40 = vunpack.c.h.bf16 %v3447_v7 }
  0x8b   : > { %v2858_v11 = vpop.eup %2857  ;;  %v662_v60 = vmul.f32 0.6931472, %v2856_v36  ;;  %2871 = vlog2.f32 %v450_v13  ;;  %v449_v62 = vadd.f32 1.0, %v361_v35  ;;  %1452 = vmatpush1.bf16.msra.mxu1 %v957_v37  ;;  %v405_v14 = vunpack.c.l.bf16 %v3459_v23 }
  0x8c   : > { %v2860_v38 = vpop.eup %2859  ;;  %v616_v19 = vmul.f32 0.6931472, %v2858_v11  ;;  %2873 = vlog2.f32 %v427_v43  ;;  %v406_v16 = vunpack.c.h.bf16 %v3459_v23  ;;  %v471_v47 = vadd.f32 1.0, %v383_v28 }
  0x8d   : > { %v710_v24 = vpack.c.bf16 %v662_v60, %v618_v48  ;;  %v660_v32 = vmul.f32 0.6931472, %v2860_v38  ;;  %2875 = vlog2.f32 %v449_v62  ;;  %v472_v51 = vadd.f32 1.0, %v384_v40 }
  0x8e   : > { %v493_v46 = vadd.f32 1.0, %v405_v14  ;;  %v494_v17 = vadd.f32 1.0, %v406_v16  ;;  %v2556_v29 = vcombine.high %v3405_v12, %v3414_v42  ;;  %v2555_v9 = vcombine.low %v3405_v12, %v3414_v42  ;;  %v2889_v42 = vld [vmem:[%s3019_s5] sm:$0xff]  }
  0x8f   : > { %v2862_v52 = vpop.eup %2861  ;;  %v978_v53 = vsel %vm3054_vm1, %v710_v24, %v2554_v25  ;;  %v709_v50 = vpack.c.bf16 %v660_v32, %v616_v19  ;;  %2877 = vlog2.f32 %v472_v51  ;;  %v2536_v33 = vcombine.high %v3428_v6, %v3433_v30 }
  0x90   : > { %v2864_v54 = vpop.eup %2863  ;;  %v1050_v55 = vand.u32 %v3074_v20, %v978_v53  ;;  %v622_v56 = vmul.f32 0.6931472, %v2862_v52  ;;  %2879 = vlog2.f32 %v494_v17  ;;  %v2535_v31 = vcombine.low %v3428_v6, %v3433_v30 }
  0x91   : > { %v2866_v57 = vpop.eup %2865  ;;  %v977_v59 = vsel %vm3054_vm1, %v709_v50, %v2553_v41  ;;  %v666_v63 = vmul.f32 0.6931472, %v2864_v54  ;;  %2881 = vlog2.f32 %v471_v47  ;;  %v2558_v28 = vcombine.high %v3447_v7, %v3459_v23 }
  0x92   : > { %v2868_v45 = vpop.eup %2867  ;;  %1410 = vmatprep.subr.bf16.mxu0 %v1050_v55  ;;  %v1047_v4 = vand.u32 %v3074_v20, %v977_v59  ;;  %v620_v2 = vmul.f32 0.6931472, %v2866_v57  ;;  %2883 = vlog2.f32 %v493_v46  ;;  %v2557_v37 = vcombine.low %v3447_v7, %v3459_v23 }
  0x93   : > { %v712_v5 = vpack.c.bf16 %v666_v63, %v622_v56  ;;  %v664_v8 = vmul.f32 0.6931472, %v2868_v45  ;;  %v2870_v15 = vpop.eup %2869 }
  0x94   : > { %1411 = vmatpush1.bf16.msra.mxu0 %v1047_v4  ;;  %v538_v26 = vmul.f32 0.6931472, %v2870_v15 }
  0x95   : > { %v2872_v58 = vpop.eup %2871  ;;  %v980_v61 = vsel %vm3054_vm1, %v712_v5, %v2556_v29  ;;  %v711_v34 = vpack.c.bf16 %v664_v8, %v620_v2 }
  0x96   : > { %v2874_v21 = vpop.eup %2873  ;;  %v1056_v22 = vand.u32 %v3074_v20, %v980_v61  ;;  %v582_v3 = vmul.f32 0.6931472, %v2872_v58 }
  0x97   : > { %v2876_v1 = vpop.eup %2875  ;;  %v979_v12 = vsel %vm3054_vm1, %v711_v34, %v2555_v9  ;;  %2568 = vmatmul.mubr.msk.bf16.vlgmr.msra.gmra.mrb[16].mxu0 %vm990_vm3, %v2889_v42  ;;  %v536_v25 = vmul.f32 0.6931472, %v2874_v21 }
  0x98   : > { %1453 = vmatprep.subr.bf16.mxu1 %v1056_v22  ;;  %v1053_v39 = vand.u32 %v3074_v20, %v979_v12  ;;  %v692_v44 = vpack.c.bf16 %v582_v3, %v538_v26  ;;  %v580_v27 = vmul.f32 0.6931472, %v2876_v1  ;;  %1526 = vmatprep.mubr.bf16.mxu0 %v2930_v0 }
  0x99   : > { %v2878_v18 = vpop.eup %2877 }
  0x9a   : > { %1454 = vmatpush1.bf16.msra.mxu1 %v1053_v39  ;;  %v960_v10 = vsel %vm3054_vm1, %v692_v44, %v2536_v33  ;;  %v691_v41 = vpack.c.bf16 %v580_v27, %v536_v25  ;;  %v2880_v13 = vpop.eup %2879  ;;  %v626_v35 = vmul.f32 0.6931472, %v2878_v18 }
  0x9b   : > { %1494 = vmatprep.subr.bf16.mxu0 %v960_v10  ;;  %v2882_v36 = vpop.eup %2881  ;;  %v670_v43 = vmul.f32 0.6931472, %v2880_v13 }
  0x9c   : > { %v959_v48 = vsel %vm3054_vm1, %v691_v41, %v2535_v31  ;;  %v2884_v6 = vpop.eup %2883  ;;  %v624_v0 = vmul.f32 0.6931472, %v2882_v36 }
  0x9d   : > { %1495 = vmatpush1.bf16.msra.mxu0 %v959_v48  ;;  %2569 = vmatmul.mubr.msk.bf16.vlgmr.msra.gmra.mrb[16].mxu1 %vm990_vm3, %v2889_v42  ;;  %v714_v30 = vpack.c.bf16 %v670_v43, %v626_v35  ;;  %v668_v11 = vmul.f32 0.6931472, %v2884_v6 }
  0x9f   : > { %v982_v60 = vsel %vm3054_vm1, %v714_v30, %v2558_v28  ;;  %v713_v62 = vpack.c.bf16 %v668_v11, %v624_v0 }
  0xa0   : > { %v1062_v38 = vand.u32 %v3074_v20, %v982_v60 }
  0xa1   : > { %v981_v19 = vsel %vm3054_vm1, %v713_v62, %v2557_v37 }
  0xa2   : > { %1496 = vmatprep.subr.bf16.mxu0 %v1062_v38  ;;  %v1059_v40 = vand.u32 %v3074_v20, %v981_v19 }
  0xa4   : > { %1497 = vmatpush1.bf16.msra.mxu0 %v1059_v40 }
  0xa7   : > { %2570 = vmatmul.mubr.msk.bf16.vlgmr.msra.gmra.mrb[20].mxu0 %vm990_vm3, %v2889_v42 }
 0x10e   : > { %v3506_v14 = vpop.f32.mrb[0].mxu0 }
 0x10f   : > { %v3508_v24 = vpop.f32.mrb[1].mxu0 }
 0x110   : > { %v1537_v7 = vadd.f32 %v3508_v24, %v3506_v14  ;;  %v3512_v23 = vpop.f32.mrb[2].mxu0 }
 0x111   : > { %v3514_v32 = vpop.f32.mrb[3].mxu0 }
 0x112   : > { %v3516_v16 = vpop.f32.mrb[0].mxu1  ;;  %v1562_v49 = vadd.f32 %v3514_v32, %v3512_v23 }
 0x113   : > { %v1538_v20 = vadd.f32 %v1537_v7, %v3516_v16  ;;  %v3521_v47 = vpop.f32.mrb[1].mxu1 }
 0x114   : > { %v3523_v51 = vpop.f32.mrb[2].mxu1 }
 0x115   : > { %v1539_v52 = vadd.f32 %v1538_v20, %v3521_v47  ;;  %v1563_v53 = vadd.f32 %v1562_v49, %v3523_v51  ;;  %v3527_v50 = vpop.f32.mrb[3].mxu1 }
 0x117   : > { %v1564_v46 = vadd.f32 %v1563_v53, %v3527_v50 }
 0x127   : > { %v3530_v17 = vpop.f32.mrb[4].mxu0 }
 0x128   : > { %v1540_v54 = vadd.f32 %v1539_v52, %v3530_v17  ;;  %v3533_v55 = vpop.f32.mrb[5].mxu0 }
 0x129   : > { %v3535_v56 = vpop.f32.mrb[6].mxu0 }
 0x12a   : > { %v1541_v57 = vadd.f32 %v1540_v54, %v3533_v55  ;;  %v1565_v59 = vadd.f32 %v1564_v46, %v3535_v56  ;;  %v3539_v63 = vpop.f32.mrb[7].mxu0 }
 0x12b   : > { %v3541_v29 = vpop.f32.mrb[4].mxu1 }
 0x12c   : > { %v1542_v45 = vadd.f32 %v1541_v57, %v3541_v29  ;;  %v1566_v4 = vadd.f32 %v1565_v59, %v3539_v63  ;;  %v3545_v2 = vpop.f32.mrb[5].mxu1 }
 0x12d   : > { %v3547_v5 = vpop.f32.mrb[6].mxu1 }
 0x12e   : > { %v1543_v8 = vadd.f32 %v1542_v45, %v3545_v2  ;;  %v1567_v9 = vadd.f32 %v1566_v4, %v3547_v5  ;;  %v3551_v15 = vpop.f32.mrb[7].mxu1 }
 0x130   : > { %v1568_v58 = vadd.f32 %v1567_v9, %v3551_v15 }
 0x13c   : > { %v3554_v61 = vpop.f32.mrb[8].mxu0 }
 0x13d   : > { %v1544_v34 = vadd.f32 %v1543_v8, %v3554_v61  ;;  %v3557_v26 = vpop.f32.mrb[9].mxu0 }
 0x13e   : > { %v3559_v21 = vpop.f32.mrb[10].mxu0 }
 0x13f   : > { %v1545_v22 = vadd.f32 %v1544_v34, %v3557_v26  ;;  %v1569_v3 = vadd.f32 %v1568_v58, %v3559_v21  ;;  %v3563_v33 = vpop.f32.mrb[11].mxu0 }
 0x141   : > { %v1570_v1 = vadd.f32 %v1569_v3, %v3563_v33 }
 0x144   : > { %v3566_v12 = vpop.f32.mrb[8].mxu1 }
 0x145   : > { %v1546_v42 = vadd.f32 %v1545_v22, %v3566_v12  ;;  %v3569_v25 = vpop.f32.mrb[9].mxu1 }
 0x146   : > { %v3571_v39 = vpop.f32.mrb[10].mxu1 }
 0x147   : > { %v1547_v44 = vadd.f32 %v1546_v42, %v3569_v25  ;;  %v1571_v27 = vadd.f32 %v1570_v1, %v3571_v39  ;;  %v3575_v31 = vpop.f32.mrb[11].mxu1 }
 0x149   : > { %v1572_v18 = vadd.f32 %v1571_v27, %v3575_v31 }
 0x152   : > { %v3578_v10 = vpop.f32.mrb[12].mxu0 }
 0x153   : > { %v1548_v41 = vadd.f32 %v1547_v44, %v3578_v10  ;;  %v3581_v13 = vpop.f32.mrb[13].mxu0 }
 0x154   : > { %v3583_v35 = vpop.f32.mrb[14].mxu0 }
 0x155   : > { %v1549_v36 = vadd.f32 %v1548_v41, %v3581_v13  ;;  %v1573_v48 = vadd.f32 %v1572_v18, %v3583_v35  ;;  %v3587_v43 = vpop.f32.mrb[15].mxu0 }
 0x157   : > { %v1574_v28 = vadd.f32 %v1573_v48, %v3587_v43 }
 0x159   : > { %v3590_v6 = vpop.f32.mrb[12].mxu1 }
 0x15a   : > { %v1550_v0 = vadd.f32 %v1549_v36, %v3590_v6  ;;  %v3593_v30 = vpop.f32.mrb[13].mxu1 }
 0x15b   : > { %v3595_v11 = vpop.f32.mrb[14].mxu1 }
 0x15c   : > { %v1551_v37 = vadd.f32 %v1550_v0, %v3593_v30  ;;  %v1575_v60 = vadd.f32 %v1574_v28, %v3595_v11  ;;  %v3599_v62 = vpop.f32.mrb[15].mxu1 }
 0x15e   : > { %v1576_v38 = vadd.f32 %v1575_v60, %v3599_v62 }
 0x16a   : > { %v3602_v19 = vpop.f32.mrb[16].mxu0 }
 0x16b   : > { %v1552_v40 = vadd.f32 %v1551_v37, %v3602_v19  ;;  %v3605_v7 = vpop.f32.mrb[17].mxu0 }
 0x16c   : > { %v3607_v49 = vpop.f32.mrb[18].mxu0 }
 0x16d   : > { %v1553_v20 = vadd.f32 %v1552_v40, %v3605_v7  ;;  %v1577_v52 = vadd.f32 %v1576_v38, %v3607_v49  ;;  %v3611_v53 = vpop.f32.mrb[19].mxu0 }
 0x16f   : > { %v1578_v46 = vadd.f32 %v1577_v52, %v3611_v53 }
 0x170   : > { %v3614_v54 = vpop.f32.mrb[16].mxu1 }
 0x171   : > { %v1554_v57 = vadd.f32 %v1553_v20, %v3614_v54  ;;  %v3617_v59 = vpop.f32.mrb[17].mxu1 }
 0x172   : > { %v3619_v45 = vpop.f32.mrb[18].mxu1 }
 0x173   : > { %v1555_v4 = vadd.f32 %v1554_v57, %v3617_v59  ;;  %v1579_v8 = vadd.f32 %v1578_v46, %v3619_v45  ;;  %v3623_v9 = vpop.f32.mrb[19].mxu1 }
 0x175   : > { %v1580_v58 = vadd.f32 %v1579_v8, %v3623_v9 }
 0x17a   : > { %v3626_v34 = vpop.f32.mrb[20].mxu0 }
 0x17b   : > { %v1556_v22 = vadd.f32 %v1555_v4, %v3626_v34  ;;  %v3629_v3 = vpop.f32.mrb[21].mxu0 }
 0x17c   : > { %v3631_v1 = vpop.f32.mrb[22].mxu0  ;;  %v1558_v42 = vsel %vm1557_vm4, %v3629_v3, 0.0 }
 0x17d   : > { %v1581_v44 = vadd.f32 %v1580_v58, %v3631_v1  ;;  %v3636_v27 = vpop.f32.mrb[23].mxu0  ;;  %v1559_v18 = vadd.f32 %v1558_v42, %v1556_v22 }
 0x17e   : > { %v1582_v41 = vsel %vm1557_vm4, %v3636_v27, 0.0 }
 0x17f   : > { %1560 = vadd.xlane.f32.xlu0 %v1559_v18  ;;  %v1583_v36 = vadd.f32 %v1582_v41, %v1581_v44 }
 0x183   : > { %1584 = vadd.xlane.f32.xlu0 %v1583_v36 }
 0x20c   : > { %v1561_v48 = vpop.xlane.xlu0 %1560 }
 0x20d   : > { %v3640_v28 = vmul.f32 0.0003644315, %v1561_v48 }
 0x20f   : > { %v3644_v0 = vsub.f32 %v3506_v14, %v3640_v28  ;;  %v3648_v37 = vsub.f32 %v3508_v24, %v3640_v28  ;;  %v3652_v60 = vsub.f32 %v3516_v16, %v3640_v28  ;;  %v3660_v52 = vsub.f32 %v3521_v47, %v3640_v28 }
 0x210   : > { %v1585_v20 = vpop.xlane.xlu0 %1584  ;;  %v3664_v14 = vsub.f32 %v3530_v17, %v3640_v28  ;;  %v3672_v57 = vsub.f32 %v3533_v55, %v3640_v28  ;;  %v3678_v47 = vsub.f32 %v3541_v29, %v3640_v28  ;;  %v3692_v42 = vsub.f32 %v3545_v2, %v3640_v28 }
 0x211   : > { %v1633_v38 = vmul.f32 %v3644_v0, %v3644_v0  ;;  %v1634_v40 = vmul.f32 %v3648_v37, %v3648_v37  ;;  %v1635_v24 = vmul.f32 %v3652_v60, %v3652_v60  ;;  %v3668_v46 = vmul.f32 0.0003644315, %v1585_v20 }
 0x212   : > { %v1636_v4 = vmul.f32 %v3660_v52, %v3660_v52  ;;  %v1637_v17 = vmul.f32 %v3664_v14, %v3664_v14  ;;  %v1638_v29 = vmul.f32 %v3672_v57, %v3672_v57  ;;  %v3698_v18 = vsub.f32 %v3554_v61, %v3640_v28 }
 0x213   : > { %v1677_v16 = vadd.f32 %v1634_v40, %v1633_v38  ;;  %v3684_v22 = vsub.f32 %v3512_v23, %v3668_v46  ;;  %v3688_v55 = vsub.f32 %v3514_v32, %v3668_v46  ;;  %v1639_v23 = vmul.f32 %v3678_v47, %v3678_v47 }
 0x214   : > { %v3704_v32 = vsub.f32 %v3523_v51, %v3668_v46  ;;  %v3712_v48 = vsub.f32 %v3557_v26, %v3640_v28  ;;  %v1640_v61 = vmul.f32 %v3692_v42, %v3692_v42  ;;  %v3718_v40 = vsub.f32 %v3527_v50, %v3668_v46 }
 0x215   : > { %v1678_v8 = vadd.f32 %v1677_v16, %v1635_v24  ;;  %4523 = vst [vmem:[#allocation2_spill] sm:$0xff] %v3684_v22  ;;  %4524 = vst [vmem:[#allocation3_spill] sm:$0xff] %v3688_v55  ;;  %v1655_v2 = vmul.f32 %v3684_v22, %v3684_v22  ;;  %v1656_v36 = vmul.f32 %v3688_v55, %v3688_v55 }
 0x216   : > { %4525 = vst [vmem:[#allocation4_spill] sm:$0xff] %v3704_v32  ;;  %4526 = vst [vmem:[#allocation5_spill] sm:$0xff] %v3718_v40  ;;  %v3722_v51 = vsub.f32 %v3566_v12, %v3640_v28  ;;  %v1641_v20 = vmul.f32 %v3698_v18, %v3698_v18  ;;  %v3728_v26 = vsub.f32 %v3535_v56, %v3668_v46 }
 0x217   : > { %v1679_v58 = vadd.f32 %v1678_v8, %v1636_v4  ;;  %v1657_v16 = vmul.f32 %v3704_v32, %v3704_v32  ;;  %v1701_v4 = vadd.f32 %v1656_v36, %v1655_v2  ;;  %v3734_v50 = vsub.f32 %v3569_v25, %v3640_v28 }
 0x218   : > { %4527 = vst [vmem:[#allocation6_spill] sm:$0xff] %v3728_v26  ;;  %v1642_v12 = vmul.f32 %v3712_v48, %v3712_v48  ;;  %v1658_v56 = vmul.f32 %v3718_v40, %v3718_v40  ;;  %v1643_v25 = vmul.f32 %v3722_v51, %v3722_v51  ;;  %v3758_v2 = vsub.f32 %v3581_v13, %v3640_v28 }
 0x219   : > { %v1680_v44 = vadd.f32 %v1679_v58, %v1637_v17  ;;  %v3740_v17 = vsub.f32 %v3539_v63, %v3668_v46  ;;  %v1702_v58 = vadd.f32 %v1701_v4, %v1657_v16  ;;  %v1659_v63 = vmul.f32 %v3728_v26, %v3728_v26 }
 0x21a   : > { %v3776_v16 = vsub.f32 %v3559_v21, %v3668_v46 }
 0x21b   : > { %v1681_v41 = vadd.f32 %v1680_v44, %v1638_v29  ;;  %4528 = vst [vmem:[#allocation7_spill] sm:$0xff] %v3740_v17  ;;  %v3746_v29 = vsub.f32 %v3578_v10, %v3640_v28  ;;  %v1644_v10 = vmul.f32 %v3734_v50, %v3734_v50 }
 0x21c   : > { %4531 = vst [vmem:[#allocation10_spill] sm:$0xff] %v3776_v16 }
 0x21d   : > { %v1682_v38 = vadd.f32 %v1681_v41, %v1639_v23  ;;  %v3752_v23 = vsub.f32 %v3547_v5, %v3668_v46  ;;  %v1703_v41 = vadd.f32 %v1702_v58, %v1658_v56  ;;  %v1660_v5 = vmul.f32 %v3740_v17, %v3740_v17 }
 0x21e   : > { %v1645_v13 = vmul.f32 %v3746_v29, %v3746_v29  ;;  %v3788_v56 = vsub.f32 %v3563_v33, %v3668_v46  ;;  %v1663_v33 = vmul.f32 %v3776_v16, %v3776_v16 }
 0x21f   : > { %v1683_v24 = vadd.f32 %v1682_v38, %v1640_v61  ;;  %4529 = vst [vmem:[#allocation8_spill] sm:$0xff] %v3752_v23  ;;  %v3764_v61 = vsub.f32 %v3551_v15, %v3668_v46  ;;  %v1704_v38 = vadd.f32 %v1703_v41, %v1659_v63  ;;  %v1661_v15 = vmul.f32 %v3752_v23, %v3752_v23  ;;  %v1937_v23 = vld [vmem:[%s264_s15 + $0x10] sm:$0x3f] }
 0x220   : > { %4532 = vst [vmem:[#allocation11_spill] sm:$0xff] %v3788_v56  ;;  %v3800_v63 = vsub.f32 %v3571_v39, %v3668_v46  ;;  %v1664_v39 = vmul.f32 %v3788_v56, %v3788_v56 }
 0x221   : > { %v1684_v8 = vadd.f32 %v1683_v24, %v1641_v20  ;;  %4530 = vst [vmem:[#allocation9_spill] sm:$0xff] %v3764_v61  ;;  %v3770_v20 = vsub.f32 %v3590_v6, %v3640_v28  ;;  %v1705_v4 = vadd.f32 %v1704_v38, %v1660_v5  ;;  %v1646_v6 = vmul.f32 %v3758_v2, %v3758_v2 }
 0x222   : > { %v1662_v21 = vmul.f32 %v3764_v61, %v3764_v61  ;;  %4533 = vst [vmem:[#allocation12_spill] sm:$0xff] %v3800_v63  ;;  %v3812_v5 = vsub.f32 %v3575_v31, %v3668_v46  ;;  %v1665_v31 = vmul.f32 %v3800_v63, %v3800_v63 }
 0x223   : > { %v1685_v44 = vadd.f32 %v1684_v8, %v1642_v12  ;;  %v3782_v12 = vsub.f32 %v3593_v30, %v3640_v28  ;;  %v1706_v58 = vadd.f32 %v1705_v4, %v1661_v15  ;;  %v1647_v30 = vmul.f32 %v3770_v20, %v3770_v20 }
 0x224   : > { %4534 = vst [vmem:[#allocation13_spill] sm:$0xff] %v3812_v5  ;;  %v3824_v15 = vsub.f32 %v3583_v35, %v3668_v46  ;;  %v3840_v35 = vsub.f32 %v3587_v43, %v3668_v46 }
 0x225   : > { %v1686_v36 = vadd.f32 %v1685_v44, %v1643_v25  ;;  %v3794_v25 = vsub.f32 %v3602_v19, %v3640_v28  ;;  %v1707_v41 = vadd.f32 %v1706_v58, %v1662_v21  ;;  %v1648_v19 = vmul.f32 %v3782_v12, %v3782_v12 }
 0x226   : > { %4535 = vst [vmem:[#allocation14_spill] sm:$0xff] %v3824_v15  ;;  %v3836_v21 = vsub.f32 %v3629_v3, %v3640_v28  ;;  %4536 = vst [vmem:[#allocation15_spill] sm:$0xff] %v3840_v35  ;;  %v1666_v58 = vmul.f32 %v3812_v5, %v3812_v5  ;;  %v3852_v3 = vsub.f32 %v3595_v11, %v3668_v46  ;;  %v1936_v5 = vld [vmem:[%s264_s15 + $0x8] sm:$0xff] }
 0x227   : > { %v1687_v24 = vadd.f32 %v1686_v36, %v1644_v10  ;;  %v3806_v10 = vsub.f32 %v3605_v7, %v3640_v28  ;;  %v1708_v38 = vadd.f32 %v1707_v41, %v1663_v33  ;;  %v1649_v7 = vmul.f32 %v3794_v25, %v3794_v25 }
 0x228   : > { %4537 = vst [vmem:[#allocation16_spill] sm:$0xff] %v3852_v3  ;;  %v1667_v43 = vmul.f32 %v3824_v15, %v3824_v15 }
 0x229   : > { %v1688_v8 = vadd.f32 %v1687_v24, %v1645_v13  ;;  %v3818_v13 = vsub.f32 %v3614_v54, %v3640_v28  ;;  %v1709_v4 = vadd.f32 %v1708_v38, %v1664_v39  ;;  %v1650_v54 = vmul.f32 %v3806_v10, %v3806_v10 }
 0x22a   : > { %v1668_v39 = vmul.f32 %v3840_v35, %v3840_v35 }
 0x22b   : > { %v1689_v44 = vadd.f32 %v1688_v8, %v1646_v6  ;;  %v3830_v6 = vsub.f32 %v3617_v59, %v3640_v28  ;;  %v3846_v59 = vsub.f32 %v3626_v34, %v3640_v28  ;;  %v1654_v34 = vmul.f32 %v3836_v21, %v3836_v21 }
 0x22c   : > { %v3862_v28 = vsub.f32 %v3599_v62, %v3668_v46 }
 0x22d   : > { %v1690_v36 = vadd.f32 %v1689_v44, %v1647_v30  ;;  %v1710_v30 = vadd.f32 %v1709_v4, %v1665_v31  ;;  %v1651_v44 = vmul.f32 %v3818_v13, %v3818_v13  ;;  %v1653_v38 = vmul.f32 %v3846_v59, %v3846_v59 }
 0x22e   : > { %4538 = vst [vmem:[#allocation17_spill] sm:$0xff] %v3862_v28  ;;  %v1669_v31 = vmul.f32 %v3852_v3, %v3852_v3  ;;  %v1697_v62 = vsel %vm1557_vm4, %v1654_v34, 0.0 }
 0x22f   : > { %v1691_v24 = vadd.f32 %v1690_v36, %v1648_v19  ;;  %v1711_v41 = vadd.f32 %v1710_v30, %v1666_v58  ;;  %v1652_v19 = vmul.f32 %v3830_v6, %v3830_v6  ;;  %v1670_v58 = vmul.f32 %v3862_v28, %v3862_v28 }
 0x231   : > { %v1692_v8 = vadd.f32 %v1691_v24, %v1649_v7  ;;  %v1712_v11 = vadd.f32 %v1711_v41, %v1667_v43  ;;  %v3870_v24 = vsub.f32 %v3607_v49, %v3668_v46  ;;  %v3883_v49 = vsub.f32 %v3619_v45, %v3668_v46 }
 0x232   : > { %v3889_v41 = vsub.f32 %v3623_v9, %v3668_v46  ;;  %v3899_v45 = vsub.f32 %v3631_v1, %v3668_v46 }
 0x233   : > { %v1693_v33 = vadd.f32 %v1692_v8, %v1650_v54  ;;  %4539 = vst [vmem:[#allocation18_spill] sm:$0xff] %v3870_v24  ;;  %v1713_v4 = vadd.f32 %v1712_v11, %v1668_v39  ;;  %v3877_v8 = vsub.f32 %v3611_v53, %v3668_v46  ;;  %4541 = vst [vmem:[#allocation20_spill] sm:$0xff] %v3883_v49 }
 0x234   : > { %4542 = vst [vmem:[#allocation21_spill] sm:$0xff] %v3889_v41  ;;  %4544 = vst [vmem:[#allocation23_spill] sm:$0xff] %v3899_v45  ;;  %v1673_v34 = vmul.f32 %v3883_v49, %v3883_v49  ;;  %v1674_v9 = vmul.f32 %v3889_v41, %v3889_v41  ;;  %v1935_v49 = vld [vmem:[%s264_s15] sm:$0xff] }
 0x235   : > { %v1694_v36 = vadd.f32 %v1693_v33, %v1651_v44  ;;  %4540 = vst [vmem:[#allocation19_spill] sm:$0xff] %v3877_v8  ;;  %v1714_v30 = vadd.f32 %v1713_v4, %v1669_v31  ;;  %v1671_v33 = vmul.f32 %v3870_v24, %v3870_v24  ;;  %v1672_v53 = vmul.f32 %v3877_v8, %v3877_v8 }
 0x237   : > { %v1695_v7 = vadd.f32 %v1694_v36, %v1652_v19  ;;  %v1715_v43 = vadd.f32 %v1714_v30, %v1670_v58  ;;  %v3895_v36 = vsub.f32 %v3636_v27, %v3668_v46  ;;  %v1781_v46 = vlaneseq }
 0x239   : > { %v1696_v54 = vadd.f32 %v1695_v7, %v1653_v38  ;;  %v1716_v19 = vadd.f32 %v1715_v43, %v1671_v33  ;;  %4543 = vst [vmem:[#allocation22_spill] sm:$0xff] %v3895_v36  ;;  %v1676_v38 = vmul.f32 %v3895_v36, %v3895_v36  ;;  %v1675_v7 = vmul.f32 %v3899_v45, %v3899_v45  ;;  %v1775_v43 = vld [vmem:[%s260_s12] sm:$0xff] }
 0x23b   : > { %v1698_v44 = vadd.f32 %v1697_v62, %v1696_v54  ;;  %v1717_v39 = vadd.f32 %v1716_v19, %v1672_v53  ;;  %v1721_v4 = vsel %vm1557_vm4, %v1676_v38, 0.0  ;;  %v1782_v54 = vshrl.u32 %v1781_v46, 7  ;;  %v1776_v38 = vld [vmem:[%s260_s12 + $0x8] sm:$0xff] }
 0x23c   : > { %vm2370_vm4 = vcmask 457732  }
 0x23d   : > { %1699 = vadd.xlane.f32.xlu1 %v1698_v44  ;;  %v1718_v11 = vadd.f32 %v1717_v39, %v1673_v34  ;;  %v1783_v58 = vsub.s32 0, %v1782_v54  ;;  %v1787_v30 = vsub.s32 1, %v1782_v54  ;;  %v1791_v44 = vsub.s32 2, %v1782_v54 }
 0x23e   : > { %v1795_v53 = vsub.s32 3, %v1782_v54  ;;  %v1799_v19 = vsub.s32 4, %v1782_v54  ;;  %v1803_v34 = vsub.s32 5, %v1782_v54  ;;  %v1807_v39 = vsub.s32 6, %v1782_v54 }
 0x23f   : > { %v1719_v27 = vadd.f32 %v1718_v11, %v1674_v9  ;;  %v1811_v9 = vsub.s32 7, %v1782_v54  ;;  %v3933_v36 = vrot.slane %v1776_v38, %v1783_v58  ;;  %v3935_v45 = vrot.slane %v1776_v38, %v1787_v30 }
 0x240   : > { %v3925_v46 = vrot.slane %v1775_v43, %v1799_v19  ;;  %v3929_v54 = vrot.slane %v1775_v43, %v1807_v39  ;;  %v3937_v41 = vrot.slane %v1776_v38, %v1791_v44  ;;  %v3939_v8 = vrot.slane %v1776_v38, %v1795_v53 }
 0x241   : > { %v1720_v31 = vadd.f32 %v1719_v27, %v1675_v7  ;;  %v3917_v7 = vrot.slane %v1775_v43, %v1783_v58  ;;  %v3919_v27 = vrot.slane %v1775_v43, %v1787_v30  ;;  %v3943_v24 = vrot.slane %v1776_v38, %v1803_v34 }
 0x242   : > { %v3945_v28 = vrot.slane %v1776_v38, %v1807_v39  ;;  %v3947_v3 = vrot.slane %v1776_v38, %v1811_v9  ;;  %v3961_v61 = vrot.slane %v1935_v49, %v1783_v58  ;;  %v3963_v17 = vrot.slane %v1935_v49, %v1787_v30 }
 0x243   : > { %v1722_v1 = vadd.f32 %v1721_v4, %v1720_v31  ;;  %v3921_v31 = vrot.slane %v1775_v43, %v1791_v44  ;;  %v1777_v4 = vld [vmem:[%s260_s12 + $0x10] sm:$0x3f]  ;;  %4546 = vst [vmem:[#allocation25_spill] sm:$0xff] %v3943_v24  ;;  %v3967_v26 = vrot.slane %v1935_v49, %v1795_v53  ;;  %v3969_v40 = vrot.slane %v1935_v49, %v1799_v19 }
 0x244   : > { %4547 = vst [vmem:[#allocation26_spill] sm:$0xff] %v3945_v28  ;;  %v3949_v35 = vrot.slane %v1777_v4, %v1783_v58  ;;  %v3953_v15 = vrot.slane %v1777_v4, %v1791_v44  ;;  %v3955_v63 = vrot.slane %v1777_v4, %v1795_v53  ;;  %v3957_v56 = vrot.slane %v1777_v4, %v1799_v19 }
 0x245   : > { %1723 = vadd.xlane.f32.xlu1 %v1722_v1  ;;  %v3923_v1 = vrot.slane %v1775_v43, %v1795_v53  ;;  %v3959_v16 = vrot.slane %v1777_v4, %v1803_v34  ;;  %4552 = vst [vmem:[#allocation31_spill] sm:$0xff] %v3961_v61  ;;  %4553 = vst [vmem:[#allocation32_spill] sm:$0xff] %v3963_v17  ;;  %v3971_v32 = vrot.slane %v1935_v49, %v1803_v34 }
 0x246   : > { %4548 = vst [vmem:[#allocation27_spill] sm:$0xff] %v3949_v35  ;;  %4549 = vst [vmem:[#allocation28_spill] sm:$0xff] %v3955_v63  ;;  %v3973_v55 = vrot.slane %v1935_v49, %v1807_v39  ;;  %v3975_v22 = vrot.slane %v1935_v49, %v1811_v9  ;;  %v3981_v61 = vrot.slane %v1936_v5, %v1791_v44 }
 0x247   : > { %4550 = vst [vmem:[#allocation29_spill] sm:$0xff] %v3957_v56  ;;  %4551 = vst [vmem:[#allocation30_spill] sm:$0xff] %v3959_v16  ;;  %v3977_v56 = vrot.slane %v1936_v5, %v1783_v58  ;;  %v3983_v16 = vrot.slane %v1936_v5, %v1795_v53  ;;  %v3985_v17 = vrot.slane %v1936_v5, %v1799_v19 }
 0x248   : > { %4555 = vst [vmem:[#allocation34_spill] sm:$0xff] %v3967_v26  ;;  %4556 = vst [vmem:[#allocation35_spill] sm:$0xff] %v3969_v40  ;;  %v3987_v26 = vrot.slane %v1936_v5, %v1803_v34  ;;  %v3989_v40 = vrot.slane %v1936_v5, %v1807_v39 }
 0x249   : > { %4557 = vst [vmem:[#allocation36_spill] sm:$0xff] %v3971_v32  ;;  %4558 = vst [vmem:[#allocation37_spill] sm:$0xff] %v3973_v55  ;;  %v3991_v32 = vrot.slane %v1936_v5, %v1811_v9  ;;  %v3993_v55 = vrot.slane %v1937_v23, %v1783_v58 }
 0x24a   : > { %4559 = vst [vmem:[#allocation38_spill] sm:$0xff] %v3975_v22  ;;  %4560 = vst [vmem:[#allocation39_spill] sm:$0xff] %v3977_v56  ;;  %v3995_v22 = vrot.slane %v1937_v23, %v1787_v30  ;;  %v3997_v56 = vrot.slane %v1937_v23, %v1791_v44 }
 0x24b   : > { %4562 = vst [vmem:[#allocation41_spill] sm:$0xff] %v3981_v61  ;;  %4563 = vst [vmem:[#allocation42_spill] sm:$0xff] %v3983_v16  ;;  %v4001_v61 = vrot.slane %v1937_v23, %v1799_v19  ;;  %v4003_v16 = vrot.slane %v1937_v23, %v1803_v34 }
 0x24c   : > { %4564 = vst [vmem:[#allocation43_spill] sm:$0xff] %v3985_v17  ;;  %4565 = vst [vmem:[#allocation44_spill] sm:$0xff] %v3987_v26 }
 0x24d   : > { %4566 = vst [vmem:[#allocation45_spill] sm:$0xff] %v3989_v40  ;;  %4567 = vst [vmem:[#allocation46_spill] sm:$0xff] %v3991_v32 }
 0x24e   : > { %4568 = vst [vmem:[#allocation47_spill] sm:$0xff] %v3993_v55  ;;  %4569 = vst [vmem:[#allocation48_spill] sm:$0xff] %v3995_v22 }
 0x24f   : > { %4570 = vst [vmem:[#allocation49_spill] sm:$0xff] %v3997_v56  ;;  %4572 = vst [vmem:[#allocation51_spill] sm:$0xff] %v4001_v61 }
 0x250   : > { %4573 = vst [vmem:[#allocation52_spill] sm:$0xff] %v4003_v16 }
 0x2ca   : > { %v1700_v62 = vpop.xlane.xlu1 %1699 }
 0x2cb   : > { %v1725_v33 = vmul.f32 0.0003644315, %v1700_v62  ;;  %v3927_v62 = vrot.slane %v1775_v43, %v1803_v34 }
 0x2cd   : > { %v1727_v11 = vadd.f32 1e-05, %v1725_v33  ;;  %v3931_v33 = vrot.slane %v1775_v43, %v1811_v9  ;;  %v3951_v43 = vrot.slane %v1777_v4, %v1787_v30  ;;  %v3979_v4 = vrot.slane %v1936_v5, %v1787_v30 }
 0x2cf   : > { %2885 = vrsqrt.f32 %v1727_v11  ;;  %v3941_v11 = vrot.slane %v1776_v38, %v1799_v19  ;;  %v3965_v38 = vrot.slane %v1935_v49, %v1791_v44  ;;  %4561 = vst [vmem:[#allocation40_spill] sm:$0xff] %v3979_v4  ;;  %v3999_v4 = vrot.slane %v1937_v23, %v1795_v53 }
 0x2d1   : > { %4545 = vst [vmem:[#allocation24_spill] sm:$0xff] %v3941_v11  ;;  %4554 = vst [vmem:[#allocation33_spill] sm:$0xff] %v3965_v38 }
 0x2d2   : > { %v1724_v38 = vpop.xlane.xlu1 %1723  ;;  %4571 = vst [vmem:[#allocation50_spill] sm:$0xff] %v3999_v4 }
 0x2d3   : > { %v4007_v40 = vmul.f32 0.0003644315, %v1724_v38 }
 0x2d9   : > { %v2886_v49 = vpop.eup %2885 }
 0x2da   : > { %v1731_v17 = vmul.f32 %v2886_v49, %v3644_v0  ;;  %v1732_v39 = vmul.f32 %v2886_v49, %v3648_v37  ;;  %v1733_v5 = vmul.f32 %v2886_v49, %v3652_v60  ;;  %v1734_v58 = vmul.f32 %v2886_v49, %v3660_v52 }
 0x2db   : > { %v1735_v30 = vmul.f32 %v2886_v49, %v3664_v14  ;;  %v1736_v44 = vmul.f32 %v2886_v49, %v3672_v57  ;;  %v1737_v53 = vmul.f32 %v2886_v49, %v3678_v47  ;;  %v1738_v19 = vmul.f32 %v2886_v49, %v3692_v42 }
 0x2dc   : > { %v1739_v23 = vmul.f32 %v2886_v49, %v3698_v18  ;;  %v1740_v0 = vmul.f32 %v2886_v49, %v3712_v48  ;;  %v1741_v37 = vmul.f32 %v2886_v49, %v3722_v51  ;;  %v1742_v34 = vmul.f32 %v2886_v49, %v3734_v50 }
 0x2dd   : > { %v1743_v60 = vmul.f32 %v2886_v49, %v3746_v29  ;;  %v1744_v52 = vmul.f32 %v2886_v49, %v3758_v2  ;;  %v1745_v14 = vmul.f32 %v2886_v49, %v3770_v20  ;;  %v1746_v57 = vmul.f32 %v2886_v49, %v3782_v12 }
 0x2de   : > { %v1747_v47 = vmul.f32 %v2886_v49, %v3794_v25  ;;  %v1748_v42 = vmul.f32 %v2886_v49, %v3806_v10  ;;  %v1749_v18 = vmul.f32 %v2886_v49, %v3818_v13  ;;  %v1750_v48 = vmul.f32 %v2886_v49, %v3830_v6 }
 0x2df   : > { %v1751_v51 = vmul.f32 %v2886_v49, %v3846_v59  ;;  %v1752_v50 = vmul.f32 %v2886_v49, %v3836_v21  ;;  %v1891_v29 = vmul.f32 %v3917_v7, %v1731_v17  ;;  %v1892_v2 = vmul.f32 %v3919_v27, %v1732_v39 }
 0x2e0   : > { %v1893_v20 = vmul.f32 %v3921_v31, %v1733_v5  ;;  %v1894_v12 = vmul.f32 %v3923_v1, %v1734_v58  ;;  %v1895_v25 = vmul.f32 %v3925_v46, %v1735_v30  ;;  %v1896_v10 = vmul.f32 %v3927_v62, %v1736_v44 }
 0x2e1   : > { %v1897_v13 = vmul.f32 %v3929_v54, %v1737_v53  ;;  %v1898_v6 = vmul.f32 %v3931_v33, %v1738_v19  ;;  %v1899_v59 = vmul.f32 %v3933_v36, %v1739_v23  ;;  %v1900_v21 = vmul.f32 %v3935_v45, %v1740_v0  ;;  %v4574_v19 = vld [vmem:[#allocation29_spill] sm:$0xff]  ;;  %v4575_v0 = vld [vmem:[#allocation30_spill] sm:$0xff] }
 0x2e2   : > { %v1901_v17 = vmul.f32 %v3937_v41, %v1741_v37  ;;  %v1902_v9 = vmul.f32 %v3939_v8, %v1742_v34  ;;  %v1903_v38 = vmul.f32 %v3941_v11, %v1743_v60  ;;  %v1904_v49 = vmul.f32 %v3943_v24, %v1744_v52  ;;  %v4576_v34 = vld [vmem:[#allocation31_spill] sm:$0xff]  ;;  %v4577_v11 = vld [vmem:[#allocation32_spill] sm:$0xff]  ;;  %v4578_v24 = vld [vmem:[#allocation33_spill] sm:$0xff] }
 0x2e3   : > { %v1905_v39 = vmul.f32 %v3945_v28, %v1745_v14  ;;  %v1906_v5 = vmul.f32 %v3947_v3, %v1746_v57  ;;  %v1907_v58 = vmul.f32 %v3949_v35, %v1747_v47  ;;  %v1908_v30 = vmul.f32 %v3951_v43, %v1748_v42  ;;  %v4579_v28 = vld [vmem:[#allocation34_spill] sm:$0xff]  ;;  %v4580_v47 = vld [vmem:[#allocation35_spill] sm:$0xff]  ;;  %v4581_v42 = vld [vmem:[#allocation36_spill] sm:$0xff] }
 0x2e4   : > { %v1909_v44 = vmul.f32 %v3953_v15, %v1749_v18  ;;  %v1910_v53 = vmul.f32 %v3955_v63, %v1750_v48  ;;  %v1911_v23 = vmul.f32 %v4574_v19, %v1751_v51  ;;  %v1912_v37 = vmul.f32 %v4575_v0, %v1752_v50  ;;  %v4582_v48 = vld [vmem:[#allocation37_spill] sm:$0xff]  ;;  %v4583_v51 = vld [vmem:[#allocation38_spill] sm:$0xff] }
 0x2e5   : > { %v2051_v60 = vadd.f32 %v4576_v34, %v1891_v29  ;;  %v2052_v52 = vadd.f32 %v4577_v11, %v1892_v2  ;;  %v2053_v14 = vadd.f32 %v4578_v24, %v1893_v20  ;;  %v4055_v57 = vadd.f32 %v4579_v28, %v1894_v12  ;;  %v4584_v29 = vld [vmem:[#allocation39_spill] sm:$0xff]  ;;  %v4585_v2 = vld [vmem:[#allocation40_spill] sm:$0xff]  ;;  %v4586_v12 = vld [vmem:[#allocation41_spill] sm:$0xff] }
 0x2e6   : > { %v4058_v35 = vadd.f32 %v4580_v47, %v1895_v25  ;;  %v4061_v18 = vadd.f32 %v4581_v42, %v1896_v10  ;;  %v4064_v63 = vadd.f32 %v4582_v48, %v1897_v13  ;;  %v4067_v50 = vadd.f32 %v4583_v51, %v1898_v6  ;;  %v4587_v25 = vld [vmem:[#allocation42_spill] sm:$0xff]  ;;  %v4588_v10 = vld [vmem:[#allocation43_spill] sm:$0xff]  ;;  %v4589_v6 = vld [vmem:[#allocation45_spill] sm:$0xff] }
 0x2e7   : > { %v4070_v34 = vadd.f32 %v4584_v29, %v1899_v59  ;;  %v4073_v20 = vadd.f32 %v4585_v2, %v1900_v21  ;;  %v4076_v28 = vadd.f32 %v4586_v12, %v1901_v17  ;;  %v4079_v47 = vadd.f32 %v4587_v25, %v1902_v9 }
 0x2e8   : > { %v4082_v42 = vadd.f32 %v4588_v10, %v1903_v38  ;;  %v4085_v13 = vadd.f32 %v3987_v26, %v1904_v49  ;;  %v4088_v51 = vadd.f32 %v4589_v6, %v1905_v39  ;;  %v4091_v59 = vadd.f32 %v3991_v32, %v1906_v5 }
 0x2e9   : > { %v4094_v21 = vadd.f32 %v3993_v55, %v1907_v58  ;;  %v4097_v17 = vadd.f32 %v3995_v22, %v1908_v30  ;;  %v4100_v9 = vadd.f32 %v3997_v56, %v1909_v44  ;;  %v4103_v38 = vadd.f32 %v3999_v4, %v1910_v53 }
 0x2ea   : > { %v4106_v49 = vadd.f32 %v4001_v61, %v1911_v23  ;;  %v4109_v39 = vadd.f32 %v4003_v16, %v1912_v37  ;;  %vm2095_vm5 = vcmp.ge.f32.partialorder %v2051_v60, 0.0  ;;  %vm2096_vm6 = vcmp.ge.f32.partialorder %v2052_v52, 0.0 }
 0x2eb   : > { %vm2097_vm7 = vcmp.ge.f32.partialorder %v2053_v14, 0.0  ;;  %vm2098_vm8 = vcmp.ge.f32.partialorder %v4055_v57, 0.0  ;;  %vm2099_vm9 = vcmp.ge.f32.partialorder %v4058_v35, 0.0  ;;  %vm2100_vm10 = vcmp.ge.f32.partialorder %v4061_v18, 0.0 }
 0x2ec   : > { %vm2107_vm1 = vcmp.ge.f32.partialorder %v4082_v42, 0.0  ;;  %vm2108_vm2 = vcmp.ge.f32.partialorder %v4085_v13, 0.0  ;;  %vm2109_vm3 = vcmp.ge.f32.partialorder %v4088_v51, 0.0  ;;  %vm2112_vm12 = vcmp.ge.f32.partialorder %v4097_v17, 0.0 }
 0x2ed   : > { %vm2113_vm13 = vcmp.ge.f32.partialorder %v4100_v9, 0.0  ;;  %vm2114_vm14 = vcmp.ge.f32.partialorder %v4103_v38, 0.0  ;;  %vm2115_vm15 = vcmp.ge.f32.partialorder %v4106_v49, 0.0  ;;  %vm2116_vm0 = vcmp.ge.f32.partialorder %v4109_v39, 0.0 }
 0x2ee   : > { %v2139_v5 = vmul.f32 0.2, %v2051_v60  ;;  %v2140_v58 = vmul.f32 0.2, %v2052_v52  ;;  %v2141_v30 = vmul.f32 0.2, %v2053_v14 }
 0x2ef   : > { %v2142_v44 = vmul.f32 0.2, %v4055_v57  ;;  %v2143_v53 = vmul.f32 0.2, %v4058_v35  ;;  %v2144_v23 = vmul.f32 0.2, %v4061_v18 }
 0x2f0   : > { %v2145_v37 = vmul.f32 0.2, %v4064_v63  ;;  %v2146_v16 = vmul.f32 0.2, %v4067_v50  ;;  %v2147_v61 = vmul.f32 0.2, %v4070_v34  ;;  %v2183_v4 = vsel %vm2095_vm5, %v2051_v60, %v2139_v5 }
 0x2f1   : > { %v2148_v56 = vmul.f32 0.2, %v4073_v20  ;;  %v2149_v22 = vmul.f32 0.2, %v4076_v28  ;;  %v2150_v55 = vmul.f32 0.2, %v4079_v47  ;;  %v2184_v32 = vsel %vm2096_vm6, %v2052_v52, %v2140_v58 }
 0x2f2   : > { %v2151_v6 = vmul.f32 0.2, %v4082_v42  ;;  %v2152_v26 = vmul.f32 0.2, %v4085_v13  ;;  %v2153_v10 = vmul.f32 0.2, %v4088_v51  ;;  %v2185_v25 = vsel %vm2097_vm7, %v2053_v14, %v2141_v30 }
 0x2f3   : > { %v2154_v12 = vmul.f32 0.2, %v4091_v59  ;;  %v2155_v60 = vmul.f32 0.2, %v4094_v21  ;;  %v2156_v5 = vmul.f32 0.2, %v4097_v17  ;;  %v2186_v2 = vsel %vm2098_vm8, %v4055_v57, %v2142_v44 }
 0x2f4   : > { %v2157_v52 = vmul.f32 0.2, %v4100_v9  ;;  %v2158_v58 = vmul.f32 0.2, %v4103_v38  ;;  %v2159_v29 = vmul.f32 0.2, %v4106_v49  ;;  %v2187_v14 = vsel %vm2099_vm9, %v4058_v35, %v2143_v53 }
 0x2f5   : > { %v2160_v30 = vmul.f32 0.2, %v4109_v39  ;;  %v2188_v48 = vsel %vm2100_vm10, %v4061_v18, %v2144_v23  ;;  %vm4590_vm5 = vcmp.ge.f32.partialorder %v4064_v63, 0.0  ;;  %vm4591_vm6 = vcmp.ge.f32.partialorder %v4067_v50, 0.0  ;;  %v4604_v23 = vld [vmem:[#allocation6_spill] sm:$0xff] }
 0x2f6   : > { %v2189_v57 = vsel %vm4590_vm5, %v4064_v63, %v2145_v37  ;;  %v2190_v44 = vsel %vm4591_vm6, %v4067_v50, %v2146_v16  ;;  %vm4592_vm7 = vcmp.ge.f32.partialorder %v4070_v34, 0.0  ;;  %vm4593_vm8 = vcmp.ge.f32.partialorder %v4073_v20, 0.0 }
 0x2f7   : > { %v2191_v24 = vsel %vm4592_vm7, %v4070_v34, %v2147_v61  ;;  %v2192_v35 = vsel %vm4593_vm8, %v4073_v20, %v2148_v56  ;;  %vm4594_vm9 = vcmp.ge.f32.partialorder %v4076_v28, 0.0  ;;  %vm4595_vm10 = vcmp.ge.f32.partialorder %v4079_v47, 0.0 }
 0x2f8   : > { %v2193_v18 = vsel %vm4594_vm9, %v4076_v28, %v2149_v22  ;;  %v2194_v63 = vsel %vm4595_vm10, %v4079_v47, %v2150_v55  ;;  %v2195_v16 = vsel %vm2107_vm1, %v4082_v42, %v2151_v6  ;;  %v2196_v61 = vsel %vm2108_vm2, %v4085_v13, %v2152_v26 }
 0x2f9   : > { %v2197_v56 = vsel %vm2109_vm3, %v4088_v51, %v2153_v10  ;;  %vm4596_vm5 = vcmp.ge.f32.partialorder %v4091_v59, 0.0  ;;  %vm4597_vm1 = vcmp.ge.f32.partialorder %v4094_v21, 0.0  ;;  %v2200_v26 = vsel %vm2112_vm12, %v4097_v17, %v2156_v5  ;;  %vm4217_vm12 = vmor %vm2370_vm4, %vm2369_vm11  ;;  %v4601_v17 = vld [vmem:[#allocation3_spill] sm:$0xff]  ;;  %v4606_v5 = vld [vmem:[#allocation8_spill] sm:$0xff] }
 0x2fa   : > { %v2198_v22 = vsel %vm4596_vm5, %v4091_v59, %v2154_v12  ;;  %v2199_v55 = vsel %vm4597_vm1, %v4094_v21, %v2155_v60  ;;  %v2201_v28 = vsel %vm2113_vm13, %v4100_v9, %v2157_v52  ;;  %v2202_v34 = vsel %vm2114_vm14, %v4103_v38, %v2158_v58  ;;  %v4600_v59 = vld [vmem:[#allocation2_spill] sm:$0xff]  ;;  %v4602_v38 = vld [vmem:[#allocation4_spill] sm:$0xff]  ;;  %v4607_v58 = vld [vmem:[#allocation9_spill] sm:$0xff] }
 0x2fb   : > { %v2203_v47 = vsel %vm2115_vm15, %v4106_v49, %v2159_v29  ;;  %v2204_v42 = vsel %vm2116_vm0, %v4109_v39, %v2160_v30  ;;  %v2596_v51 = vpack.c.bf16 %v2184_v32, %v2183_v4  ;;  %v2597_v50 = vpack.c.bf16 %v2186_v2, %v2185_v25  ;;  %v4603_v39 = vld [vmem:[#allocation5_spill] sm:$0xff]  ;;  %v4608_v30 = vld [vmem:[#allocation10_spill] sm:$0xff] }
 0x2fc   : > { %v2598_v20 = vpack.c.bf16 %v2188_v48, %v2187_v14  ;;  %v2599_v12 = vpack.c.bf16 %v2190_v44, %v2189_v57  ;;  %v2600_v10 = vpack.c.bf16 %v2192_v35, %v2191_v24  ;;  %v2601_v13 = vpack.c.bf16 %v2194_v63, %v2193_v18  ;;  %v4609_v44 = vld [vmem:[#allocation11_spill] sm:$0xff]  ;;  %v4610_v18 = vld [vmem:[#allocation12_spill] sm:$0xff] }
 0x2fd   : > { %v2602_v6 = vpack.c.bf16 %v2196_v61, %v2195_v16  ;;  %v2603_v32 = vpack.c.bf16 %v2198_v22, %v2197_v56  ;;  %v2604_v4 = vpack.c.bf16 %v2200_v26, %v2199_v55  ;;  %v2605_v2 = vpack.c.bf16 %v2202_v34, %v2201_v28  ;;  %2359 = vst [vmem:[%s4195_s24] sm:$0xff] %v2596_v51  ;;  %v4611_v16 = vld [vmem:[#allocation13_spill] sm:$0xff]  ;;  %v4612_v56 = vld [vmem:[#allocation14_spill] sm:$0xff]  ;;  %v4613_v55 = vld [vmem:[#allocation15_spill] sm:$0xff] }
 0x2fe   : > { %2360 = vst [vmem:[%s4195_s24 + $0x8] sm:$0xff] %v2597_v50  ;;  %v2606_v48 = vpack.c.bf16 %v2204_v42, %v2203_v47  ;;  %2361 = vst [vmem:[%s4195_s24 + $0x10] sm:$0xff] %v2598_v20  ;;  %v1728_v24 = vadd.f32 1e-05, %v4007_v40  ;;  %v4605_v40 = vld [vmem:[#allocation7_spill] sm:$0xff]  ;;  %v4614_v28 = vld [vmem:[#allocation16_spill] sm:$0xff] }
 0x2ff   : > { %2362 = vst [vmem:[%s4195_s24 + $0x18] sm:$0xff] %v2599_v12  ;;  %2363 = vst [vmem:[%s4195_s24 + $0x20] sm:$0xff] %v2600_v10  ;;  %v4615_v47 = vld [vmem:[#allocation17_spill] sm:$0xff]  ;;  %v4616_v51 = vld [vmem:[#allocation18_spill] sm:$0xff] }
 0x300   : > { %2364 = vst [vmem:[%s4195_s24 + $0x28] sm:$0xff] %v2601_v13  ;;  %2365 = vst [vmem:[%s4195_s24 + $0x30] sm:$0xff] %v2602_v6  ;;  %2887 = vrsqrt.f32 %v1728_v24  ;;  %v4617_v20 = vld [vmem:[#allocation19_spill] sm:$0xff]  ;;  %v4618_v10 = vld [vmem:[#allocation20_spill] sm:$0xff] }
 0x301   : > { %2366 = vst [vmem:[%s4195_s24 + $0x38] sm:$0xff] %v2603_v32  ;;  %2367 = vst [vmem:[%s4195_s24 + $0x40] sm:$0xff] %v2604_v4  ;;  %v4619_v6 = vld [vmem:[#allocation21_spill] sm:$0xff]  ;;  %v4620_v4 = vld [vmem:[#allocation23_spill] sm:$0xff] }
 0x302   : > { %2368 = vst [vmem:[%s4195_s24 + $0x48] sm:$0xff] %v2605_v2  ;;  %2372 = vst.msk [vmem:[%s4195_s24 + $0x50] sm:$0xff] %vm4217_vm12, %v2606_v48  ;;  %v4621_v48 = vld [vmem:[#allocation22_spill] sm:$0xff] }
 0x30a   : > { %v2888_v25 = vpop.eup %2887 }
 0x30b   : > { %v1753_v21 = vmul.f32 %v2888_v25, %v4600_v59  ;;  %v1754_v9 = vmul.f32 %v2888_v25, %v4601_v17  ;;  %v1755_v49 = vmul.f32 %v2888_v25, %v4602_v38  ;;  %v1756_v53 = vmul.f32 %v2888_v25, %v4603_v39 }
 0x30c   : > { %v1757_v37 = vmul.f32 %v2888_v25, %v4604_v23  ;;  %v1758_v60 = vmul.f32 %v2888_v25, %v4605_v40  ;;  %v1759_v52 = vmul.f32 %v2888_v25, %v4606_v5  ;;  %v1760_v14 = vmul.f32 %v2888_v25, %v4607_v58 }
 0x30d   : > { %v1761_v57 = vmul.f32 %v2888_v25, %v4608_v30  ;;  %v1762_v35 = vmul.f32 %v2888_v25, %v4609_v44  ;;  %v1763_v63 = vmul.f32 %v2888_v25, %v4610_v18  ;;  %v1764_v61 = vmul.f32 %v2888_v25, %v4611_v16  ;;  %v4630_v18 = vld [vmem:[#allocation35_spill] sm:$0xff]  ;;  %v4632_v16 = vld [vmem:[#allocation37_spill] sm:$0xff] }
 0x30e   : > { %v1765_v22 = vmul.f32 %v2888_v25, %v4612_v56  ;;  %v1766_v26 = vmul.f32 %v2888_v25, %v4613_v55  ;;  %v1767_v34 = vmul.f32 %v2888_v25, %v4614_v28  ;;  %v1768_v42 = vmul.f32 %v2888_v25, %v4615_v47  ;;  %v4634_v56 = vld [vmem:[#allocation39_spill] sm:$0xff] }
 0x30f   : > { %v1769_v50 = vmul.f32 %v2888_v25, %v4616_v51  ;;  %v1770_v12 = vmul.f32 %v2888_v25, %v4617_v20  ;;  %v1771_v13 = vmul.f32 %v2888_v25, %v4618_v10  ;;  %v1772_v32 = vmul.f32 %v2888_v25, %v4619_v6 }
 0x310   : > { %v1773_v2 = vmul.f32 %v2888_v25, %v4620_v4  ;;  %v1774_v24 = vmul.f32 %v2888_v25, %v4621_v48  ;;  %v1913_v59 = vmul.f32 %v3917_v7, %v1753_v21  ;;  %v1914_v17 = vmul.f32 %v3919_v27, %v1754_v9  ;;  %v4622_v21 = vld [vmem:[#allocation24_spill] sm:$0xff]  ;;  %v4623_v9 = vld [vmem:[#allocation25_spill] sm:$0xff] }
 0x311   : > { %v1915_v38 = vmul.f32 %v3921_v31, %v1755_v49  ;;  %v1916_v39 = vmul.f32 %v3923_v1, %v1756_v53  ;;  %v1917_v23 = vmul.f32 %v3925_v46, %v1757_v37  ;;  %v1918_v40 = vmul.f32 %v3927_v62, %v1758_v60  ;;  %v4624_v49 = vld [vmem:[#allocation26_spill] sm:$0xff]  ;;  %v4625_v53 = vld [vmem:[#allocation27_spill] sm:$0xff]  ;;  %v4626_v37 = vld [vmem:[#allocation28_spill] sm:$0xff] }
 0x312   : > { %v1919_v5 = vmul.f32 %v3929_v54, %v1759_v52  ;;  %v1920_v58 = vmul.f32 %v3931_v33, %v1760_v14  ;;  %v1921_v30 = vmul.f32 %v3933_v36, %v1761_v57  ;;  %v1922_v25 = vmul.f32 %v3935_v45, %v1762_v35  ;;  %v4627_v60 = vld [vmem:[#allocation31_spill] sm:$0xff]  ;;  %v4628_v57 = vld [vmem:[#allocation33_spill] sm:$0xff]  ;;  %v4629_v35 = vld [vmem:[#allocation34_spill] sm:$0xff] }
 0x313   : > { %v1923_v7 = vmul.f32 %v3937_v41, %v1763_v63  ;;  %v1924_v27 = vmul.f32 %v3939_v8, %v1764_v61  ;;  %v1925_v31 = vmul.f32 %v4622_v21, %v1765_v22  ;;  %v1926_v1 = vmul.f32 %v4623_v9, %v1766_v26  ;;  %v4636_v26 = vld [vmem:[#allocation41_spill] sm:$0xff] }
 0x314   : > { %v1927_v46 = vmul.f32 %v4624_v49, %v1767_v34  ;;  %v1928_v62 = vmul.f32 %v3947_v3, %v1768_v42  ;;  %v1929_v54 = vmul.f32 %v4625_v53, %v1769_v50  ;;  %v1930_v33 = vmul.f32 %v3951_v43, %v1770_v12  ;;  %v4631_v43 = vld [vmem:[#allocation36_spill] sm:$0xff]  ;;  %v4637_v34 = vld [vmem:[#allocation42_spill] sm:$0xff]  ;;  %v4638_v42 = vld [vmem:[#allocation43_spill] sm:$0xff] }
 0x315   : > { %v1931_v36 = vmul.f32 %v3953_v15, %v1771_v13  ;;  %v1932_v45 = vmul.f32 %v4626_v37, %v1772_v32  ;;  %v1933_v41 = vmul.f32 %v4574_v19, %v1773_v2  ;;  %v1934_v8 = vmul.f32 %v4575_v0, %v1774_v24  ;;  %v4633_v19 = vld [vmem:[#allocation38_spill] sm:$0xff]  ;;  %v4639_v50 = vld [vmem:[#allocation44_spill] sm:$0xff]  ;;  %v4640_v12 = vld [vmem:[#allocation45_spill] sm:$0xff] }
 0x316   : > { %v2073_v52 = vadd.f32 %v4627_v60, %v1913_v59  ;;  %v2074_v14 = vadd.f32 %v4577_v11, %v1914_v17  ;;  %v2075_v44 = vadd.f32 %v4628_v57, %v1915_v38  ;;  %v4283_v3 = vadd.f32 %v4629_v35, %v1916_v39  ;;  %v4635_v11 = vld [vmem:[#allocation40_spill] sm:$0xff]  ;;  %v4641_v13 = vld [vmem:[#allocation46_spill] sm:$0xff]  ;;  %v4642_v32 = vld [vmem:[#allocation47_spill] sm:$0xff] }
 0x317   : > { %v4286_v63 = vadd.f32 %v4630_v18, %v1917_v23  ;;  %v4289_v15 = vadd.f32 %v4631_v43, %v1918_v40  ;;  %v4292_v61 = vadd.f32 %v4632_v16, %v1919_v5  ;;  %v4295_v0 = vadd.f32 %v4633_v19, %v1920_v58  ;;  %v4643_v2 = vld [vmem:[#allocation48_spill] sm:$0xff]  ;;  %v4644_v24 = vld [vmem:[#allocation49_spill] sm:$0xff]  ;;  %v4645_v17 = vld [vmem:[#allocation50_spill] sm:$0xff] }
 0x318   : > { %v4298_v22 = vadd.f32 %v4634_v56, %v1921_v30  ;;  %v4301_v55 = vadd.f32 %v4635_v11, %v1922_v25  ;;  %v4304_v28 = vadd.f32 %v4636_v26, %v1923_v7  ;;  %v4307_v47 = vadd.f32 %v4637_v34, %v1924_v27  ;;  %v4646_v39 = vld [vmem:[#allocation51_spill] sm:$0xff]  ;;  %v4647_v40 = vld [vmem:[#allocation52_spill] sm:$0xff] }
 0x319   : > { %v4310_v51 = vadd.f32 %v4638_v42, %v1925_v31  ;;  %v4313_v20 = vadd.f32 %v4639_v50, %v1926_v1  ;;  %v4316_v10 = vadd.f32 %v4640_v12, %v1927_v46  ;;  %v4319_v6 = vadd.f32 %v4641_v13, %v1928_v62 }
 0x31a   : > { %v4322_v4 = vadd.f32 %v4642_v32, %v1929_v54  ;;  %v4325_v48 = vadd.f32 %v4643_v2, %v1930_v33  ;;  %v4328_v59 = vadd.f32 %v4644_v24, %v1931_v36  ;;  %v4331_v38 = vadd.f32 %v4645_v17, %v1932_v45 }
 0x31b   : > { %v4334_v23 = vadd.f32 %v4646_v39, %v1933_v41  ;;  %v4337_v5 = vadd.f32 %v4647_v40, %v1934_v8  ;;  %vm2117_vm11 = vcmp.ge.f32.partialorder %v2073_v52, 0.0  ;;  %vm2118_vm13 = vcmp.ge.f32.partialorder %v2074_v14, 0.0 }
 0x31c   : > { %vm2119_vm14 = vcmp.ge.f32.partialorder %v2075_v44, 0.0  ;;  %vm2120_vm15 = vcmp.ge.f32.partialorder %v4283_v3, 0.0  ;;  %vm2121_vm0 = vcmp.ge.f32.partialorder %v4286_v63, 0.0  ;;  %vm2129_vm10 = vcmp.ge.f32.partialorder %v4310_v51, 0.0 }
 0x31d   : > { %vm2130_vm5 = vcmp.ge.f32.partialorder %v4313_v20, 0.0  ;;  %vm2131_vm1 = vcmp.ge.f32.partialorder %v4316_v10, 0.0  ;;  %vm2132_vm2 = vcmp.ge.f32.partialorder %v4319_v6, 0.0  ;;  %vm2133_vm3 = vcmp.ge.f32.partialorder %v4322_v4, 0.0 }
 0x31e   : > { %vm2134_vm4 = vcmp.ge.f32.partialorder %v4325_v48, 0.0  ;;  %vm2135_vm6 = vcmp.ge.f32.partialorder %v4328_v59, 0.0  ;;  %vm2136_vm7 = vcmp.ge.f32.partialorder %v4331_v38, 0.0  ;;  %vm2137_vm8 = vcmp.ge.f32.partialorder %v4334_v23, 0.0 }
 0x31f   : > { %v2161_v58 = vmul.f32 0.2, %v2073_v52  ;;  %v2162_v30 = vmul.f32 0.2, %v2074_v14  ;;  %v2163_v25 = vmul.f32 0.2, %v2075_v44 }
 0x320   : > { %v2164_v7 = vmul.f32 0.2, %v4283_v3  ;;  %v2165_v27 = vmul.f32 0.2, %v4286_v63  ;;  %v2166_v21 = vmul.f32 0.2, %v4289_v15 }
 0x321   : > { %v2167_v31 = vmul.f32 0.2, %v4292_v61  ;;  %v2168_v9 = vmul.f32 0.2, %v4295_v0  ;;  %v2169_v1 = vmul.f32 0.2, %v4298_v22  ;;  %v2205_v49 = vsel %vm2117_vm11, %v2073_v52, %v2161_v58 }
 0x322   : > { %v2170_v46 = vmul.f32 0.2, %v4301_v55  ;;  %v2171_v62 = vmul.f32 0.2, %v4304_v28  ;;  %v2172_v53 = vmul.f32 0.2, %v4307_v47  ;;  %v2206_v54 = vsel %vm2118_vm13, %v2074_v14, %v2162_v30 }
 0x323   : > { %v2173_v33 = vmul.f32 0.2, %v4310_v51  ;;  %v2174_v36 = vmul.f32 0.2, %v4313_v20  ;;  %v2175_v37 = vmul.f32 0.2, %v4316_v10  ;;  %v2207_v45 = vsel %vm2119_vm14, %v2075_v44, %v2163_v25 }
 0x324   : > { %v2176_v41 = vmul.f32 0.2, %v4319_v6  ;;  %v2177_v8 = vmul.f32 0.2, %v4322_v4  ;;  %v2178_v60 = vmul.f32 0.2, %v4325_v48  ;;  %v2208_v52 = vsel %vm2120_vm15, %v4283_v3, %v2164_v7 }
 0x325   : > { %v2179_v14 = vmul.f32 0.2, %v4328_v59  ;;  %v2180_v57 = vmul.f32 0.2, %v4331_v38  ;;  %v2181_v35 = vmul.f32 0.2, %v4334_v23  ;;  %v2209_v44 = vsel %vm2121_vm0, %v4286_v63, %v2165_v27 }
 0x326   : > { %v2182_v18 = vmul.f32 0.2, %v4337_v5  ;;  %vm4648_vm11 = vcmp.ge.f32.partialorder %v4289_v15, 0.0  ;;  %vm4649_vm13 = vcmp.ge.f32.partialorder %v4292_v61, 0.0  ;;  %vm4650_vm14 = vcmp.ge.f32.partialorder %v4295_v0, 0.0 }
 0x327   : > { %v2210_v43 = vsel %vm4648_vm11, %v4289_v15, %v2166_v21  ;;  %v2211_v3 = vsel %vm4649_vm13, %v4292_v61, %v2167_v31  ;;  %v2212_v16 = vsel %vm4650_vm14, %v4295_v0, %v2168_v9  ;;  %vm4651_vm15 = vcmp.ge.f32.partialorder %v4298_v22, 0.0 }
 0x328   : > { %v2213_v19 = vsel %vm4651_vm15, %v4298_v22, %v2169_v1  ;;  %vm4652_vm0 = vcmp.ge.f32.partialorder %v4301_v55, 0.0  ;;  %vm4653_vm9 = vcmp.ge.f32.partialorder %v4304_v28, 0.0  ;;  %vm4654_vm11 = vcmp.ge.f32.partialorder %v4307_v47, 0.0 }
 0x329   : > { %v2214_v63 = vsel %vm4652_vm0, %v4301_v55, %v2170_v46  ;;  %v2215_v15 = vsel %vm4653_vm9, %v4304_v28, %v2171_v62  ;;  %v2216_v61 = vsel %vm4654_vm11, %v4307_v47, %v2172_v53  ;;  %v2217_v0 = vsel %vm2129_vm10, %v4310_v51, %v2173_v33 }
 0x32a   : > { %v2218_v56 = vsel %vm2130_vm5, %v4313_v20, %v2174_v36  ;;  %v2219_v22 = vsel %vm2131_vm1, %v4316_v10, %v2175_v37  ;;  %v2220_v11 = vsel %vm2132_vm2, %v4319_v6, %v2176_v41  ;;  %v2221_v55 = vsel %vm2133_vm3, %v4322_v4, %v2177_v8 }
 0x32b   : > { %v2222_v26 = vsel %vm2134_vm4, %v4325_v48, %v2178_v60  ;;  %v2223_v28 = vsel %vm2135_vm6, %v4328_v59, %v2179_v14  ;;  %v2224_v34 = vsel %vm2136_vm7, %v4331_v38, %v2180_v57  ;;  %v2225_v47 = vsel %vm2137_vm8, %v4334_v23, %v2181_v35 }
 0x32c   : > { %vm4655_vm2 = vcmp.ge.f32.partialorder %v4337_v5, 0.0  ;;  %v2607_v51 = vpack.c.bf16 %v2206_v54, %v2205_v49  ;;  %v2608_v50 = vpack.c.bf16 %v2208_v52, %v2207_v45  ;;  %v2609_v20 = vpack.c.bf16 %v2210_v43, %v2209_v44 }
 0x32d   : > { %v2226_v42 = vsel %vm4655_vm2, %v4337_v5, %v2182_v18  ;;  %v2610_v12 = vpack.c.bf16 %v2212_v16, %v2211_v3  ;;  %v2611_v10 = vpack.c.bf16 %v2214_v63, %v2213_v19  ;;  %v2612_v13 = vpack.c.bf16 %v2216_v61, %v2215_v15 }
 0x32e   : > { %v2613_v6 = vpack.c.bf16 %v2218_v56, %v2217_v0  ;;  %v2614_v32 = vpack.c.bf16 %v2220_v11, %v2219_v22  ;;  %v2615_v4 = vpack.c.bf16 %v2222_v26, %v2221_v55  ;;  %v2616_v2 = vpack.c.bf16 %v2224_v34, %v2223_v28  ;;  %2373 = vst [vmem:[%s4195_s24 + $0x58] sm:$0xff] %v2607_v51 }
 0x32f   : > { %2374 = vst [vmem:[%s4195_s24 + $0x60] sm:$0xff] %v2608_v50  ;;  %v2617_v48 = vpack.c.bf16 %v2226_v42, %v2225_v47  ;;  %2375 = vst [vmem:[%s4195_s24 + $0x68] sm:$0xff] %v2609_v20 }
 0x330   : > { %2376 = vst [vmem:[%s4195_s24 + $0x70] sm:$0xff] %v2610_v12  ;;  %2377 = vst [vmem:[%s4195_s24 + $0x78] sm:$0xff] %v2611_v10 }
 0x331   : > { %2378 = vst [vmem:[%s4195_s24 + $0x80] sm:$0xff] %v2612_v13  ;;  %2379 = vst [vmem:[%s4195_s24 + $0x88] sm:$0xff] %v2613_v6 }
 0x332   : > { %2380 = vst [vmem:[%s4195_s24 + $0x90] sm:$0xff] %v2614_v32  ;;  %2381 = vst [vmem:[%s4195_s24 + $0x98] sm:$0xff] %v2615_v4 }
 0x333   : > { %2382 = vst [vmem:[%s4195_s24 + $0xa0] sm:$0xff] %v2616_v2  ;;  %2383 = vst.msk [vmem:[%s4195_s24 + $0xa8] sm:$0xff] %vm4217_vm12, %v2617_v48 }
 0x334 PF: > { %s14_s19 = sadd.s32 1, %s2928_s19   ;;  %s4656_s15 = smov %s2920_s17 }
 0x335   : > { %p11_p8 = scmp.ge.s32.totalorder %s14_s19, 6   ;;  %s4657_s16 = smov %s2924_s18 }
 0x336   : > { %s4658_s17 = smov %s4661_s20  ;;  %s4659_s18 = smov %s4665_s21 }
 0x337   :  { %13 = sbr.rel (!%p11_p8) target bundleno = 3 (0x3), region = 75 }

// kernel: forward.5
= control target key start
LH: loop header
LB: loop body
LE: loop exit
PB: predicated region body
PF: predicated region fallthrough
CT: control target
= control target key end

     0   :  { %s1237_s15 = smov 0   ;;  %s1239_s16 = smov 0   ;;  %s1373_s0 = inlined_call_operand.vmem [shape: bf16[2,2,432,216], index: 0, kind: input, shape index: {}]   ;;  %s1374_s1 = inlined_call_operand.vmem [shape: bf16[2,16,432], index: 1, kind: input, shape index: {}]   ;;  %s1375_s2 = inlined_call_operand.vmem [shape: f32[2,1,216], index: 2, kind: input, shape index: {}]   ;;  %s1376_s3 = inlined_call_operand.vmem [shape: f32[2,1,216], index: 3, kind: input, shape index: {}]   ;;  %s1377_s4 = inlined_call_operand.vmem [shape: bf16[2,2,16,216], index: 4, kind: output, shape index: {}]  }
   0x1   :  { %s1241_s17 = smov 0   ;;  %s1243_s18 = smov 0  }
   0x2   :  { %s1245_s19 = smov 0  }
   0x3 LB: > { %s23_s20 = sadd.s32 1, %s1202_s17  ;;  %s26_s21 = sadd.s32 1, %s1206_s18  ;;  %s1210_s19 = sphi %s1245_s19, %s14_s19   ;;  %s1206_s18 = sphi %s1243_s18, %s1381_s18   ;;  %s1202_s17 = sphi %s1241_s17, %s1380_s17   ;;  %s1198_s16 = sphi %s1239_s16, %s1379_s16   ;;  %s1194_s15 = sphi %s1237_s15, %s1378_s15  }
   0x4   : > { %p24_p0 = scmp.ge.s32.totalorder %s23_s20, 2  ;;  %p960_p1 = scmp.ge.s32.totalorder %s1210_s19, 1 }
   0x5   : > { %p210_p2 = scmp.lt.s32.totalorder %s1210_s19, 5 }
   0x6   : > { %s1383_s20 = smov (%p24_p0, %s23_s20), 0  ;;  %s1385_s21 = smov (!%p24_p0, %s26_s21), %s1206_s18 }
   0x7   : > { %p211_p3 = pnand %p960_p1, %p210_p2  ;;  %p28_p4 = scmp.ge.s32.totalorder %s1385_s21, 2 }
   0x8   : > { %p257_p5 = scmp.lt.s32.totalorder (!%p211_p3), %s1198_s16, 1  ;;  %p259_p6 = scmp.lt.s32.totalorder (!%p211_p3), %s1194_s15, 1  ;;  %vm636_vm0 = vcmask (!%p211_p3), 392192   ;;  %vm726_vm1 = vcmask (!%p211_p3), 719872   ;;  %vm820_vm2 = vcmask (!%p211_p3), 1043456   ;;  %vm821_vm3 = vcmask (!%p211_p3), 719876  }
   0x9   : > { %s1387_s21 = smov (%p28_p4, %s1385_s21), 0  ;;  %214 = sbr.rel (%p211_p3) target bundleno = 632 (0x278), region = 36 }
   0xa   : > { %vm822_vm6 = vmor (!%p211_p3), %vm821_vm3, %vm820_vm2 }
  0x10   : > { %s1389_s16 = smov (!%p257_p5, %s1198_s16), 1  ;;  %s1391_s15 = smov (!%p259_p6, %s1194_s15), 1 }
  0x11   : > { %s1040_s22 = smul.u32 216, %s1389_s16  ;;  %s1032_s23 = sshll.u32 %s1389_s16, 5 }
  0x12   : > { %s1039_s24 = smul.u32 108, %s1391_s15  ;;  %s1277_s27 = scalar_lea.vmem %s1374_s1, %s1032_s23 }
  0x13   : > { %v1163_v0 = vld [vmem:[%s1277_s27 + $0xc] ss:$16 sps:$4 sm:$0xff]   ;;  %v1167_v1 = vld [vmem:[%s1277_s27 + $0x4] ss:$16 sps:$4 sm:$0xff]   ;;  %v1161_v51 = vld [vmem:[%s1277_s27 + $0x8] ss:$16 sps:$4 sm:$0xff]  }
  0x14   : > { %s263_s28 = sadd.s32 %s1040_s22, %s1039_s24  ;;  %1027 = vmatprep.mubr.msk.bf16.mxu0 %vm636_vm0, %v1163_v0  ;;  %672 = vmatprep.mubr.bf16.mxu1 %v1167_v1  ;;  %v1165_v57 = vld [vmem:[%s1277_s27] ss:$16 sps:$4 sm:$0xff]   ;;  %s964_s7 = sshll.u32 %s1389_s16, 1 }
  0x15   : > { %s961_s29 = sshll.u32 %s263_s28, 2  ;;  %s274_s10 = scalar_lea.vmem %s1375_s2, %s964_s7 }
  0x16   : > { %s1284_s6 = scalar_lea.vmem %s1373_s0, %s961_s29  ;;  %s278_s13 = scalar_lea.vmem %s1376_s3, %s964_s7 }
  0x17   : > { %v1081_v2 = vld [vmem:[%s1284_s6 + $0x4] ss:$8 sps:$4 sm:$0xff]   ;;  %v1083_v3 = vld [vmem:[%s1284_s6] ss:$8 sps:$4 sm:$0xff]   ;;  %v1084_v4 = vld [vmem:[%s1284_s6 + $0x14] ss:$8 sps:$4 sm:$0xff]  }
  0x18   : > { %640 = vmatprep.subr.bf16.mxu1 %v1081_v2  ;;  %v1086_v5 = vld [vmem:[%s1284_s6 + $0x10] ss:$8 sps:$4 sm:$0xff]   ;;  %v1087_v6 = vld [vmem:[%s1284_s6 + $0x24] ss:$8 sps:$4 sm:$0xff]   ;;  %v1089_v7 = vld [vmem:[%s1284_s6 + $0x20] ss:$8 sps:$4 sm:$0xff]  }
  0x19   : > { %641 = vmatpush1.bf16.msra.mxu1 %v1083_v3  ;;  %v1096_v8 = vld [vmem:[%s1284_s6 + $0x104] ss:$8 sps:$4 sm:$0xff]   ;;  %v1098_v9 = vld [vmem:[%s1284_s6 + $0x100] ss:$8 sps:$4 sm:$0xff]   ;;  %v1090_v10 = vld [vmem:[%s1284_s6 + $0x34] ss:$8 sps:$4 sm:$0xff]  }
  0x1a   : > { %642 = vmatprep.subr.bf16.mxu1 %v1084_v4  ;;  %683 = vmatprep.subr.bf16.mxu0 %v1096_v8  ;;  %v1102_v11 = vld [vmem:[%s1284_s6 + $0x114] ss:$8 sps:$4 sm:$0xff]   ;;  %v1104_v12 = vld [vmem:[%s1284_s6 + $0x110] ss:$8 sps:$4 sm:$0xff]   ;;  %v1093_v14 = vld [vmem:[%s1284_s6 + $0x44] ss:$8 sps:$4 sm:$0xff]  }
  0x1b   : > { %684 = vmatpush1.bf16.msra.mxu0 %v1098_v9  ;;  %v1092_v13 = vld [vmem:[%s1284_s6 + $0x30] ss:$8 sps:$4 sm:$0xff]   ;;  %v1108_v15 = vld [vmem:[%s1284_s6 + $0x124] ss:$8 sps:$4 sm:$0xff]   ;;  %v1110_v16 = vld [vmem:[%s1284_s6 + $0x120] ss:$8 sps:$4 sm:$0xff]  }
  0x1c   : > { %685 = vmatprep.subr.bf16.mxu0 %v1102_v11  ;;  %v1095_v17 = vld [vmem:[%s1284_s6 + $0x40] ss:$8 sps:$4 sm:$0xff]   ;;  %v1114_v18 = vld [vmem:[%s1284_s6 + $0x134] ss:$8 sps:$4 sm:$0xff]   ;;  %v1116_v20 = vld [vmem:[%s1284_s6 + $0x130] ss:$8 sps:$4 sm:$0xff]  }
  0x1d   : > { %643 = vmatpush1.bf16.msra.mxu1 %v1086_v5  ;;  %v1099_v19 = vld [vmem:[%s1284_s6 + $0x54] ss:$8 sps:$4 sm:$0xff]   ;;  %v1101_v21 = vld [vmem:[%s1284_s6 + $0x50] ss:$8 sps:$4 sm:$0xff]   ;;  %v1120_v22 = vld [vmem:[%s1284_s6 + $0x144] ss:$8 sps:$4 sm:$0xff]  }
  0x1e   : > { %644 = vmatprep.subr.bf16.mxu1 %v1087_v6  ;;  %v1105_v23 = vld [vmem:[%s1284_s6 + $0x64] ss:$8 sps:$4 sm:$0xff]   ;;  %v1122_v24 = vld [vmem:[%s1284_s6 + $0x140] ss:$8 sps:$4 sm:$0xff]   ;;  %v1126_v26 = vld [vmem:[%s1284_s6 + $0x154] ss:$8 sps:$4 sm:$0xff]  }
  0x1f   : > { %686 = vmatpush1.bf16.msra.mxu0 %v1104_v12  ;;  %v1107_v25 = vld [vmem:[%s1284_s6 + $0x60] ss:$8 sps:$4 sm:$0xff]   ;;  %v1111_v27 = vld [vmem:[%s1284_s6 + $0x74] ss:$8 sps:$4 sm:$0xff]   ;;  %v1128_v28 = vld [vmem:[%s1284_s6 + $0x150] ss:$8 sps:$4 sm:$0xff]  }
  0x20   : > { %687 = vmatprep.subr.bf16.mxu0 %v1108_v15  ;;  %v1113_v29 = vld [vmem:[%s1284_s6 + $0x70] ss:$8 sps:$4 sm:$0xff]   ;;  %v1132_v30 = vld [vmem:[%s1284_s6 + $0x164] ss:$8 sps:$4 sm:$0xff]   ;;  %v1134_v32 = vld [vmem:[%s1284_s6 + $0x160] ss:$8 sps:$4 sm:$0xff]  }
  0x21   : > { %645 = vmatpush1.bf16.msra.mxu1 %v1089_v7  ;;  %v1117_v31 = vld [vmem:[%s1284_s6 + $0x84] ss:$8 sps:$4 sm:$0xff]   ;;  %v1119_v33 = vld [vmem:[%s1284_s6 + $0x80] ss:$8 sps:$4 sm:$0xff]   ;;  %v1138_v34 = vld [vmem:[%s1284_s6 + $0x174] ss:$8 sps:$4 sm:$0xff]  }
  0x22   : > { %646 = vmatprep.subr.bf16.mxu1 %v1090_v10  ;;  %v1123_v35 = vld [vmem:[%s1284_s6 + $0x94] ss:$8 sps:$4 sm:$0xff]   ;;  %v1140_v36 = vld [vmem:[%s1284_s6 + $0x170] ss:$8 sps:$4 sm:$0xff]   ;;  %v1144_v38 = vld [vmem:[%s1284_s6 + $0x184] ss:$8 sps:$4 sm:$0xff]  }
  0x23   : > { %688 = vmatpush1.bf16.msra.mxu0 %v1110_v16  ;;  %v1125_v37 = vld [vmem:[%s1284_s6 + $0x90] ss:$8 sps:$4 sm:$0xff]   ;;  %v1129_v39 = vld [vmem:[%s1284_s6 + $0xa4] ss:$8 sps:$4 sm:$0xff]   ;;  %v1146_v40 = vld [vmem:[%s1284_s6 + $0x180] ss:$8 sps:$4 sm:$0xff]  }
  0x24   : > { %689 = vmatprep.subr.bf16.mxu0 %v1114_v18  ;;  %v1131_v41 = vld [vmem:[%s1284_s6 + $0xa0] ss:$8 sps:$4 sm:$0xff]   ;;  %v1150_v42 = vld [vmem:[%s1284_s6 + $0x194] ss:$8 sps:$4 sm:$0xff]   ;;  %v1152_v44 = vld [vmem:[%s1284_s6 + $0x190] ss:$8 sps:$4 sm:$0xff]  }
  0x25   : > { %647 = vmatpush1.bf16.msra.mxu1 %v1092_v13  ;;  %v1135_v43 = vld [vmem:[%s1284_s6 + $0xb4] ss:$8 sps:$4 sm:$0xff]   ;;  %v1137_v45 = vld [vmem:[%s1284_s6 + $0xb0] ss:$8 sps:$4 sm:$0xff]   ;;  %v1156_v46 = vld [vmem:[%s1284_s6 + $0x1a4] ss:$8 sps:$4 sm:$0xff]  }
  0x26   : > { %648 = vmatprep.subr.bf16.mxu1 %v1093_v14  ;;  %v1141_v47 = vld [vmem:[%s1284_s6 + $0xc4] ss:$8 sps:$4 sm:$0xff]   ;;  %v1158_v48 = vld [vmem:[%s1284_s6 + $0x1a0] ss:$8 sps:$4 sm:$0xff]   ;;  %v1147_v50 = vld [vmem:[%s1284_s6 + $0xd4] ss:$8 sps:$4 sm:$0xff]  }
  0x27   : > { %690 = vmatpush1.bf16.msra.mxu0 %v1116_v20  ;;  %v1143_v49 = vld [vmem:[%s1284_s6 + $0xc0] ss:$8 sps:$4 sm:$0xff]   ;;  %v1149_v52 = vld [vmem:[%s1284_s6 + $0xd0] ss:$8 sps:$4 sm:$0xff]   ;;  %v1153_v53 = vld [vmem:[%s1284_s6 + $0xe4] ss:$8 sps:$4 sm:$0xff]  }
  0x28   : > { %691 = vmatprep.subr.bf16.mxu0 %v1120_v22  ;;  %v1155_v54 = vld [vmem:[%s1284_s6 + $0xe0] ss:$8 sps:$4 sm:$0xff]   ;;  %v1159_v55 = vld [vmem:[%s1284_s6 + $0xf4] ss:$8 sps:$4 sm:$0xff]   ;;  %v1164_v56 = vld [vmem:[%s1284_s6 + $0xf0] ss:$8 sps:$4 sm:$0xff]  }
  0x29   : > { %649 = vmatpush1.bf16.msra.mxu1 %v1095_v17  ;;  %s966_s14 = sshll.u32 %s1391_s15, 2  ;;  %s967_s22 = sshll.u32 %s1389_s16, 3 }
  0x2a   : > { %650 = vmatprep.subr.bf16.mxu1 %v1099_v19  ;;  %s285_s23 = sadd.s32 %s967_s22, %s966_s14 }
  0x2b   : > { %692 = vmatpush1.bf16.msra.mxu0 %v1122_v24  ;;  %s968_s24 = sshll.u32 %s285_s23, 2 }
  0x2c   : > { %693 = vmatprep.subr.bf16.mxu0 %v1126_v26  ;;  %s287_s25 = scalar_lea.vmem %s1377_s4, %s968_s24 }
  0x2d   : > { %651 = vmatpush1.bf16.msra.mxu1 %v1101_v21 }
  0x2e   : > { %652 = vmatprep.subr.bf16.mxu1 %v1105_v23 }
  0x2f   : > { %694 = vmatpush1.bf16.msra.mxu0 %v1128_v28  ;;  %v766_v28 = vlaneseq }
  0x30   : > { %695 = vmatprep.subr.bf16.mxu0 %v1132_v30 }
  0x31   : > { %653 = vmatpush1.bf16.msra.mxu1 %v1107_v25 }
  0x32   : > { %654 = vmatprep.subr.bf16.mxu1 %v1111_v27 }
  0x33   : > { %696 = vmatpush1.bf16.msra.mxu0 %v1134_v32  ;;  %v767_v32 = vshrl.u32 %v766_v28, 7 }
  0x34   : > { %697 = vmatprep.subr.bf16.mxu0 %v1138_v34 }
  0x35   : > { %655 = vmatpush1.bf16.msra.mxu1 %v1113_v29  ;;  %v768_v34 = vsub.s32 0, %v767_v32 }
  0x36   : > { %656 = vmatprep.subr.bf16.mxu1 %v1117_v31 }
  0x37   : > { %698 = vmatpush1.bf16.msra.mxu0 %v1140_v36  ;;  %v764_v36 = vld [vmem:[%s274_s10] sm:$0x3] }
  0x38   : > { %699 = vmatprep.subr.bf16.mxu0 %v1144_v38  ;;  %v769_v38 = vrot.slane %v764_v36, %v768_v34 }
  0x39   : > { %657 = vmatpush1.bf16.msra.mxu1 %v1119_v33 }
  0x3a   : > { %658 = vmatprep.subr.bf16.mxu1 %v1123_v35  ;;  %v772_v35 = vsub.s32 1, %v767_v32 }
  0x3b   : > { %700 = vmatpush1.bf16.msra.mxu0 %v1146_v40 }
  0x3c   : > { %701 = vmatprep.subr.bf16.mxu0 %v1150_v42 }
  0x3d   : > { %659 = vmatpush1.bf16.msra.mxu1 %v1125_v37  ;;  %v780_v37 = vld [vmem:[%s278_s13] sm:$0x3] }
  0x3e   : > { %660 = vmatprep.subr.bf16.mxu1 %v1129_v39  ;;  %v773_v39 = vrot.slane %v764_v36, %v772_v35  ;;  %v789_v42 = vrot.slane %v780_v37, %v772_v35 }
  0x3f   : > { %702 = vmatpush1.bf16.msra.mxu0 %v1152_v44 }
  0x40   : > { %703 = vmatprep.subr.bf16.mxu0 %v1156_v46 }
  0x41   : > { %661 = vmatpush1.bf16.msra.mxu1 %v1131_v41  ;;  %v785_v41 = vrot.slane %v780_v37, %v768_v34 }
  0x42   : > { %662 = vmatprep.subr.bf16.mxu1 %v1135_v43 }
  0x43   : > { %704 = vmatpush1.bf16.msra.mxu0 %v1158_v48 }
  0x45   : > { %663 = vmatpush1.bf16.msra.mxu1 %v1137_v45 }
  0x46   : > { %664 = vmatprep.subr.bf16.mxu1 %v1141_v47  ;;  %716 = vmatmul.mubr.bf16.vlgmr.msra.gmra.mrb[0].mxu0 %v1161_v51 }
  0x49   : > { %665 = vmatpush1.bf16.msra.mxu1 %v1143_v49 }
  0x4a   : > { %666 = vmatprep.subr.bf16.mxu1 %v1147_v50 }
  0x4d   : > { %667 = vmatpush1.bf16.msra.mxu1 %v1149_v52 }
  0x4e   : > { %668 = vmatprep.subr.bf16.mxu1 %v1153_v53 }
  0x51   : > { %669 = vmatpush1.bf16.msra.mxu1 %v1155_v54 }
  0x52   : > { %670 = vmatprep.subr.bf16.mxu1 %v1159_v55 }
  0x55   : > { %671 = vmatpush1.bf16.msra.mxu1 %v1164_v56 }
  0x58   : > { %673 = vmatmul.mubr.bf16.vlgmr.msra.gmra.mrb[0].mxu1 %v1165_v57 }
 0x119   : > { %v717_v58 = vpop.f32.mrb[0].mxu0 }
 0x11a   : > { %v719_v59 = vpop.f32.mrb[1].mxu0 }
 0x11b   : > { %v721_v60 = vpop.f32.mrb[2].mxu0 }
 0x11c   : > { %v723_v61 = vpop.f32.mrb[3].mxu0 }
 0x12b   : > { %v674_v62 = vpop.f32.mrb[0].mxu1 }
 0x12c   : > { %v718_v63 = vadd.f32 %v717_v58, %v674_v62  ;;  %v676_v0 = vpop.f32.mrb[1].mxu1 }
 0x12d   : > { %v720_v1 = vadd.f32 %v719_v59, %v676_v0  ;;  %v678_v2 = vpop.f32.mrb[2].mxu1 }
 0x12e   : > { %v722_v3 = vadd.f32 %v721_v60, %v678_v2  ;;  %v680_v4 = vpop.f32.mrb[3].mxu1 }
 0x12f   : > { %v724_v5 = vadd.f32 %v723_v61, %v680_v4  ;;  %v727_v6 = vsel %vm726_vm1, %v720_v1, 0.0 }
 0x130   : > { %v728_v7 = vadd.f32 %v727_v6, %v718_v63 }
 0x131   : > { %v731_v8 = vsel %vm726_vm1, %v724_v5, 0.0 }
 0x132   : > { %729 = vadd.xlane.f32.xlu0 %v728_v7  ;;  %v732_v9 = vadd.f32 %v731_v8, %v722_v3 }
 0x136   : > { %733 = vadd.xlane.f32.xlu0 %v732_v9 }
 0x1bf   : > { %v730_v10 = vpop.xlane.xlu0 %729 }
 0x1c0   : > { %v736_v11 = vmul.f32 0.0046296297, %v730_v10 }
 0x1c2   : > { %v738_v12 = vsub.f32 %v718_v63, %v736_v11  ;;  %v739_v13 = vsub.f32 %v720_v1, %v736_v11 }
 0x1c3   : > { %v734_v14 = vpop.xlane.xlu0 %733 }
 0x1c4   : > { %v737_v15 = vmul.f32 0.0046296297, %v734_v14  ;;  %v742_v16 = vmul.f32 %v738_v12, %v738_v12  ;;  %v743_v17 = vmul.f32 %v739_v13, %v739_v13 }
 0x1c6   : > { %v740_v18 = vsub.f32 %v722_v3, %v737_v15  ;;  %v741_v19 = vsub.f32 %v724_v5, %v737_v15  ;;  %v746_v20 = vsel %vm726_vm1, %v743_v17, 0.0 }
 0x1c7   : > { %v747_v21 = vadd.f32 %v746_v20, %v742_v16 }
 0x1c8   : > { %v745_v22 = vmul.f32 %v741_v19, %v741_v19  ;;  %v744_v23 = vmul.f32 %v740_v18, %v740_v18 }
 0x1c9   : > { %748 = vadd.xlane.f32.xlu1 %v747_v21 }
 0x1ca   : > { %v750_v24 = vsel %vm726_vm1, %v745_v22, 0.0 }
 0x1cb   : > { %v751_v25 = vadd.f32 %v750_v24, %v744_v23 }
 0x1cd   : > { %752 = vadd.xlane.f32.xlu1 %v751_v25 }
 0x256   : > { %v749_v26 = vpop.xlane.xlu1 %748 }
 0x257   : > { %v754_v27 = vmul.f32 0.0046296297, %v749_v26 }
 0x259   : > { %v756_v29 = vadd.f32 1e-05, %v754_v27 }
 0x25a   : > { %v753_v30 = vpop.xlane.xlu1 %752 }
 0x25b   : > { %1168 = vrsqrt.f32 %v756_v29  ;;  %v755_v31 = vmul.f32 0.0046296297, %v753_v30 }
 0x25d   : > { %v757_v33 = vadd.f32 1e-05, %v755_v31 }
 0x25f   : > { %1170 = vrsqrt.f32 %v757_v33 }
 0x265   : > { %v1169_v40 = vpop.eup %1168 }
 0x266   : > { %v760_v43 = vmul.f32 %v1169_v40, %v738_v12  ;;  %v761_v44 = vmul.f32 %v1169_v40, %v739_v13 }
 0x268   : > { %v776_v45 = vmul.f32 %v769_v38, %v760_v43  ;;  %v777_v46 = vmul.f32 %v773_v39, %v761_v44 }
 0x269   : > { %v1171_v47 = vpop.eup %1170 }
 0x26a   : > { %v792_v48 = vadd.f32 %v785_v41, %v776_v45  ;;  %v793_v49 = vadd.f32 %v789_v42, %v777_v46  ;;  %v762_v50 = vmul.f32 %v1171_v47, %v740_v18  ;;  %v763_v51 = vmul.f32 %v1171_v47, %v741_v19 }
 0x26c   : > { %vm796_vm4 = vcmp.ge.f32.partialorder %v792_v48, 0.0  ;;  %vm797_vm5 = vcmp.ge.f32.partialorder %v793_v49, 0.0  ;;  %v800_v52 = vmul.f32 0.2, %v792_v48  ;;  %v801_v53 = vmul.f32 0.2, %v793_v49 }
 0x26d   : > { %v778_v54 = vmul.f32 %v769_v38, %v762_v50  ;;  %v779_v55 = vmul.f32 %v773_v39, %v763_v51 }
 0x26e   : > { %v804_v56 = vsel %vm796_vm4, %v792_v48, %v800_v52  ;;  %v805_v57 = vsel %vm797_vm5, %v793_v49, %v801_v53 }
 0x26f   : > { %v1033_v58 = vpack.c.bf16 %v805_v57, %v804_v56  ;;  %v794_v59 = vadd.f32 %v785_v41, %v778_v54  ;;  %v795_v60 = vadd.f32 %v789_v42, %v779_v55 }
 0x271   : > { %823 = vst.msk [vmem:[%s287_s25] sm:$0xff] %vm822_vm6, %v1033_v58  ;;  %vm798_vm7 = vcmp.ge.f32.partialorder %v794_v59, 0.0  ;;  %vm799_vm8 = vcmp.ge.f32.partialorder %v795_v60, 0.0  ;;  %v802_v61 = vmul.f32 0.2, %v794_v59 }
 0x272   : > { %v803_v62 = vmul.f32 0.2, %v795_v60 }
 0x273   : > { %v806_v63 = vsel %vm798_vm7, %v794_v59, %v802_v61 }
 0x274   : > { %v807_v0 = vsel %vm799_vm8, %v795_v60, %v803_v62 }
 0x275   : > { %v1034_v1 = vpack.c.bf16 %v807_v0, %v806_v63 }
 0x277   : > { %824 = vst.msk [vmem:[%s287_s25 + $0x8] sm:$0xff] %vm822_vm6, %v1034_v1 }
 0x278 PF: > { %s14_s19 = sadd.s32 1, %s1210_s19   ;;  %s1378_s15 = smov %s1202_s17 }
 0x279   : > { %p11_p7 = scmp.ge.s32.totalorder %s14_s19, 6   ;;  %s1379_s16 = smov %s1206_s18 }
 0x27a   : > { %s1380_s17 = smov %s1383_s20  ;;  %s1381_s18 = smov %s1387_s21 }
 0x27b   :  { %13 = sbr.rel (!%p11_p7) target bundleno = 3 (0x3), region = 75 }

// kernel: forward.6
= control target key start
LH: loop header
LB: loop body
LE: loop exit
PB: predicated region body
PF: predicated region fallthrough
CT: control target
= control target key end

     0   :  { %s717_s9 = smov 0   ;;  %s788_s0 = inlined_call_operand.vmem [shape: bf16[2,432,128], index: 0, kind: input, shape index: {}]   ;;  %s789_s1 = inlined_call_operand.vmem [shape: bf16[2,16,432], index: 1, kind: input, shape index: {}]   ;;  %s790_s2 = inlined_call_operand.vmem [shape: bf16[2,16,128], index: 2, kind: output, shape index: {}]  }
   0x1 LB: > { %s573_s10 = sadd.s32 4294967295, %s699_s9   ;;  %p577_p0 = scmp.ge.s32.totalorder %s699_s9, 1  ;;  %s699_s9 = sphi %s717_s9, %s12_s9  }
   0x2   : > { %p122_p1 = scmp.lt.s32.totalorder %s699_s9, 3 }
   0x4   : > { %p123_p2 = pnand %p577_p0, %p122_p1 }
   0x5   : > { %p149_p3 = scmp.lt.s32.totalorder (!%p123_p2), %s573_s10, 1  ;;  %v701_v0 = vmov (!%p123_p2), 0   ;;  %vm404_vm0 = vcmask (!%p123_p2), 392192  }
   0x6   : > { %126 = sbr.rel (%p123_p2) target bundleno = 283 (0x11b), region = 28  ;;  %449 = vmatprep.subr.bf16.mxu1 (!%p123_p2), %v701_v0 }
   0xd   : > { %s792_s10 = smov (!%p149_p3, %s573_s10), 1 }
   0xe   : > { %s650_s11 = smul.u32 216, %s792_s10  ;;  %s619_s12 = sshll.u32 %s792_s10, 5 }
   0xf   : > { %s733_s15 = scalar_lea.vmem %s789_s1, %s619_s12  ;;  %s620_s19 = sshll.u32 %s792_s10, 3 }
  0x10   : > { %s738_s18 = scalar_lea.vmem %s788_s0, %s650_s11  ;;  %v687_v23 = vld [vmem:[%s733_s15 + $0x4] ss:$16 sps:$4 sm:$0xff]   ;;  %v692_v25 = vld [vmem:[%s733_s15 + $0xc] ss:$16 sps:$4 sm:$0xff]   ;;  %v685_v28 = vld [vmem:[%s733_s15] ss:$16 sps:$4 sm:$0xff]   ;;  %s163_s22 = scalar_lea.vmem %s790_s2, %s620_s19 }
  0x11   : > { %v660_v1 = vld [vmem:[%s738_s18 + $0x80] sm:$0xff]   ;;  %v661_v2 = vld [vmem:[%s738_s18 + $0x88] sm:$0xff]   ;;  %v664_v5 = vld [vmem:[%s738_s18 + $0x90] sm:$0xff]   ;;  %440 = vmatprep.mubr.bf16.mxu0 %v687_v23  ;;  %614 = vmatprep.mubr.msk.bf16.mxu1 %vm404_vm0, %v692_v25 }
  0x12   : > { %450 = vmatpush1.bf16.msra.mxu1 %v660_v1  ;;  %v662_v3 = vld [vmem:[%s738_s18 + $0x40] sm:$0xff]   ;;  %v665_v6 = vld [vmem:[%s738_s18 + $0x48] sm:$0xff]   ;;  %v668_v8 = vld [vmem:[%s738_s18 + $0x50] sm:$0xff]  }
  0x13   : > { %451 = vmatprep.subr.bf16.mxu1 %v701_v0  ;;  %v663_v4 = vld [vmem:[%s738_s18] sm:$0xff]   ;;  %628 = vmatprep.subr.bf16.mxu0 %v662_v3  ;;  %v666_v7 = vld [vmem:[%s738_s18 + $0x8] sm:$0xff]   ;;  %v669_v9 = vld [vmem:[%s738_s18 + $0x10] sm:$0xff]  }
  0x14   : > { %629 = vmatpush3.bf16.msra.mxu0 %v663_v4  ;;  %v667_v10 = vld [vmem:[%s738_s18 + $0x98] sm:$0xff]   ;;  %v670_v12 = vld [vmem:[%s738_s18 + $0xa0] sm:$0xff]   ;;  %v673_v15 = vld [vmem:[%s738_s18 + $0xa8] sm:$0xff]  }
  0x15   : > { %630 = vmatprep.subr.bf16.mxu0 %v665_v6  ;;  %v671_v11 = vld [vmem:[%s738_s18 + $0x58] sm:$0xff]   ;;  %v674_v14 = vld [vmem:[%s738_s18 + $0x60] sm:$0xff]   ;;  %v677_v17 = vld [vmem:[%s738_s18 + $0x68] sm:$0xff]  }
  0x16   : > { %452 = vmatpush1.bf16.msra.mxu1 %v661_v2  ;;  %v672_v13 = vld [vmem:[%s738_s18 + $0x18] sm:$0xff]   ;;  %v675_v16 = vld [vmem:[%s738_s18 + $0x20] sm:$0xff]   ;;  %v676_v18 = vld [vmem:[%s738_s18 + $0xb0] sm:$0xff]  }
  0x17   : > { %453 = vmatprep.subr.bf16.mxu1 %v701_v0  ;;  %v678_v19 = vld [vmem:[%s738_s18 + $0x28] sm:$0xff]   ;;  %v680_v20 = vld [vmem:[%s738_s18 + $0x70] sm:$0xff]   ;;  %v679_v21 = vld [vmem:[%s738_s18 + $0xb8] sm:$0xff]  }
  0x18   : > { %631 = vmatpush3.bf16.msra.mxu0 %v666_v7  ;;  %v681_v22 = vld [vmem:[%s738_s18 + $0x30] sm:$0xff]   ;;  %v683_v24 = vld [vmem:[%s738_s18 + $0x78] sm:$0xff]   ;;  %v682_v27 = vld [vmem:[%s738_s18 + $0xc0] sm:$0xff]  }
  0x19   : > { %632 = vmatprep.subr.bf16.mxu0 %v668_v8  ;;  %v684_v26 = vld [vmem:[%s738_s18 + $0x38] sm:$0xff]   ;;  %v688_v29 = vld [vmem:[%s738_s18 + $0xc8] sm:$0xff]   ;;  %v689_v30 = vld [vmem:[%s738_s18 + $0xd0] sm:$0xff]  }
  0x1a   : > { %454 = vmatpush1.bf16.msra.mxu1 %v664_v5  ;;  %v690_v31 = vld [vmem:[%s733_s15 + $0x8] ss:$16 sps:$4 sm:$0xff]  }
  0x1b   : > { %455 = vmatprep.subr.bf16.mxu1 %v701_v0 }
  0x1c   : > { %633 = vmatpush3.bf16.msra.mxu0 %v669_v9 }
  0x1d   : > { %634 = vmatprep.subr.bf16.mxu0 %v671_v11 }
  0x1e   : > { %456 = vmatpush1.bf16.msra.mxu1 %v667_v10 }
  0x1f   : > { %457 = vmatprep.subr.bf16.mxu1 %v701_v0 }
  0x20   : > { %635 = vmatpush3.bf16.msra.mxu0 %v672_v13 }
  0x21   : > { %636 = vmatprep.subr.bf16.mxu0 %v674_v14 }
  0x22   : > { %458 = vmatpush1.bf16.msra.mxu1 %v670_v12 }
  0x23   : > { %459 = vmatprep.subr.bf16.mxu1 %v701_v0 }
  0x24   : > { %637 = vmatpush3.bf16.msra.mxu0 %v675_v16 }
  0x25   : > { %638 = vmatprep.subr.bf16.mxu0 %v677_v17 }
  0x26   : > { %460 = vmatpush1.bf16.msra.mxu1 %v673_v15 }
  0x27   : > { %461 = vmatprep.subr.bf16.mxu1 %v701_v0 }
  0x28   : > { %639 = vmatpush3.bf16.msra.mxu0 %v678_v19 }
  0x29   : > { %640 = vmatprep.subr.bf16.mxu0 %v680_v20 }
  0x2a   : > { %462 = vmatpush1.bf16.msra.mxu1 %v676_v18 }
  0x2b   : > { %463 = vmatprep.subr.bf16.mxu1 %v701_v0 }
  0x2c   : > { %641 = vmatpush3.bf16.msra.mxu0 %v681_v22 }
  0x2d   : > { %642 = vmatprep.subr.bf16.mxu0 %v683_v24 }
  0x2e   : > { %464 = vmatpush1.bf16.msra.mxu1 %v679_v21 }
  0x2f   : > { %465 = vmatprep.subr.bf16.mxu1 %v701_v0 }
  0x30   : > { %643 = vmatpush3.bf16.msra.mxu0 %v684_v26 }
  0x32   : > { %466 = vmatpush1.bf16.msra.mxu1 %v682_v27 }
  0x33   : > { %467 = vmatprep.subr.bf16.mxu1 %v701_v0  ;;  %441 = vmatmul.mubr.bf16.vlgmr.msra.gmra.mrb[0].mxu0 %v685_v28 }
  0x36   : > { %468 = vmatpush1.bf16.msra.mxu1 %v688_v29 }
  0x37   : > { %469 = vmatprep.subr.bf16.mxu1 %v701_v0 }
  0x3a   : > { %470 = vmatpush1.bf16.msra.mxu1 %v689_v30 }
  0x3d   : > { %482 = vmatmul.mubr.bf16.vlgmr.msra.gmra.mrb[0].mxu1 %v690_v31 }
 0x106   : > { %v644_v32 = vpop.f32.mrb[0].mxu0 }
 0x107   : > { %v645_v33 = vpop.f32.mrb[1].mxu0 }
 0x108   : > { %v646_v34 = vadd.f32 %v645_v33, %v644_v32  ;;  %v647_v35 = vpop.f32.mrb[2].mxu0 }
 0x109   : > { %v648_v36 = vpop.f32.mrb[3].mxu0 }
 0x10a   : > { %v649_v37 = vadd.f32 %v648_v36, %v647_v35 }
 0x110   : > { %v483_v38 = vpop.f32.mrb[0].mxu1 }
 0x111   : > { %v484_v39 = vadd.f32 %v646_v34, %v483_v38  ;;  %v485_v40 = vpop.f32.mrb[1].mxu1 }
 0x112   : > { %v486_v41 = vpop.f32.mrb[2].mxu1 }
 0x113   : > { %v492_v42 = vmul.f32 0.2, %v484_v39  ;;  %v487_v43 = vadd.f32 %v649_v37, %v486_v41  ;;  %v488_v44 = vpop.f32.mrb[3].mxu1  ;;  %vm490_vm1 = vcmp.ge.f32.partialorder %v484_v39, 0.0 }
 0x115   : > { %vm491_vm2 = vcmp.ge.f32.partialorder %v487_v43, 0.0  ;;  %v493_v45 = vmul.f32 0.2, %v487_v43  ;;  %v494_v46 = vsel %vm490_vm1, %v484_v39, %v492_v42 }
 0x117   : > { %v495_v47 = vsel %vm491_vm2, %v487_v43, %v493_v45 }
 0x118   : > { %v626_v48 = vpack.c.bf16 %v495_v47, %v494_v46 }
 0x11a   : > { %627 = vst [vmem:[%s163_s22] sm:$0xff] %v626_v48  }
 0x11b PF: > { %s12_s9 = sadd.s32 1, %s699_s9  }
 0x11c   : > { %p9_p4 = scmp.ge.s32.totalorder %s12_s9, 4  }
 0x11e   :  { %11 = sbr.rel (!%p9_p4) target bundleno = 1 (0x1), region = 61 }

// kernel: squeeze.6
= control target key start
LH: loop header
LB: loop body
LE: loop exit
PB: predicated region body
PF: predicated region fallthrough
CT: control target
= control target key end

     0   :  { %s80_s10 = smov 12  ;;  %s85_s11 = smov 48  ;;  %vm82_vm0 = vcmask 1043458   ;;  %vm87_vm1 = vcmask 1045508   ;;  %vm92_vm2 = vcmask 1047558   ;;  %vm66_vm3 = vcmask 523264   ;;  %s270_s0 = inlined_call_operand.vmem [shape: bf16[1,2,16,64], index: 0, kind: input, shape index: {}]   ;;  %s271_s1 = inlined_call_operand.vmem [shape: bf16[2,1024], index: 1, kind: output, shape index: {}]  }
   0x1   :  { %v215_v0 = vld [vmem:[%s270_s0 + $0x8] sm:$0xff]   ;;  %v212_v1 = vld [vmem:[%s270_s0] sm:$0xff]   ;;  %s77_s0 = smov 3  ;;  %s90_s12 = smov 192  ;;  %vm96_vm4 = vcmask 1048064   ;;  %v219_v27 = vmov 0.0  }
   0x2   :  { %v209_v2 = vunpack.c.l.bf16 %v215_v0  ;;  %v213_v3 = vunpack.c.l.bf16 %v212_v1  ;;  %v210_v4 = vunpack.c.h.bf16 %v215_v0  ;;  %v214_v5 = vunpack.c.h.bf16 %v212_v1  ;;  %s105_s13 = smov 3  ;;  %s108_s14 = smov 12 }
   0x3   :  { %s113_s15 = smov 48  ;;  %s118_s16 = smov 192 }
   0x4   :  { %36 = vst [vmem:[#allocation1 + $0x10] sm:$0xff] %v209_v2  ;;  %64 = vst [vmem:[#allocation1] sm:$0xff] %v213_v3  ;;  %s218_s17 = smov 64  }
   0x5   :  { %20 = vst [vmem:[#allocation1 + $0x18] sm:$0xff] %v210_v4  ;;  %51 = vst [vmem:[#allocation1 + $0x8] sm:$0xff] %v214_v5 }
   0xb   :  { %v78_v6 = vld [vmem:[#allocation1 + $0x1] ss:$16 sm:%s77_s0]   ;;  %v81_v7 = vld [vmem:[#allocation1 - $0x1d] ss:$16 sm:%s80_s10]   ;;  %v86_v8 = vld [vmem:[#allocation1 - $0x3b] ss:$16 sm:%s85_s11]  }
   0xc   :  { %v83_v9 = vsel %vm82_vm0, %v81_v7, %v78_v6  ;;  %v91_v10 = vld [vmem:[#allocation1 - $0x59] ss:$16 sm:%s90_s12]   ;;  %v106_v11 = vld [vmem:[#allocation1 + $0x9] ss:$16 sm:%s105_s13]   ;;  %v109_v12 = vld [vmem:[#allocation1 - $0x15] ss:$16 sm:%s108_s14]  }
   0xd   :  { %v88_v13 = vsel %vm87_vm1, %v86_v8, %v83_v9  ;;  %v111_v14 = vsel %vm82_vm0, %v109_v12, %v106_v11  ;;  %v114_v15 = vld [vmem:[#allocation1 - $0x33] ss:$16 sm:%s113_s15]   ;;  %v119_v16 = vld [vmem:[#allocation1 - $0x51] ss:$16 sm:%s118_s16]   ;;  %v65_v17 = vld [vmem:[#allocation1] ss:$2 sm:$0xff]  }
   0xe   :  { %v93_v18 = vsel %vm92_vm2, %v91_v10, %v88_v13  ;;  %v116_v19 = vsel %vm87_vm1, %v114_v15, %v111_v14  ;;  %67 = vst.msk [vmem:[#allocation0] ss:$8 sm:$0xf] %vm66_vm3, %v65_v17   ;;  %v70_v20 = vld [vmem:[#allocation1 + $0x10] ss:$2 sm:$0xff]  }
   0xf   :  { %68 = vst.msk [vmem:[#allocation0] ss:$8 sm:$0xf0] %vm66_vm3, %v65_v17   ;;  %94 = vrot.lane.b32.xlu0 %v93_v18, %s218_s17  ;;  %73 = vst.msk [vmem:[#allocation0 + $0x1] ss:$8 sm:$0xf] %vm66_vm3, %v70_v20   ;;  %v121_v21 = vsel %vm92_vm2, %v119_v16, %v116_v19 }
  0x10   :  { %75 = vst.msk [vmem:[#allocation0 + $0x1] ss:$8 sm:$0xf0] %vm66_vm3, %v70_v20  }
  0x13   :  { %122 = vrot.lane.b32.xlu0 %v121_v21, %s218_s17 }
  0x81   :  { %v95_v22 = vpop.permute.xlu0 %94  }
  0x82   :  { %97 = vst.msk [vmem:[#allocation0] sm:$0x3] %vm96_vm4, %v95_v22   ;;  %99 = vst.msk [vmem:[#allocation0 + $0x6] sm:$0xc] %vm96_vm4, %v95_v22  }
  0x83   :  { %101 = vst.msk [vmem:[#allocation0 + $0xc] sm:$0x30] %vm96_vm4, %v95_v22   ;;  %103 = vst.msk [vmem:[#allocation0 + $0x12] sm:$0xc0] %vm96_vm4, %v95_v22  }
  0x85   :  { %v123_v23 = vpop.permute.xlu0 %122  }
  0x86   :  { %126 = vst.msk [vmem:[#allocation0 + $0x20] sm:$0x3] %vm96_vm4, %v123_v23   ;;  %128 = vst.msk [vmem:[#allocation0 + $0x26] sm:$0xc] %vm96_vm4, %v123_v23  }
  0x87   :  { %130 = vst.msk [vmem:[#allocation0 + $0x2c] sm:$0x30] %vm96_vm4, %v123_v23   ;;  %132 = vst.msk [vmem:[#allocation0 + $0x32] sm:$0xc0] %vm96_vm4, %v123_v23  }
  0x89   :  { %v137_v24 = vld [vmem:[#allocation0] sm:$0x3]  ;;  %v142_v25 = vld [vmem:[#allocation0 + $0x8] sm:$0x3] }
  0x8a   :  { %v148_v26 = vld [vmem:[#allocation0 + $0x10] sm:$0x3]  ;;  %v138_v28 = vpack.c.bf16 %v219_v27, %v137_v24  ;;  %v143_v29 = vpack.c.bf16 %v219_v27, %v142_v25  ;;  %v155_v31 = vld [vmem:[#allocation0 + $0x18] sm:$0x3] }
  0x8b   :  { %v149_v30 = vpack.c.bf16 %v219_v27, %v148_v26  ;;  %v156_v32 = vpack.c.bf16 %v219_v27, %v155_v31 }
  0x8c   :  { %140 = vst [vmem:[%s271_s1] sm:$0x1] %v138_v28  ;;  %200 = vst [vmem:[%s271_s1 + $0x1] sm:$0x1] %v143_v29 }
  0x8d   :  { %201 = vst [vmem:[%s271_s1 + $0x2] sm:$0x1] %v149_v30  ;;  %202 = vst [vmem:[%s271_s1 + $0x3] sm:$0x1] %v156_v32  ;;  %v162_v33 = vld [vmem:[#allocation0 + $0x20] sm:$0x3] }
  0x8e   :  { %v169_v34 = vld [vmem:[#allocation0 + $0x28] sm:$0x3]  ;;  %v176_v35 = vld [vmem:[#allocation0 + $0x30] sm:$0x3]  ;;  %v163_v36 = vpack.c.bf16 %v219_v27, %v162_v33  ;;  %v183_v39 = vld [vmem:[#allocation0 + $0x38] sm:$0x3] }
  0x8f   :  { %v170_v37 = vpack.c.bf16 %v219_v27, %v169_v34  ;;  %v177_v38 = vpack.c.bf16 %v219_v27, %v176_v35  ;;  %v184_v40 = vpack.c.bf16 %v219_v27, %v183_v39 }
  0x90   :  { %203 = vst [vmem:[%s271_s1 + $0x4] sm:$0x1] %v163_v36 }
  0x91   :  { %204 = vst [vmem:[%s271_s1 + $0x5] sm:$0x1] %v170_v37  ;;  %205 = vst [vmem:[%s271_s1 + $0x6] sm:$0x1] %v177_v38 }
  0x92   :  { %206 = vst [vmem:[%s271_s1 + $0x7] sm:$0x1] %v184_v40 }

// kernel: forward.7
= control target key start
LH: loop header
LB: loop body
LE: loop exit
PB: predicated region body
PF: predicated region fallthrough
CT: control target
= control target key end

     0   :  { %s6056_s20 = smov 0   ;;  %s6914_s0 = inlined_call_operand.vmem [shape: bf16[2,1024], index: 0, kind: input, shape index: {}]   ;;  %s6915_s1 = inlined_call_operand.vmem [shape: bf16[2,1024], index: 1, kind: input, shape index: {}]   ;;  %s6916_s2 = inlined_call_operand.vmem [shape: bf16[2,27648], index: 2, kind: input, shape index: {}]   ;;  %s6917_s3 = inlined_call_operand.vmem [shape: bf16[27648,8], index: 3, kind: input, shape index: {}]   ;;  %s6918_s4 = inlined_call_operand.vmem [shape: f32[2,1], index: 4, kind: input, shape index: {}]   ;;  %s6919_s5 = inlined_call_operand.vmem [shape: bf16[1024,16], index: 5, kind: input, shape index: {}]   ;;  %s6920_s6 = inlined_call_operand.vmem [shape: f32[1,8], index: 6, kind: input, shape index: {}]   ;;  %s6921_s7 = inlined_call_operand.vmem [shape: f32[1,8], index: 7, kind: input, shape index: {}]   ;;  %s6922_s8 = inlined_call_operand.vmem [shape: f32[1,8], index: 8, kind: input, shape index: {}]   ;;  %s6923_s9 = inlined_call_operand.vmem [shape: f32[1,8], index: 9, kind: input, shape index: {}]   ;;  %s6924_s10 = inlined_call_operand.vmem [shape: f32[1,8], index: 10, kind: input, shape index: {}]   ;;  %s6925_s11 = inlined_call_operand.vmem [shape: f32[32,32], index: 11, kind: input, shape index: {}]   ;;  %s6926_s12 = inlined_call_operand.vmem [shape: f32[1,32], index: 12, kind: input, shape index: {}]   ;;  %s6927_s13 = inlined_call_operand.vmem [shape: f32[32,32], index: 13, kind: input, shape index: {}]   ;;  %s6928_s14 = inlined_call_operand.vmem [shape: f32[1,32], index: 14, kind: input, shape index: {}]   ;;  %s6929_s15 = inlined_call_operand.vmem [shape: f32[32,32], index: 15, kind: input, shape index: {}]   ;;  %s6930_s16 = inlined_call_operand.vmem [shape: f32[1,32], index: 16, kind: input, shape index: {}]   ;;  %s6931_s17 = inlined_call_operand.vmem [shape: f32[32,1], index: 17, kind: input, shape index: {}]   ;;  %s6932_s18 = inlined_call_operand.<no memory space> [shape: f32[1,1], index: 18, kind: input, shape index: {}]   ;;  %s6933_s19 = inlined_call_operand.vmem [shape: f32[2,1], index: 19, kind: output, shape index: {}]  }
   0x1   :  { %6942 = sst [smem:[#allocation12_spill]] %s6914_s0  ;;  %v24_v0 = vstv %s6932_s18 }
   0x2   :  { %6943 = sst [smem:[#allocation13_spill]] %s6915_s1  ;;  %25 = vst [vmem:[#allocation3] sm:$0x1] %v24_v0 }
   0x3   :  { %6944 = sst [smem:[#allocation14_spill]] %s6916_s2 }
   0x4   :  { %6945 = sst [smem:[#allocation15_spill]] %s6917_s3 }
   0x5 LB: > { %s6062_s21 = sadd.s32 4294967295, %s5941_s20   ;;  %p4743_p0 = scmp.ge.s32.totalorder %s5941_s20, 1  ;;  %s5941_s20 = sphi %s6056_s20, %s31_s20  }
   0x6   : > { %p545_p1 = scmp.lt.s32.totalorder %s5941_s20, 9 }
   0x8   : > { %p546_p2 = pnand %p4743_p0, %p545_p1 }
   0x9   : > { %s600_s18 = smul.u32 (!%p546_p2), 27, %s6062_s21  ;;  %s6946_s23 = sld [smem:[#allocation14_spill]] (!%p546_p2) }
   0xa   : > { %549 = sbr.rel (%p546_p2) target bundleno = 1819 (0x71b), region = 96  ;;  %s6947_s27 = sld [smem:[#allocation15_spill]] (!%p546_p2) }
   0xb   : > { %s605_s1 = smul.u32 (!%p546_p2), 432, %s6062_s21  ;;  %p601_p3 = scmp.lt.s32.totalorder (!%p546_p2), %s600_s18, 215 }
   0xc   : > { %p4745_p5 = scmp.ne.s32.totalorder (!%p546_p2), %s6062_s21, 0 }
   0xd   : > { %p606_p4 = scmp.lt.s32.totalorder (!%p546_p2), %s605_s1, 3455 }
  0x11   : > { %s6967_s18 = smov (!%p601_p3, %s600_s18), 215  ;;  %s6969_s1 = smov (!%p606_p4, %s605_s1), 3455 }
  0x12   : > { %s6071_s24 = scalar_lea.vmem %s6946_s23, %s6967_s18  ;;  %s4744_s25 = sshll.u32 %s6969_s1, 2  ;;  %vm616_vm0 = vcmask (!%p4745_p5), 58368   ;;  %v5943_v1 = vmov (!%p4745_p5), 0.0  }
  0x13   : > { %s6076_s28 = scalar_lea.vmem %s6947_s27, %s4744_s25  ;;  %615 = sbr.rel (%p4745_p5) target bundleno = 26 (0x1a), region = 100  ;;  %617 = vst.msk [vmem:[#allocation2] sm:$0x3] (!%p4745_p5), %vm616_vm0, %v5943_v1 }
  0x1a PF: > { %v5649_v2 = vld [vmem:[%s6076_s28 + $0x40] sm:$0xff]   ;;  %v5653_v6 = vld [vmem:[%s6076_s28 + $0x48] sm:$0xff]   ;;  %v5657_v10 = vld [vmem:[%s6076_s28 + $0x50] sm:$0xff]   ;;  %v1063_v31 = vlaneseq  ;;  %v5944_v37 = vmov 1966171168   ;;  %vm5946_vm1 = vmmov 0  }
  0x1b   : > { %v5650_v3 = vld [vmem:[%s6076_s28 + $0xc0] sm:$0xff]   ;;  %5046 = vmatprep.subr.bf16.mxu0 %v5649_v2  ;;  %v5654_v7 = vld [vmem:[%s6076_s28 + $0xc8] sm:$0xff]   ;;  %v5658_v11 = vld [vmem:[%s6076_s28 + $0xd0] sm:$0xff]   ;;  %v1061_v38 = vunpack.c.l.s4 %v5944_v37  ;;  %vm3113_vm2 = vcmask 58368   ;;  %p4963_p6 = scmp.ne.s32.totalorder %s6062_s21, 7 }
  0x1c   : > { %v5651_v4 = vld [vmem:[%s6076_s28] sm:$0xff]   ;;  %5068 = vmatprep.subr.bf16.mxu1 %v5650_v3  ;;  %v5655_v8 = vld [vmem:[%s6076_s28 + $0x8] sm:$0xff]   ;;  %v5659_v12 = vld [vmem:[%s6076_s28 + $0x10] sm:$0xff]   ;;  %v1064_v35 = vshrl.u32 %v1063_v31, 7 }
  0x1d   : > { %v5652_v5 = vld [vmem:[%s6076_s28 + $0x80] sm:$0xff]   ;;  %5047 = vmatpush3.bf16.msra.mxu0 %v5651_v4  ;;  %v5656_v9 = vld [vmem:[%s6076_s28 + $0x88] sm:$0xff]   ;;  %v5660_v13 = vld [vmem:[%s6076_s28 + $0x90] sm:$0xff]   ;;  %v1062_v41 = vunpack.c.0.s8 %v1061_v38 }
  0x1e   : > { %5069 = vmatpush3.bf16.msra.mxu1 %v5652_v5  ;;  %5048 = vmatprep.subr.bf16.mxu0 %v5653_v6  ;;  %v5661_v14 = vld [vmem:[%s6076_s28 + $0x58] sm:$0xff]   ;;  %v5665_v18 = vld [vmem:[%s6076_s28 + $0x60] sm:$0xff]   ;;  %v5669_v22 = vld [vmem:[%s6076_s28 + $0x68] sm:$0xff]  }
  0x1f   : > { %5070 = vmatprep.subr.bf16.mxu1 %v5654_v7  ;;  %v5662_v15 = vld [vmem:[%s6076_s28 + $0xd8] sm:$0xff]   ;;  %v5666_v19 = vld [vmem:[%s6076_s28 + $0xe0] sm:$0xff]   ;;  %v5670_v23 = vld [vmem:[%s6076_s28 + $0xe8] sm:$0xff]   ;;  %v6114_v43 = vsub.s32 %v1062_v41, %v1064_v35 }
  0x20   : > { %v5663_v16 = vld [vmem:[%s6076_s28 + $0x18] sm:$0xff]   ;;  %v5667_v20 = vld [vmem:[%s6076_s28 + $0x20] sm:$0xff]   ;;  %v5671_v24 = vld [vmem:[%s6076_s28 + $0x28] sm:$0xff]  }
  0x21   : > { %5049 = vmatpush3.bf16.msra.mxu0 %v5655_v8  ;;  %v5664_v17 = vld [vmem:[%s6076_s28 + $0x98] sm:$0xff]   ;;  %v5668_v21 = vld [vmem:[%s6076_s28 + $0xa0] sm:$0xff]   ;;  %v5672_v25 = vld [vmem:[%s6076_s28 + $0xa8] sm:$0xff]  }
  0x22   : > { %5071 = vmatpush3.bf16.msra.mxu1 %v5656_v9  ;;  %5050 = vmatprep.subr.bf16.mxu0 %v5657_v10  ;;  %v5673_v26 = vld [vmem:[%s6076_s28 + $0x70] sm:$0xff]   ;;  %v5677_v30 = vld [vmem:[%s6076_s28 + $0x78] sm:$0xff]   ;;  %v5682_v36 = vld [vmem:[%s6076_s28 + $0x140] sm:$0xff]  }
  0x23   : > { %5072 = vmatprep.subr.bf16.mxu1 %v5658_v11  ;;  %v5674_v27 = vld [vmem:[%s6076_s28 + $0xf0] sm:$0xff]   ;;  %v5678_v32 = vld [vmem:[%s6076_s28 + $0xf8] sm:$0xff]   ;;  %v619_v39 = vld [vmem:[%s6071_s24] sm:$0xff] }
  0x24   : > { %v5675_v28 = vld [vmem:[%s6076_s28 + $0x30] sm:$0xff]   ;;  %v5679_v33 = vld [vmem:[%s6076_s28 + $0x38] sm:$0xff]   ;;  %v1059_v40 = vcombine.high %v619_v39, %v619_v39  ;;  %v5684_v42 = vld [vmem:[%s6076_s28 + $0x1c0] sm:$0xff]   ;;  %v1066_v44 = vrot.slane %v619_v39, %v6114_v43 }
  0x25   : > { %5051 = vmatpush3.bf16.msra.mxu0 %v5659_v12  ;;  %v5676_v29 = vld [vmem:[%s6076_s28 + $0xb0] sm:$0xff]   ;;  %v5680_v34 = vld [vmem:[%s6076_s28 + $0xb8] sm:$0xff]   ;;  %v5683_v50 = vld [vmem:[%s6076_s28 + $0x100] sm:$0xff]  }
  0x26   : > { %5073 = vmatpush3.bf16.msra.mxu1 %v5660_v13  ;;  %5052 = vmatprep.subr.bf16.mxu0 %v5661_v14  ;;  %v6118_v45 = vrot.slane %v1059_v40, %v6114_v43  ;;  %v1074_v46 = vcombine.high %v1066_v44, %v1066_v44  ;;  %v1082_v47 = vrot.slane %v1066_v44, %v6114_v43  ;;  %v5686_v53 = vld [vmem:[%s6076_s28 + $0x148] sm:$0xff]   ;;  %v5685_v55 = vld [vmem:[%s6076_s28 + $0x180] sm:$0xff]   ;;  %v5690_v59 = vld [vmem:[%s6076_s28 + $0x150] sm:$0xff]  }
  0x27   : > { %5074 = vmatprep.subr.bf16.mxu1 %v5662_v15  ;;  %v5688_v56 = vld [vmem:[%s6076_s28 + $0x1c8] sm:$0xff]   ;;  %v5692_v61 = vld [vmem:[%s6076_s28 + $0x1d0] sm:$0xff]   ;;  %v5694_v63 = vld [vmem:[%s6076_s28 + $0x158] sm:$0xff]  }
  0x28   : > { %v1075_v48 = vcombine.high %v6118_v45, %v6118_v45  ;;  %v1096_v49 = vrot.slane %v1074_v46, %v6114_v43  ;;  %v1104_v52 = vcombine.high %v1082_v47, %v1082_v47  ;;  %v5687_v58 = vld [vmem:[%s6076_s28 + $0x108] sm:$0xff]   ;;  %v5691_v62 = vld [vmem:[%s6076_s28 + $0x110] sm:$0xff]   ;;  %v5696_v1 = vld [vmem:[%s6076_s28 + $0x1d8] sm:$0xff]  }
  0x29   : > { %5053 = vmatpush3.bf16.msra.mxu0 %v5663_v16  ;;  %v5689_v60 = vld [vmem:[%s6076_s28 + $0x188] sm:$0xff]   ;;  %v5693_v0 = vld [vmem:[%s6076_s28 + $0x190] sm:$0xff]   ;;  %v5695_v2 = vld [vmem:[%s6076_s28 + $0x118] sm:$0xff]  }
  0x2a   : > { %5075 = vmatpush3.bf16.msra.mxu1 %v5664_v17  ;;  %5054 = vmatprep.subr.bf16.mxu0 %v5665_v18  ;;  %v1103_v51 = vrot.slane %v1075_v48, %v6114_v43  ;;  %v1106_v54 = vcombine.high %v1096_v49, %v1096_v49  ;;  %v5698_v3 = vld [vmem:[%s6076_s28 + $0x160] sm:$0xff]   ;;  %v5697_v4 = vld [vmem:[%s6076_s28 + $0x198] sm:$0xff]   ;;  %v5702_v7 = vld [vmem:[%s6076_s28 + $0x168] sm:$0xff]  }
  0x2b   : > { %5076 = vmatprep.subr.bf16.mxu1 %v5666_v19  ;;  %2584 = vmatprep.mubr.bf16.mxu0 %v1096_v49  ;;  %v5700_v5 = vld [vmem:[%s6076_s28 + $0x1e0] sm:$0xff]   ;;  %v5704_v9 = vld [vmem:[%s6076_s28 + $0x1e8] sm:$0xff]   ;;  %v5706_v11 = vld [vmem:[%s6076_s28 + $0x170] sm:$0xff]   ;;  %v1089_v19 = vrot.slane %v6118_v45, %v6114_v43 }
  0x2c   : > { %v1107_v57 = vcombine.high %v1103_v51, %v1103_v51  ;;  %2624 = vmatprep.mubr.bf16.mxu1 %v1106_v54  ;;  %v5699_v6 = vld [vmem:[%s6076_s28 + $0x120] sm:$0xff]   ;;  %v5703_v10 = vld [vmem:[%s6076_s28 + $0x128] sm:$0xff]   ;;  %v5708_v13 = vld [vmem:[%s6076_s28 + $0x1f0] sm:$0xff]  }
  0x2d   : > { %5055 = vmatpush3.bf16.msra.mxu0 %v5667_v20  ;;  %v5701_v8 = vld [vmem:[%s6076_s28 + $0x1a0] sm:$0xff]   ;;  %v5705_v12 = vld [vmem:[%s6076_s28 + $0x1a8] sm:$0xff]   ;;  %v5707_v14 = vld [vmem:[%s6076_s28 + $0x130] sm:$0xff]  }
  0x2e   : > { %5077 = vmatpush3.bf16.msra.mxu1 %v5668_v21  ;;  %5056 = vmatprep.subr.bf16.mxu0 %v5669_v22  ;;  %v5710_v15 = vld [vmem:[%s6076_s28 + $0x178] sm:$0xff]   ;;  %v5709_v16 = vld [vmem:[%s6076_s28 + $0x1b0] sm:$0xff]   ;;  %v5714_v20 = vld [vmem:[%s6076_s28 + $0x240] sm:$0xff]  }
  0x2f   : > { %5078 = vmatprep.subr.bf16.mxu1 %v5670_v23  ;;  %v5712_v17 = vld [vmem:[%s6076_s28 + $0x1f8] sm:$0xff]   ;;  %v5716_v22 = vld [vmem:[%s6076_s28 + $0x2c0] sm:$0xff]   ;;  %v5724_v31 = vld [vmem:[%s6076_s28 + $0x2d0] sm:$0xff]  }
  0x30   : > { %v5711_v18 = vld [vmem:[%s6076_s28 + $0x138] sm:$0xff]   ;;  %v5715_v23 = vld [vmem:[%s6076_s28 + $0x200] sm:$0xff]   ;;  %v5734_v41 = vld [vmem:[%s6076_s28 + $0x268] sm:$0xff]  }
  0x31   : > { %5057 = vmatpush3.bf16.msra.mxu0 %v5671_v24  ;;  %v5713_v21 = vld [vmem:[%s6076_s28 + $0x1b8] sm:$0xff]   ;;  %v1105_v24 = vcombine.high %v1089_v19, %v1089_v19  ;;  %v5730_v37 = vld [vmem:[%s6076_s28 + $0x260] sm:$0xff]   ;;  %v5736_v44 = vld [vmem:[%s6076_s28 + $0x2e8] sm:$0xff]  }
  0x32   : > { %5079 = vmatpush3.bf16.msra.mxu1 %v5672_v25  ;;  %5058 = vmatprep.subr.bf16.mxu0 %v5673_v26  ;;  %v5718_v25 = vld [vmem:[%s6076_s28 + $0x248] sm:$0xff]   ;;  %v5717_v26 = vld [vmem:[%s6076_s28 + $0x280] sm:$0xff]   ;;  %v5728_v35 = vld [vmem:[%s6076_s28 + $0x2d8] sm:$0xff]  }
  0x33   : > { %5080 = vmatprep.subr.bf16.mxu1 %v5674_v27  ;;  %v5720_v27 = vld [vmem:[%s6076_s28 + $0x2c8] sm:$0xff]   ;;  %v5729_v38 = vld [vmem:[%s6076_s28 + $0x298] sm:$0xff]   ;;  %v5732_v39 = vld [vmem:[%s6076_s28 + $0x2e0] sm:$0xff]  }
  0x34   : > { %v5731_v40 = vld [vmem:[%s6076_s28 + $0x220] sm:$0xff]   ;;  %v5735_v45 = vld [vmem:[%s6076_s28 + $0x228] sm:$0xff]   ;;  %v5739_v54 = vld [vmem:[%s6076_s28 + $0x230] sm:$0xff]  }
  0x35   : > { %5059 = vmatpush3.bf16.msra.mxu0 %v5675_v28  ;;  %v5719_v28 = vld [vmem:[%s6076_s28 + $0x208] sm:$0xff]  }
  0x36   : > { %5081 = vmatpush3.bf16.msra.mxu1 %v5676_v29  ;;  %5060 = vmatprep.subr.bf16.mxu0 %v5677_v30  ;;  %v5722_v29 = vld [vmem:[%s6076_s28 + $0x250] sm:$0xff]   ;;  %v5721_v30 = vld [vmem:[%s6076_s28 + $0x288] sm:$0xff]  }
  0x37   : > { %5082 = vmatprep.subr.bf16.mxu1 %v5678_v32  ;;  %v5723_v32 = vld [vmem:[%s6076_s28 + $0x210] sm:$0xff]   ;;  %v620_v46 = vld [vmem:[%s6071_s24 + $0x8] sm:$0xff] }
  0x38   : > { %v1115_v48 = vrot.slane %v620_v46, %v6114_v43  ;;  %v1108_v49 = vcombine.high %v620_v46, %v620_v46  ;;  %v5786_v46 = vld [vmem:[%s6076_s28 + $0x488] sm:$0xff]  }
  0x39   : > { %5061 = vmatpush3.bf16.msra.mxu0 %v5679_v33  ;;  %v5726_v33 = vld [vmem:[%s6076_s28 + $0x258] sm:$0xff]  }
  0x3a   : > { %5083 = vmatpush3.bf16.msra.mxu1 %v5680_v34  ;;  %5090 = vmatprep.subr.bf16.mxu0 %v5682_v36  ;;  %v5725_v34 = vld [vmem:[%s6076_s28 + $0x290] sm:$0xff]   ;;  %v5727_v36 = vld [vmem:[%s6076_s28 + $0x218] sm:$0xff]  }
  0x3b   : > { %5112 = vmatprep.subr.bf16.mxu1 %v5684_v42  ;;  %v5733_v42 = vld [vmem:[%s6076_s28 + $0x2a0] sm:$0xff]  }
  0x3c   : > { %2585 = vmatmul.mubr.bf16.vlgmr.msra.gmra.mrb[0].mxu0 %v1082_v47  ;;  %v5738_v47 = vld [vmem:[%s6076_s28 + $0x270] sm:$0xff]  }
  0x3d   : > { %5091 = vmatpush3.bf16.msra.mxu0 %v5683_v50  ;;  %2625 = vmatmul.mubr.bf16.vlgmr.msra.gmra.mrb[0].mxu1 %v1104_v52  ;;  %v5737_v50 = vld [vmem:[%s6076_s28 + $0x2a8] sm:$0xff]   ;;  %v1123_v52 = vcombine.high %v1115_v48, %v1115_v48 }
  0x3e   : > { %5092 = vmatprep.subr.bf16.mxu0 %v5686_v53  ;;  %5113 = vmatpush3.bf16.msra.mxu1 %v5685_v55  ;;  %v6186_v53 = vrot.slane %v1108_v49, %v6114_v43  ;;  %v5742_v55 = vld [vmem:[%s6076_s28 + $0x278] sm:$0xff]  }
  0x3f   : > { %2664 = vmatprep.mubr.bf16.mxu0 %v1103_v51  ;;  %5114 = vmatprep.subr.bf16.mxu1 %v5688_v56  ;;  %v5740_v51 = vld [vmem:[%s6076_s28 + $0x2f0] sm:$0xff]   ;;  %v1145_v56 = vrot.slane %v1123_v52, %v6114_v43  ;;  %v5791_v49 = vld [vmem:[%s6076_s28 + $0x458] sm:$0xff]  }
  0x40   : > { %2704 = vmatprep.mubr.bf16.mxu1 %v1107_v57  ;;  %v5741_v57 = vld [vmem:[%s6076_s28 + $0x2b0] sm:$0xff]   ;;  %v5792_v52 = vld [vmem:[%s6076_s28 + $0x418] sm:$0xff]  }
  0x41   : > { %5093 = vmatpush3.bf16.msra.mxu0 %v5687_v58  ;;  %v1124_v58 = vcombine.high %v6186_v53, %v6186_v53 }
  0x42   : > { %5094 = vmatprep.subr.bf16.mxu0 %v5690_v59  ;;  %5115 = vmatpush3.bf16.msra.mxu1 %v5689_v60  ;;  %v5744_v59 = vld [vmem:[%s6076_s28 + $0x2f8] sm:$0xff]   ;;  %v1155_v60 = vcombine.high %v1145_v56, %v1145_v56 }
  0x43   : > { %5116 = vmatprep.subr.bf16.mxu1 %v5692_v61  ;;  %v5743_v61 = vld [vmem:[%s6076_s28 + $0x238] sm:$0xff]  }
  0x45   : > { %5095 = vmatpush3.bf16.msra.mxu0 %v5691_v62  ;;  %v1131_v62 = vrot.slane %v1115_v48, %v6114_v43  ;;  %v5788_v48 = vld [vmem:[%s6076_s28 + $0x410] sm:$0xff]  }
  0x46   : > { %5096 = vmatprep.subr.bf16.mxu0 %v5694_v63  ;;  %5117 = vmatpush3.bf16.msra.mxu1 %v5693_v0  ;;  %v5746_v63 = vld [vmem:[%s6076_s28 + $0x340] sm:$0xff]   ;;  %v5745_v0 = vld [vmem:[%s6076_s28 + $0x2b8] sm:$0xff]  }
  0x47   : > { %5118 = vmatprep.subr.bf16.mxu1 %v5696_v1  ;;  %v1152_v1 = vrot.slane %v1124_v58, %v6114_v43  ;;  %v5798_v58 = vld [vmem:[%s6076_s28 + $0x4a0] sm:$0xff]  }
  0x49   : > { %5097 = vmatpush3.bf16.msra.mxu0 %v5695_v2  ;;  %v5748_v2 = vld [vmem:[%s6076_s28 + $0x3c0] sm:$0xff]  }
  0x4a   : > { %5098 = vmatprep.subr.bf16.mxu0 %v5698_v3  ;;  %5119 = vmatpush3.bf16.msra.mxu1 %v5697_v4  ;;  %v5747_v3 = vld [vmem:[%s6076_s28 + $0x300] sm:$0xff]   ;;  %v1153_v4 = vcombine.high %v1131_v62, %v1131_v62 }
  0x4b   : > { %5120 = vmatprep.subr.bf16.mxu1 %v5700_v5  ;;  %v5750_v5 = vld [vmem:[%s6076_s28 + $0x348] sm:$0xff]  }
  0x4d   : > { %5099 = vmatpush3.bf16.msra.mxu0 %v5699_v6  ;;  %v5749_v6 = vld [vmem:[%s6076_s28 + $0x380] sm:$0xff]  }
  0x4e   : > { %5100 = vmatprep.subr.bf16.mxu0 %v5702_v7  ;;  %5121 = vmatpush3.bf16.msra.mxu1 %v5701_v8  ;;  %v1156_v7 = vcombine.high %v1152_v1, %v1152_v1  ;;  %v5752_v8 = vld [vmem:[%s6076_s28 + $0x3c8] sm:$0xff]  }
  0x4f   : > { %5122 = vmatprep.subr.bf16.mxu1 %v5704_v9  ;;  %v5751_v9 = vld [vmem:[%s6076_s28 + $0x308] sm:$0xff]  }
  0x51   : > { %5101 = vmatpush3.bf16.msra.mxu0 %v5703_v10  ;;  %v5754_v10 = vld [vmem:[%s6076_s28 + $0x350] sm:$0xff]  }
  0x52   : > { %5102 = vmatprep.subr.bf16.mxu0 %v5706_v11  ;;  %5123 = vmatpush3.bf16.msra.mxu1 %v5705_v12  ;;  %v5753_v11 = vld [vmem:[%s6076_s28 + $0x388] sm:$0xff]   ;;  %v5756_v12 = vld [vmem:[%s6076_s28 + $0x3d0] sm:$0xff]  }
  0x53   : > { %5124 = vmatprep.subr.bf16.mxu1 %v5708_v13  ;;  %v5755_v13 = vld [vmem:[%s6076_s28 + $0x310] sm:$0xff]  }
  0x55   : > { %5103 = vmatpush3.bf16.msra.mxu0 %v5707_v14  ;;  %v5758_v14 = vld [vmem:[%s6076_s28 + $0x358] sm:$0xff]  }
  0x56   : > { %5104 = vmatprep.subr.bf16.mxu0 %v5710_v15  ;;  %5125 = vmatpush3.bf16.msra.mxu1 %v5709_v16  ;;  %v5757_v15 = vld [vmem:[%s6076_s28 + $0x390] sm:$0xff]   ;;  %v5760_v16 = vld [vmem:[%s6076_s28 + $0x3d8] sm:$0xff]  }
  0x57   : > { %5126 = vmatprep.subr.bf16.mxu1 %v5712_v17  ;;  %v5759_v17 = vld [vmem:[%s6076_s28 + $0x318] sm:$0xff]  }
  0x59   : > { %5105 = vmatpush3.bf16.msra.mxu0 %v5711_v18  ;;  %v5762_v18 = vld [vmem:[%s6076_s28 + $0x360] sm:$0xff]  }
  0x5a   : > { %5134 = vmatprep.subr.bf16.mxu0 %v5714_v20  ;;  %5127 = vmatpush3.bf16.msra.mxu1 %v5713_v21  ;;  %v5764_v20 = vld [vmem:[%s6076_s28 + $0x3e0] sm:$0xff]  }
  0x5b   : > { %5156 = vmatprep.subr.bf16.mxu1 %v5716_v22  ;;  %v5763_v21 = vld [vmem:[%s6076_s28 + $0x320] sm:$0xff]   ;;  %v5766_v22 = vld [vmem:[%s6076_s28 + $0x368] sm:$0xff]  }
  0x5c   : > { %2665 = vmatmul.mubr.bf16.vlgmr.msra.gmra.mrb[4].mxu0 %v1089_v19  ;;  %v5761_v19 = vld [vmem:[%s6076_s28 + $0x398] sm:$0xff]  }
  0x5d   : > { %5135 = vmatpush3.bf16.msra.mxu0 %v5715_v23  ;;  %2705 = vmatmul.mubr.bf16.vlgmr.msra.gmra.mrb[4].mxu1 %v1105_v24  ;;  %v5765_v23 = vld [vmem:[%s6076_s28 + $0x3a0] sm:$0xff]   ;;  %v5768_v24 = vld [vmem:[%s6076_s28 + $0x3e8] sm:$0xff]  }
  0x5e   : > { %5136 = vmatprep.subr.bf16.mxu0 %v5718_v25  ;;  %5157 = vmatpush3.bf16.msra.mxu1 %v5717_v26  ;;  %v5767_v25 = vld [vmem:[%s6076_s28 + $0x328] sm:$0xff]   ;;  %v5770_v26 = vld [vmem:[%s6076_s28 + $0x370] sm:$0xff]  }
  0x5f   : > { %5158 = vmatprep.subr.bf16.mxu1 %v5720_v27  ;;  %2744 = vmatprep.mubr.bf16.mxu0 %v1145_v56  ;;  %v5769_v27 = vld [vmem:[%s6076_s28 + $0x3a8] sm:$0xff]   ;;  %v5796_v56 = vld [vmem:[%s6076_s28 + $0x420] sm:$0xff]  }
  0x60   : > { %2784 = vmatprep.mubr.bf16.mxu1 %v1155_v60  ;;  %v5800_v60 = vld [vmem:[%s6076_s28 + $0x428] sm:$0xff]  }
  0x61   : > { %5137 = vmatpush3.bf16.msra.mxu0 %v5719_v28  ;;  %v5772_v28 = vld [vmem:[%s6076_s28 + $0x3f0] sm:$0xff]  }
  0x62   : > { %5138 = vmatprep.subr.bf16.mxu0 %v5722_v29  ;;  %5159 = vmatpush3.bf16.msra.mxu1 %v5721_v30  ;;  %v5771_v29 = vld [vmem:[%s6076_s28 + $0x330] sm:$0xff]   ;;  %v5774_v30 = vld [vmem:[%s6076_s28 + $0x378] sm:$0xff]  }
  0x63   : > { %5160 = vmatprep.subr.bf16.mxu1 %v5724_v31  ;;  %v5773_v31 = vld [vmem:[%s6076_s28 + $0x3b0] sm:$0xff]  }
  0x65   : > { %5139 = vmatpush3.bf16.msra.mxu0 %v5723_v32  ;;  %v5776_v32 = vld [vmem:[%s6076_s28 + $0x3f8] sm:$0xff]  }
  0x66   : > { %5140 = vmatprep.subr.bf16.mxu0 %v5726_v33  ;;  %5161 = vmatpush3.bf16.msra.mxu1 %v5725_v34  ;;  %v5775_v33 = vld [vmem:[%s6076_s28 + $0x338] sm:$0xff]   ;;  %v1138_v34 = vrot.slane %v6186_v53, %v6114_v43  ;;  %v5795_v53 = vld [vmem:[%s6076_s28 + $0x460] sm:$0xff]  }
  0x67   : > { %5162 = vmatprep.subr.bf16.mxu1 %v5728_v35  ;;  %v5779_v35 = vld [vmem:[%s6076_s28 + $0x440] sm:$0xff]  }
  0x69   : > { %5141 = vmatpush3.bf16.msra.mxu0 %v5727_v36  ;;  %v5778_v36 = vld [vmem:[%s6076_s28 + $0x3b8] sm:$0xff]  }
  0x6a   : > { %5142 = vmatprep.subr.bf16.mxu0 %v5730_v37  ;;  %5163 = vmatpush3.bf16.msra.mxu1 %v5729_v38  ;;  %v5781_v37 = vld [vmem:[%s6076_s28 + $0x4c0] sm:$0xff]  }
  0x6b   : > { %5164 = vmatprep.subr.bf16.mxu1 %v5732_v39  ;;  %v5780_v38 = vld [vmem:[%s6076_s28 + $0x400] sm:$0xff]   ;;  %v1154_v39 = vcombine.high %v1138_v34, %v1138_v34 }
  0x6d   : > { %5143 = vmatpush3.bf16.msra.mxu0 %v5731_v40  ;;  %v5783_v40 = vld [vmem:[%s6076_s28 + $0x448] sm:$0xff]  }
  0x6e   : > { %5144 = vmatprep.subr.bf16.mxu0 %v5734_v41  ;;  %5165 = vmatpush3.bf16.msra.mxu1 %v5733_v42  ;;  %v5782_v41 = vld [vmem:[%s6076_s28 + $0x480] sm:$0xff]   ;;  %v5785_v42 = vld [vmem:[%s6076_s28 + $0x4c8] sm:$0xff]  }
  0x6f   : > { %5166 = vmatprep.subr.bf16.mxu1 %v5736_v44  ;;  %v5784_v44 = vld [vmem:[%s6076_s28 + $0x408] sm:$0xff]  }
  0x71   : > { %5145 = vmatpush3.bf16.msra.mxu0 %v5735_v45  ;;  %v5787_v45 = vld [vmem:[%s6076_s28 + $0x450] sm:$0xff]  }
  0x72   : > { %5146 = vmatprep.subr.bf16.mxu0 %v5738_v47  ;;  %5167 = vmatpush3.bf16.msra.mxu1 %v5737_v50  ;;  %v5789_v47 = vld [vmem:[%s6076_s28 + $0x4d0] sm:$0xff]  }
  0x73   : > { %5168 = vmatprep.subr.bf16.mxu1 %v5740_v51  ;;  %v5790_v50 = vld [vmem:[%s6076_s28 + $0x490] sm:$0xff]   ;;  %v5793_v51 = vld [vmem:[%s6076_s28 + $0x4d8] sm:$0xff]  }
  0x75   : > { %5147 = vmatpush3.bf16.msra.mxu0 %v5739_v54  ;;  %v5794_v54 = vld [vmem:[%s6076_s28 + $0x498] sm:$0xff]  }
  0x76   : > { %5148 = vmatprep.subr.bf16.mxu0 %v5742_v55  ;;  %5169 = vmatpush3.bf16.msra.mxu1 %v5741_v57  ;;  %v5797_v55 = vld [vmem:[%s6076_s28 + $0x4e0] sm:$0xff]   ;;  %v5799_v57 = vld [vmem:[%s6076_s28 + $0x468] sm:$0xff]  }
  0x77   : > { %5170 = vmatprep.subr.bf16.mxu1 %v5744_v59  ;;  %v5801_v59 = vld [vmem:[%s6076_s28 + $0x4e8] sm:$0xff]  }
  0x79   : > { %5149 = vmatpush3.bf16.msra.mxu0 %v5743_v61  ;;  %v621_v61 = vld [vmem:[%s6071_s24 + $0x10] sm:$0xff] }
  0x7a   : > { %5178 = vmatprep.subr.bf16.mxu0 %v5746_v63  ;;  %5171 = vmatpush3.bf16.msra.mxu1 %v5745_v0  ;;  %v1164_v63 = vrot.slane %v621_v61, %v6114_v43  ;;  %v1157_v0 = vcombine.high %v621_v61, %v621_v61  ;;  %v5851_v61 = vld [vmem:[%s6076_s28 + $0x610] sm:$0xff]  }
  0x7b   : > { %5200 = vmatprep.subr.bf16.mxu1 %v5748_v2  ;;  %v5805_v2 = vld [vmem:[%s6076_s28 + $0x4f0] sm:$0xff]  }
  0x7c   : > { %2745 = vmatmul.mubr.bf16.vlgmr.msra.gmra.mrb[8].mxu0 %v1131_v62  ;;  %v5803_v62 = vld [vmem:[%s6076_s28 + $0x470] sm:$0xff]  }
  0x7d   : > { %5179 = vmatpush3.bf16.msra.mxu0 %v5747_v3  ;;  %2824 = vmatprep.mubr.bf16.mxu0 %v1152_v1  ;;  %v5802_v1 = vld [vmem:[%s6076_s28 + $0x4a8] sm:$0xff]   ;;  %v1172_v3 = vcombine.high %v1164_v63, %v1164_v63 }
  0x7e   : > { %2785 = vmatmul.mubr.bf16.vlgmr.msra.gmra.mrb[8].mxu1 %v1153_v4  ;;  %5180 = vmatprep.subr.bf16.mxu0 %v5750_v5  ;;  %v6262_v4 = vrot.slane %v1157_v0, %v6114_v43  ;;  %v5804_v5 = vld [vmem:[%s6076_s28 + $0x430] sm:$0xff]   ;;  %v5854_v0 = vld [vmem:[%s6076_s28 + $0x618] sm:$0xff]  }
  0x7f   : > { %5201 = vmatpush3.bf16.msra.mxu1 %v5749_v6  ;;  %2864 = vmatprep.mubr.bf16.mxu1 %v1156_v7  ;;  %v5807_v6 = vld [vmem:[%s6076_s28 + $0x478] sm:$0xff]   ;;  %v1194_v7 = vrot.slane %v1172_v3, %v6114_v43 }
  0x80   : > { %5202 = vmatprep.subr.bf16.mxu1 %v5752_v8  ;;  %v5806_v8 = vld [vmem:[%s6076_s28 + $0x4b0] sm:$0xff]   ;;  %v5855_v3 = vld [vmem:[%s6076_s28 + $0x698] sm:$0xff]  }
  0x81   : > { %5181 = vmatpush3.bf16.msra.mxu0 %v5751_v9  ;;  %v1173_v9 = vcombine.high %v6262_v4, %v6262_v4 }
  0x82   : > { %5182 = vmatprep.subr.bf16.mxu0 %v5754_v10  ;;  %v5809_v10 = vld [vmem:[%s6076_s28 + $0x4f8] sm:$0xff]  }
  0x83   : > { %5203 = vmatpush3.bf16.msra.mxu1 %v5753_v11  ;;  %v1204_v11 = vcombine.high %v1194_v7, %v1194_v7 }
  0x84   : > { %5204 = vmatprep.subr.bf16.mxu1 %v5756_v12  ;;  %v5808_v12 = vld [vmem:[%s6076_s28 + $0x438] sm:$0xff]  }
  0x85   : > { %5183 = vmatpush3.bf16.msra.mxu0 %v5755_v13  ;;  %v1180_v13 = vrot.slane %v1164_v63, %v6114_v43  ;;  %v5852_v63 = vld [vmem:[%s6076_s28 + $0x690] sm:$0xff]  }
  0x86   : > { %5184 = vmatprep.subr.bf16.mxu0 %v5758_v14  ;;  %v5811_v14 = vld [vmem:[%s6076_s28 + $0x540] sm:$0xff]  }
  0x87   : > { %5205 = vmatpush3.bf16.msra.mxu1 %v5757_v15  ;;  %v5810_v15 = vld [vmem:[%s6076_s28 + $0x4b8] sm:$0xff]  }
  0x88   : > { %5206 = vmatprep.subr.bf16.mxu1 %v5760_v16  ;;  %v1201_v16 = vrot.slane %v1173_v9, %v6114_v43  ;;  %v5860_v9 = vld [vmem:[%s6076_s28 + $0x628] sm:$0xff]  }
  0x89   : > { %5185 = vmatpush3.bf16.msra.mxu0 %v5759_v17  ;;  %v5813_v17 = vld [vmem:[%s6076_s28 + $0x5c0] sm:$0xff]  }
  0x8a   : > { %5186 = vmatprep.subr.bf16.mxu0 %v5762_v18  ;;  %v5812_v18 = vld [vmem:[%s6076_s28 + $0x500] sm:$0xff]  }
  0x8b   : > { %5207 = vmatpush3.bf16.msra.mxu1 %v5761_v19  ;;  %v1202_v19 = vcombine.high %v1180_v13, %v1180_v13 }
  0x8c   : > { %5208 = vmatprep.subr.bf16.mxu1 %v5764_v20  ;;  %v5815_v20 = vld [vmem:[%s6076_s28 + $0x548] sm:$0xff]  }
  0x8d   : > { %5187 = vmatpush3.bf16.msra.mxu0 %v5763_v21  ;;  %v5814_v21 = vld [vmem:[%s6076_s28 + $0x580] sm:$0xff]  }
  0x8e   : > { %5188 = vmatprep.subr.bf16.mxu0 %v5766_v22  ;;  %v1205_v22 = vcombine.high %v1201_v16, %v1201_v16 }
  0x8f   : > { %5209 = vmatpush3.bf16.msra.mxu1 %v5765_v23  ;;  %v5817_v23 = vld [vmem:[%s6076_s28 + $0x5c8] sm:$0xff]  }
  0x90   : > { %5210 = vmatprep.subr.bf16.mxu1 %v5768_v24  ;;  %v5816_v24 = vld [vmem:[%s6076_s28 + $0x508] sm:$0xff]  }
  0x91   : > { %5189 = vmatpush3.bf16.msra.mxu0 %v5767_v25  ;;  %v5819_v25 = vld [vmem:[%s6076_s28 + $0x550] sm:$0xff]  }
  0x92   : > { %5190 = vmatprep.subr.bf16.mxu0 %v5770_v26  ;;  %v5818_v26 = vld [vmem:[%s6076_s28 + $0x588] sm:$0xff]  }
  0x93   : > { %5211 = vmatpush3.bf16.msra.mxu1 %v5769_v27  ;;  %v5821_v27 = vld [vmem:[%s6076_s28 + $0x5d0] sm:$0xff]  }
  0x94   : > { %5212 = vmatprep.subr.bf16.mxu1 %v5772_v28  ;;  %v5820_v28 = vld [vmem:[%s6076_s28 + $0x510] sm:$0xff]  }
  0x95   : > { %5191 = vmatpush3.bf16.msra.mxu0 %v5771_v29  ;;  %v5823_v29 = vld [vmem:[%s6076_s28 + $0x558] sm:$0xff]  }
  0x96   : > { %5192 = vmatprep.subr.bf16.mxu0 %v5774_v30  ;;  %v5822_v30 = vld [vmem:[%s6076_s28 + $0x590] sm:$0xff]  }
  0x97   : > { %5213 = vmatpush3.bf16.msra.mxu1 %v5773_v31  ;;  %v5825_v31 = vld [vmem:[%s6076_s28 + $0x5d8] sm:$0xff]  }
  0x98   : > { %5214 = vmatprep.subr.bf16.mxu1 %v5776_v32  ;;  %v5824_v32 = vld [vmem:[%s6076_s28 + $0x518] sm:$0xff]  }
  0x99   : > { %5193 = vmatpush3.bf16.msra.mxu0 %v5775_v33  ;;  %v5827_v33 = vld [vmem:[%s6076_s28 + $0x560] sm:$0xff]  }
  0x9a   : > { %5222 = vmatprep.subr.bf16.mxu0 %v5779_v35  ;;  %v5829_v35 = vld [vmem:[%s6076_s28 + $0x5e0] sm:$0xff]  }
  0x9b   : > { %5215 = vmatpush3.bf16.msra.mxu1 %v5778_v36  ;;  %v5828_v36 = vld [vmem:[%s6076_s28 + $0x520] sm:$0xff]  }
  0x9c   : > { %2825 = vmatmul.mubr.bf16.vlgmr.msra.gmra.mrb[12].mxu0 %v1138_v34  ;;  %5244 = vmatprep.subr.bf16.mxu1 %v5781_v37  ;;  %v5826_v34 = vld [vmem:[%s6076_s28 + $0x598] sm:$0xff]   ;;  %v5831_v37 = vld [vmem:[%s6076_s28 + $0x568] sm:$0xff]  }
  0x9d   : > { %5223 = vmatpush3.bf16.msra.mxu0 %v5780_v38  ;;  %2904 = vmatprep.mubr.bf16.mxu0 %v1194_v7  ;;  %v5830_v38 = vld [vmem:[%s6076_s28 + $0x5a0] sm:$0xff]   ;;  %v5859_v7 = vld [vmem:[%s6076_s28 + $0x668] sm:$0xff]  }
  0x9e   : > { %2865 = vmatmul.mubr.bf16.vlgmr.msra.gmra.mrb[12].mxu1 %v1154_v39  ;;  %5224 = vmatprep.subr.bf16.mxu0 %v5783_v40  ;;  %v5833_v39 = vld [vmem:[%s6076_s28 + $0x5e8] sm:$0xff]  }
  0x9f   : > { %5245 = vmatpush3.bf16.msra.mxu1 %v5782_v41  ;;  %2944 = vmatprep.mubr.bf16.mxu1 %v1204_v11  ;;  %v5832_v40 = vld [vmem:[%s6076_s28 + $0x528] sm:$0xff]   ;;  %v5835_v41 = vld [vmem:[%s6076_s28 + $0x570] sm:$0xff]  }
  0xa0   : > { %5246 = vmatprep.subr.bf16.mxu1 %v5785_v42  ;;  %v5834_v42 = vld [vmem:[%s6076_s28 + $0x5a8] sm:$0xff]  }
  0xa1   : > { %5225 = vmatpush3.bf16.msra.mxu0 %v5784_v44  ;;  %v5837_v44 = vld [vmem:[%s6076_s28 + $0x5f0] sm:$0xff]   ;;  %v5861_v11 = vld [vmem:[%s6076_s28 + $0x6a8] sm:$0xff]  }
  0xa2   : > { %5226 = vmatprep.subr.bf16.mxu0 %v5787_v45  ;;  %v5836_v45 = vld [vmem:[%s6076_s28 + $0x530] sm:$0xff]  }
  0xa3   : > { %5247 = vmatpush3.bf16.msra.mxu1 %v5786_v46  ;;  %v5839_v46 = vld [vmem:[%s6076_s28 + $0x578] sm:$0xff]  }
  0xa4   : > { %5248 = vmatprep.subr.bf16.mxu1 %v5789_v47  ;;  %v5838_v47 = vld [vmem:[%s6076_s28 + $0x5b0] sm:$0xff]  }
  0xa5   : > { %5227 = vmatpush3.bf16.msra.mxu0 %v5788_v48  ;;  %v5841_v48 = vld [vmem:[%s6076_s28 + $0x5f8] sm:$0xff]  }
  0xa6   : > { %5228 = vmatprep.subr.bf16.mxu0 %v5791_v49  ;;  %v5840_v49 = vld [vmem:[%s6076_s28 + $0x538] sm:$0xff]  }
  0xa7   : > { %5249 = vmatpush3.bf16.msra.mxu1 %v5790_v50  ;;  %v1187_v50 = vrot.slane %v6262_v4, %v6114_v43 }
  0xa8   : > { %5250 = vmatprep.subr.bf16.mxu1 %v5793_v51  ;;  %v5844_v51 = vld [vmem:[%s6076_s28 + $0x640] sm:$0xff]  }
  0xa9   : > { %5229 = vmatpush3.bf16.msra.mxu0 %v5792_v52  ;;  %v5843_v52 = vld [vmem:[%s6076_s28 + $0x5b8] sm:$0xff]  }
  0xaa   : > { %5230 = vmatprep.subr.bf16.mxu0 %v5795_v53  ;;  %v5845_v53 = vld [vmem:[%s6076_s28 + $0x600] sm:$0xff]  }
  0xab   : > { %5251 = vmatpush3.bf16.msra.mxu1 %v5794_v54  ;;  %v1203_v54 = vcombine.high %v1187_v50, %v1187_v50 }
  0xac   : > { %5252 = vmatprep.subr.bf16.mxu1 %v5797_v55  ;;  %v5847_v55 = vld [vmem:[%s6076_s28 + $0x648] sm:$0xff]  }
  0xad   : > { %5231 = vmatpush3.bf16.msra.mxu0 %v5796_v56  ;;  %v5846_v56 = vld [vmem:[%s6076_s28 + $0x680] sm:$0xff]  }
  0xae   : > { %5232 = vmatprep.subr.bf16.mxu0 %v5799_v57  ;;  %v5945_v57 = vmov 0.0  }
  0xaf   : > { %5253 = vmatpush3.bf16.msra.mxu1 %v5798_v58  ;;  %v5848_v58 = vld [vmem:[%s6076_s28 + $0x608] sm:$0xff]  }
  0xb0   : > { %5254 = vmatprep.subr.bf16.mxu1 %v5801_v59  ;;  %v5850_v59 = vld [vmem:[%s6076_s28 + $0x650] sm:$0xff]  }
  0xb1   : > { %5233 = vmatpush3.bf16.msra.mxu0 %v5800_v60  ;;  %v5849_v60 = vld [vmem:[%s6076_s28 + $0x688] sm:$0xff]  }
  0xb2   : > { %5234 = vmatprep.subr.bf16.mxu0 %v5803_v62  ;;  %v5853_v62 = vld [vmem:[%s6076_s28 + $0x658] sm:$0xff]  }
  0xb3   : > { %5255 = vmatpush3.bf16.msra.mxu1 %v5802_v1  ;;  %v5856_v1 = vld [vmem:[%s6076_s28 + $0x660] sm:$0xff]  }
  0xb4   : > { %5256 = vmatprep.subr.bf16.mxu1 %v5805_v2  ;;  %v4746_v2 = vld.sshfl [vmem:[%s6071_s24 + $0x18] sm:$0x13 pattern:$0x75316420] }
  0xb5   : > { %5235 = vmatpush3.bf16.msra.mxu0 %v5804_v5  ;;  %v1213_v4 = vcombine.high %v4746_v2, %v4746_v2  ;;  %v5857_v5 = vld [vmem:[%s6076_s28 + $0x620] sm:$0xff]  }
  0xb6   : > { %5236 = vmatprep.subr.bf16.mxu0 %v5807_v6 }
  0xb7   : > { %5257 = vmatpush3.bf16.msra.mxu1 %v5806_v8  ;;  %v1227_v6 = vrot.slane %v1213_v4, %v6114_v43  ;;  %v5858_v8 = vld [vmem:[%s6076_s28 + $0x6a0] sm:$0xff]  }
  0xb8   : > { %5258 = vmatprep.subr.bf16.mxu1 %v5809_v10  ;;  %v5862_v10 = vld [vmem:[%s6076_s28 + $0x670] sm:$0xff]  }
  0xb9   : > { %5237 = vmatpush3.bf16.msra.mxu0 %v5808_v12  ;;  %v5863_v12 = vld [vmem:[%s6076_s28 + $0x630] sm:$0xff]  }
  0xba   : > { %5266 = vmatprep.subr.bf16.mxu0 %v5811_v14  ;;  %v5864_v14 = vld [vmem:[%s6076_s28 + $0x6b0] sm:$0xff]  }
  0xbb   : > { %5259 = vmatpush3.bf16.msra.mxu1 %v5810_v15  ;;  %v5866_v15 = vld [vmem:[%s6076_s28 + $0x638] sm:$0xff]  }
  0xbc   : > { %2905 = vmatmul.mubr.bf16.vlgmr.msra.gmra.mrb[16].mxu0 %v1180_v13  ;;  %5288 = vmatprep.subr.bf16.mxu1 %v5813_v17  ;;  %v5865_v13 = vld [vmem:[%s6076_s28 + $0x678] sm:$0xff]  }
  0xbd   : > { %5267 = vmatpush3.bf16.msra.mxu0 %v5812_v18  ;;  %2984 = vmatprep.mubr.bf16.mxu0 %v1201_v16  ;;  %v1220_v16 = vrot.slane %v4746_v2, %v6114_v43  ;;  %v5867_v17 = vld [vmem:[%s6076_s28 + $0x6b8] sm:$0xff]  }
  0xbe   : > { %2945 = vmatmul.mubr.bf16.vlgmr.msra.gmra.mrb[16].mxu1 %v1202_v19  ;;  %5268 = vmatprep.subr.bf16.mxu0 %v5815_v20 }
  0xbf   : > { %5289 = vmatpush3.bf16.msra.mxu1 %v5814_v21  ;;  %3024 = vmatprep.mubr.bf16.mxu1 %v1205_v22  ;;  %v1228_v18 = vcombine.high %v1220_v16, %v1220_v16 }
  0xc0   : > { %5290 = vmatprep.subr.bf16.mxu1 %v5817_v23 }
  0xc1   : > { %5269 = vmatpush3.bf16.msra.mxu0 %v5816_v24 }
  0xc2   : > { %5270 = vmatprep.subr.bf16.mxu0 %v5819_v25 }
  0xc3   : > { %5291 = vmatpush3.bf16.msra.mxu1 %v5818_v26 }
  0xc4   : > { %5292 = vmatprep.subr.bf16.mxu1 %v5821_v27 }
  0xc5   : > { %5271 = vmatpush3.bf16.msra.mxu0 %v5820_v28 }
  0xc6   : > { %5272 = vmatprep.subr.bf16.mxu0 %v5823_v29 }
  0xc7   : > { %5293 = vmatpush3.bf16.msra.mxu1 %v5822_v30 }
  0xc8   : > { %5294 = vmatprep.subr.bf16.mxu1 %v5825_v31 }
  0xc9   : > { %5273 = vmatpush3.bf16.msra.mxu0 %v5824_v32 }
  0xca   : > { %5274 = vmatprep.subr.bf16.mxu0 %v5827_v33 }
  0xcb   : > { %5295 = vmatpush3.bf16.msra.mxu1 %v5826_v34 }
  0xcc   : > { %5296 = vmatprep.subr.bf16.mxu1 %v5829_v35 }
  0xcd   : > { %5275 = vmatpush3.bf16.msra.mxu0 %v5828_v36 }
  0xce   : > { %5276 = vmatprep.subr.bf16.mxu0 %v5831_v37 }
  0xcf   : > { %5297 = vmatpush3.bf16.msra.mxu1 %v5830_v38 }
  0xd0   : > { %5298 = vmatprep.subr.bf16.mxu1 %v5833_v39 }
  0xd1   : > { %5277 = vmatpush3.bf16.msra.mxu0 %v5832_v40 }
  0xd2   : > { %5278 = vmatprep.subr.bf16.mxu0 %v5835_v41 }
  0xd3   : > { %5299 = vmatpush3.bf16.msra.mxu1 %v5834_v42 }
  0xd4   : > { %5300 = vmatprep.subr.bf16.mxu1 %v5837_v44 }
  0xd5   : > { %5279 = vmatpush3.bf16.msra.mxu0 %v5836_v45 }
  0xd6   : > { %5280 = vmatprep.subr.bf16.mxu0 %v5839_v46 }
  0xd7   : > { %5301 = vmatpush3.bf16.msra.mxu1 %v5838_v47 }
  0xd8   : > { %5302 = vmatprep.subr.bf16.mxu1 %v5841_v48 }
  0xd9   : > { %5281 = vmatpush3.bf16.msra.mxu0 %v5840_v49 }
  0xda   : > { %5310 = vmatprep.subr.bf16.mxu0 %v5844_v51 }
  0xdb   : > { %5303 = vmatpush3.bf16.msra.mxu1 %v5843_v52 }
  0xdc   : > { %2985 = vmatmul.mubr.bf16.vlgmr.msra.gmra.mrb[20].mxu0 %v1187_v50  ;;  %5540 = vmatprep.subr.bf16.mxu1 %v5945_v57 }
  0xdd   : > { %5311 = vmatpush3.bf16.msra.mxu0 %v5845_v53  ;;  %3064 = vmatprep.mubr.bf16.mxu0 %v1227_v6 }
  0xde   : > { %3025 = vmatmul.mubr.bf16.vlgmr.msra.gmra.mrb[20].mxu1 %v1203_v54  ;;  %5312 = vmatprep.subr.bf16.mxu0 %v5847_v55 }
  0xdf   : > { %5541 = vmatpush3.bf16.msra.mxu1 %v5846_v56  ;;  %5556 = vmatprep.mubr.msk.bf16.mxu1 %vm5946_vm1, %v5945_v57 }
  0xe0   : > { %5542 = vmatprep.subr.bf16.mxu1 %v5945_v57 }
  0xe1   : > { %5313 = vmatpush3.bf16.msra.mxu0 %v5848_v58 }
  0xe2   : > { %5314 = vmatprep.subr.bf16.mxu0 %v5850_v59 }
  0xe3   : > { %5543 = vmatpush3.bf16.msra.mxu1 %v5849_v60 }
  0xe4   : > { %5544 = vmatprep.subr.bf16.mxu1 %v5945_v57 }
  0xe5   : > { %5315 = vmatpush3.bf16.msra.mxu0 %v5851_v61 }
  0xe6   : > { %5316 = vmatprep.subr.bf16.mxu0 %v5853_v62 }
  0xe7   : > { %5545 = vmatpush3.bf16.msra.mxu1 %v5852_v63 }
  0xe8   : > { %5546 = vmatprep.subr.bf16.mxu1 %v5945_v57 }
  0xe9   : > { %5317 = vmatpush3.bf16.msra.mxu0 %v5854_v0 }
  0xea   : > { %5318 = vmatprep.subr.bf16.mxu0 %v5856_v1 }
  0xeb   : > { %5547 = vmatpush3.bf16.msra.mxu1 %v5855_v3 }
  0xec   : > { %5548 = vmatprep.subr.bf16.mxu1 %v5945_v57 }
  0xed   : > { %5319 = vmatpush3.bf16.msra.mxu0 %v5857_v5 }
  0xee   : > { %5320 = vmatprep.subr.bf16.mxu0 %v5859_v7 }
  0xef   : > { %5549 = vmatpush3.bf16.msra.mxu1 %v5858_v8 }
  0xf0   : > { %5550 = vmatprep.subr.bf16.mxu1 %v5945_v57 }
  0xf1   : > { %5321 = vmatpush3.bf16.msra.mxu0 %v5860_v9 }
  0xf2   : > { %5322 = vmatprep.subr.bf16.mxu0 %v5862_v10 }
  0xf3   : > { %5551 = vmatpush3.bf16.msra.mxu1 %v5861_v11 }
  0xf4   : > { %5552 = vmatprep.subr.bf16.mxu1 %v5945_v57 }
  0xf5   : > { %5323 = vmatpush3.bf16.msra.mxu0 %v5863_v12 }
  0xf6   : > { %5324 = vmatprep.subr.bf16.mxu0 %v5865_v13 }
  0xf7   : > { %5553 = vmatpush3.bf16.msra.mxu1 %v5864_v14 }
  0xf8   : > { %5554 = vmatprep.subr.bf16.mxu1 %v5945_v57 }
  0xf9   : > { %5325 = vmatpush3.bf16.msra.mxu0 %v5866_v15 }
  0xfb   : > { %5555 = vmatpush3.bf16.msra.mxu1 %v5867_v17 }
  0xfc   : > { %3065 = vmatmul.mubr.bf16.vlgmr.msra.gmra.mrb[24].mxu0 %v1220_v16 }
  0xfe   : > { %5557 = vmatmul.mubr.bf16.vlgmr.msra.gmra.mrb[24].mxu1 %v1228_v18 }
 0x10f   : > { %v5062_v19 = vpop.f32.mrb[0].mxu0 }
 0x110   : > { %v5063_v20 = vpop.f32.mrb[1].mxu0  ;;  %v5084_v21 = vpop.f32.mrb[0].mxu1 }
 0x111   : > { %v5064_v22 = vadd.f32 %v5063_v20, %v5062_v19  ;;  %v5065_v23 = vpop.f32.mrb[2].mxu0  ;;  %v5085_v24 = vpop.f32.mrb[1].mxu1 }
 0x112   : > { %v5066_v25 = vpop.f32.mrb[3].mxu0  ;;  %v5086_v26 = vadd.f32 %v5085_v24, %v5084_v21  ;;  %v5087_v27 = vpop.f32.mrb[2].mxu1 }
 0x113   : > { %v5088_v28 = vpop.f32.mrb[3].mxu1 }
 0x114   : > { %v2627_v29 = vadd.f32 %v5086_v26, %v5064_v22 }
 0x12f   : > { %v5106_v30 = vpop.f32.mrb[4].mxu0 }
 0x130   : > { %v5107_v31 = vpop.f32.mrb[5].mxu0  ;;  %v5128_v34 = vpop.f32.mrb[4].mxu1 }
 0x131   : > { %v5108_v32 = vadd.f32 %v5107_v31, %v5106_v30  ;;  %v5109_v33 = vpop.f32.mrb[6].mxu0  ;;  %v5129_v36 = vpop.f32.mrb[5].mxu1 }
 0x132   : > { %v5110_v35 = vpop.f32.mrb[7].mxu0  ;;  %v5130_v38 = vadd.f32 %v5129_v36, %v5128_v34  ;;  %v5131_v39 = vpop.f32.mrb[6].mxu1  ;;  %v618_v36 = vld [vmem:[#allocation2] sm:$0x3] }
 0x133   : > { %v2667_v37 = vadd.f32 %v5108_v32, %v2627_v29  ;;  %v5132_v40 = vpop.f32.mrb[7].mxu1 }
 0x135   : > { %v2707_v41 = vadd.f32 %v5130_v38, %v2667_v37 }
 0x14f   : > { %v5150_v42 = vpop.f32.mrb[8].mxu0 }
 0x150   : > { %v5151_v44 = vpop.f32.mrb[9].mxu0 }
 0x151   : > { %v5152_v45 = vadd.f32 %v5151_v44, %v5150_v42  ;;  %v5153_v46 = vpop.f32.mrb[10].mxu0  ;;  %v5172_v47 = vpop.f32.mrb[8].mxu1 }
 0x152   : > { %v5154_v48 = vpop.f32.mrb[11].mxu0  ;;  %v5173_v49 = vpop.f32.mrb[9].mxu1 }
 0x153   : > { %v2747_v50 = vadd.f32 %v5152_v45, %v2707_v41  ;;  %v5174_v51 = vadd.f32 %v5173_v49, %v5172_v47  ;;  %v5175_v52 = vpop.f32.mrb[10].mxu1 }
 0x154   : > { %v5176_v53 = vpop.f32.mrb[11].mxu1 }
 0x155   : > { %v2787_v54 = vadd.f32 %v5174_v51, %v2747_v50 }
 0x16f   : > { %v5194_v55 = vpop.f32.mrb[12].mxu0 }
 0x170   : > { %v5195_v56 = vpop.f32.mrb[13].mxu0 }
 0x171   : > { %v5196_v57 = vadd.f32 %v5195_v56, %v5194_v55  ;;  %v5197_v58 = vpop.f32.mrb[14].mxu0  ;;  %v5216_v59 = vpop.f32.mrb[12].mxu1 }
 0x172   : > { %v5198_v60 = vpop.f32.mrb[15].mxu0  ;;  %v5217_v61 = vpop.f32.mrb[13].mxu1 }
 0x173   : > { %v2827_v62 = vadd.f32 %v5196_v57, %v2787_v54  ;;  %v5218_v63 = vadd.f32 %v5217_v61, %v5216_v59  ;;  %v5219_v0 = vpop.f32.mrb[14].mxu1 }
 0x174   : > { %v5220_v1 = vpop.f32.mrb[15].mxu1 }
 0x175   : > { %v2867_v2 = vadd.f32 %v5218_v63, %v2827_v62 }
 0x18f   : > { %v5238_v3 = vpop.f32.mrb[16].mxu0 }
 0x190   : > { %v5239_v4 = vpop.f32.mrb[17].mxu0 }
 0x191   : > { %v5240_v5 = vadd.f32 %v5239_v4, %v5238_v3  ;;  %v5241_v6 = vpop.f32.mrb[18].mxu0  ;;  %v5260_v7 = vpop.f32.mrb[16].mxu1 }
 0x192   : > { %v5242_v8 = vpop.f32.mrb[19].mxu0  ;;  %v5261_v9 = vpop.f32.mrb[17].mxu1 }
 0x193   : > { %v2907_v10 = vadd.f32 %v5240_v5, %v2867_v2  ;;  %v5262_v11 = vadd.f32 %v5261_v9, %v5260_v7  ;;  %v5263_v12 = vpop.f32.mrb[18].mxu1 }
 0x194   : > { %v5264_v13 = vpop.f32.mrb[19].mxu1 }
 0x195   : > { %v2947_v14 = vadd.f32 %v5262_v11, %v2907_v10 }
 0x1af   : > { %v5282_v15 = vpop.f32.mrb[20].mxu0 }
 0x1b0   : > { %v5283_v16 = vpop.f32.mrb[21].mxu0 }
 0x1b1   : > { %v5284_v17 = vadd.f32 %v5283_v16, %v5282_v15  ;;  %v5285_v18 = vpop.f32.mrb[22].mxu0  ;;  %v5304_v19 = vpop.f32.mrb[20].mxu1 }
 0x1b2   : > { %v5286_v20 = vpop.f32.mrb[23].mxu0  ;;  %v5305_v21 = vpop.f32.mrb[21].mxu1 }
 0x1b3   : > { %v2987_v22 = vadd.f32 %v5284_v17, %v2947_v14  ;;  %v5306_v23 = vadd.f32 %v5305_v21, %v5304_v19  ;;  %v5307_v24 = vpop.f32.mrb[22].mxu1 }
 0x1b4   : > { %v5308_v25 = vpop.f32.mrb[23].mxu1 }
 0x1b5   : > { %v3027_v26 = vadd.f32 %v5306_v23, %v2987_v22 }
 0x1cf   : > { %v5326_v27 = vpop.f32.mrb[24].mxu0 }
 0x1d0   : > { %v5327_v28 = vpop.f32.mrb[25].mxu0 }
 0x1d1   : > { %v5328_v29 = vadd.f32 %v5327_v28, %v5326_v27  ;;  %v5329_v30 = vpop.f32.mrb[26].mxu0  ;;  %v3106_v31 = vpop.f32.mrb[24].mxu1 }
 0x1d2   : > { %v5330_v32 = vpop.f32.mrb[27].mxu0  ;;  %v5558_v33 = vpop.f32.mrb[25].mxu1 }
 0x1d3   : > { %v3067_v34 = vadd.f32 %v5328_v29, %v3027_v26  ;;  %v3109_v35 = vpop.f32.mrb[26].mxu1  ;;  %3118 = sbr.rel (%p4963_p6) target bundleno = 1819 (0x71b), region = 104 }
 0x1d4   : > { %v5559_v37 = vpop.f32.mrb[27].mxu1 }
 0x1d5   : > { %v3107_v38 = vadd.f32 %v3106_v31, %v3067_v34 }
 0x1d7   : > { %v3112_v39 = vadd.f32 %v3107_v38, %v618_v36 }
 0x1d9   : > { %3114 = vst.msk [vmem:[#allocation2] sm:$0x3] %vm3113_vm2, %v3112_v39 }
 0x1da   : > { %v6340_v40 = vld [vmem:[%s6919_s5 + $0x40] sm:$0xff]   ;;  %v6363_v45 = vld [vmem:[%s6919_s5 + $0x48] sm:$0xff]   ;;  %v6387_v49 = vld [vmem:[%s6919_s5 + $0x50] sm:$0xff]   ;;  %s6948_s21 = sld [smem:[#allocation12_spill]]  ;;  %s6957_s24 = sld [smem:[#allocation13_spill]]  ;;  %vm5950_vm3 = vmmov 0  }
 0x1db   : > { %v6345_v41 = vld [vmem:[%s6919_s5 + $0xc0] sm:$0xff]   ;;  %5341 = vmatprep.subr.bf16.mxu0 %v6340_v40  ;;  %v6369_v46 = vld [vmem:[%s6919_s5 + $0xc8] sm:$0xff]   ;;  %v6393_v50 = vld [vmem:[%s6919_s5 + $0xd0] sm:$0xff]   ;;  %s5947_s28 = smov 8   ;;  %vm4137_vm5 = vcmask 64512   ;;  %s5951_s25 = smov 120  }
 0x1dc   : > { %v6351_v42 = vld [vmem:[%s6919_s5] sm:$0xff]   ;;  %5363 = vmatprep.subr.bf16.mxu1 %v6345_v41  ;;  %v6375_v47 = vld [vmem:[%s6919_s5 + $0x8] sm:$0xff]   ;;  %v6399_v51 = vld [vmem:[%s6919_s5 + $0x10] sm:$0xff]   ;;  %vm4453_vm10 = vcmask 261120   ;;  %vm4701_vm13 = vcmask 1024  }
 0x1dd   : > { %v6357_v44 = vld [vmem:[%s6919_s5 + $0x80] sm:$0xff]   ;;  %5342 = vmatpush3.bf16.msra.mxu0 %v6351_v42  ;;  %v6381_v48 = vld [vmem:[%s6919_s5 + $0x88] sm:$0xff]   ;;  %v6405_v52 = vld [vmem:[%s6919_s5 + $0x90] sm:$0xff]  }
 0x1de   : > { %5364 = vmatpush3.bf16.msra.mxu1 %v6357_v44  ;;  %5343 = vmatprep.subr.bf16.mxu0 %v6363_v45  ;;  %v6411_v53 = vld [vmem:[%s6919_s5 + $0x58] sm:$0xff]   ;;  %v6435_v57 = vld [vmem:[%s6919_s5 + $0x60] sm:$0xff]   ;;  %v6459_v61 = vld [vmem:[%s6919_s5 + $0x68] sm:$0xff]  }
 0x1df   : > { %5365 = vmatprep.subr.bf16.mxu1 %v6369_v46  ;;  %v6417_v54 = vld [vmem:[%s6919_s5 + $0xd8] sm:$0xff]   ;;  %v6441_v58 = vld [vmem:[%s6919_s5 + $0xe0] sm:$0xff]   ;;  %v6465_v62 = vld [vmem:[%s6919_s5 + $0xe8] sm:$0xff]  }
 0x1e0   : > { %v6423_v55 = vld [vmem:[%s6919_s5 + $0x18] sm:$0xff]   ;;  %v6447_v59 = vld [vmem:[%s6919_s5 + $0x20] sm:$0xff]   ;;  %v6471_v63 = vld [vmem:[%s6919_s5 + $0x28] sm:$0xff]  }
 0x1e1   : > { %5344 = vmatpush3.bf16.msra.mxu0 %v6375_v47  ;;  %v6429_v56 = vld [vmem:[%s6919_s5 + $0x98] sm:$0xff]   ;;  %v6453_v60 = vld [vmem:[%s6919_s5 + $0xa0] sm:$0xff]   ;;  %v6477_v0 = vld [vmem:[%s6919_s5 + $0xa8] sm:$0xff]  }
 0x1e2   : > { %5366 = vmatpush3.bf16.msra.mxu1 %v6381_v48  ;;  %5345 = vmatprep.subr.bf16.mxu0 %v6387_v49  ;;  %v6483_v1 = vld [vmem:[%s6919_s5 + $0x70] sm:$0xff]   ;;  %v6507_v5 = vld [vmem:[%s6919_s5 + $0x78] sm:$0xff]   ;;  %v3119_v9 = vld [vmem:[%s6948_s21] sm:$0xff] }
 0x1e3   : > { %5367 = vmatprep.subr.bf16.mxu1 %v6393_v50  ;;  %v6489_v2 = vld [vmem:[%s6919_s5 + $0xf0] sm:$0xff]   ;;  %v6513_v6 = vld [vmem:[%s6919_s5 + $0xf8] sm:$0xff]   ;;  %v3249_v10 = vcombine.high %v3119_v9, %v3119_v9  ;;  %v3256_v11 = vrot.slane %v3119_v9, %v6114_v43  ;;  %v6536_v12 = vld [vmem:[%s6919_s5 + $0x140] sm:$0xff]  }
 0x1e4   : > { %v6495_v3 = vld [vmem:[%s6919_s5 + $0x30] sm:$0xff]   ;;  %v6519_v7 = vld [vmem:[%s6919_s5 + $0x38] sm:$0xff]   ;;  %v6541_v13 = vld [vmem:[%s6919_s5 + $0x1c0] sm:$0xff]  }
 0x1e5   : > { %5346 = vmatpush3.bf16.msra.mxu0 %v6399_v51  ;;  %v6501_v4 = vld [vmem:[%s6919_s5 + $0xb0] sm:$0xff]   ;;  %v6525_v8 = vld [vmem:[%s6919_s5 + $0xb8] sm:$0xff]   ;;  %v3264_v14 = vcombine.high %v3256_v11, %v3256_v11  ;;  %v3272_v15 = vrot.slane %v3256_v11, %v6114_v43  ;;  %v6546_v16 = vrot.slane %v3249_v10, %v6114_v43  ;;  %v6553_v18 = vld [vmem:[%s6919_s5 + $0x100] sm:$0xff]  }
 0x1e6   : > { %5368 = vmatpush3.bf16.msra.mxu1 %v6405_v52  ;;  %5347 = vmatprep.subr.bf16.mxu0 %v6411_v53  ;;  %v6560_v21 = vld [vmem:[%s6919_s5 + $0x148] sm:$0xff]   ;;  %v6565_v23 = vld [vmem:[%s6919_s5 + $0x180] sm:$0xff]   ;;  %v6583_v28 = vld [vmem:[%s6919_s5 + $0x150] sm:$0xff]  }
 0x1e7   : > { %5369 = vmatprep.subr.bf16.mxu1 %v6417_v54  ;;  %v3286_v17 = vrot.slane %v3264_v14, %v6114_v43  ;;  %v3265_v19 = vcombine.high %v6546_v16, %v6546_v16  ;;  %v3294_v20 = vcombine.high %v3272_v15, %v3272_v15  ;;  %v6571_v25 = vld [vmem:[%s6919_s5 + $0x1c8] sm:$0xff]   ;;  %v6595_v30 = vld [vmem:[%s6919_s5 + $0x1d0] sm:$0xff]   ;;  %v6607_v32 = vld [vmem:[%s6919_s5 + $0x158] sm:$0xff]  }
 0x1e8   : > { %v6577_v26 = vld [vmem:[%s6919_s5 + $0x108] sm:$0xff]   ;;  %v6601_v31 = vld [vmem:[%s6919_s5 + $0x110] sm:$0xff]   ;;  %v6619_v34 = vld [vmem:[%s6919_s5 + $0x1d8] sm:$0xff]  }
 0x1e9   : > { %5348 = vmatpush3.bf16.msra.mxu0 %v6423_v55  ;;  %3722 = vmatprep.mubr.bf16.mxu0 %v3286_v17  ;;  %v3296_v22 = vcombine.high %v3286_v17, %v3286_v17  ;;  %v3293_v24 = vrot.slane %v3265_v19, %v6114_v43  ;;  %v6589_v29 = vld [vmem:[%s6919_s5 + $0x188] sm:$0xff]   ;;  %v6613_v33 = vld [vmem:[%s6919_s5 + $0x190] sm:$0xff]   ;;  %v6625_v35 = vld [vmem:[%s6919_s5 + $0x118] sm:$0xff]  }
 0x1ea   : > { %5370 = vmatpush3.bf16.msra.mxu1 %v6429_v56  ;;  %5349 = vmatprep.subr.bf16.mxu0 %v6435_v57  ;;  %v6631_v36 = vld [vmem:[%s6919_s5 + $0x160] sm:$0xff]   ;;  %v6637_v37 = vld [vmem:[%s6919_s5 + $0x198] sm:$0xff]   ;;  %v6655_v9 = vld [vmem:[%s6919_s5 + $0x168] sm:$0xff]  }
 0x1eb   : > { %5371 = vmatprep.subr.bf16.mxu1 %v6441_v58  ;;  %3762 = vmatprep.mubr.bf16.mxu1 %v3296_v22  ;;  %v3297_v27 = vcombine.high %v3293_v24, %v3293_v24  ;;  %v6643_v38 = vld [vmem:[%s6919_s5 + $0x1e0] sm:$0xff]   ;;  %6949 = vst [vmem:[#allocation4_spill] sm:$0xff] %v6655_v9  ;;  %v6667_v11 = vld [vmem:[%s6919_s5 + $0x1e8] sm:$0xff]   ;;  %v6691_v19 = vld [vmem:[%s6919_s5 + $0x1f0] sm:$0xff]  }
 0x1ec   : > { %v6649_v39 = vld [vmem:[%s6919_s5 + $0x120] sm:$0xff]   ;;  %6951 = vst [vmem:[#allocation6_spill] sm:$0xff] %v6667_v11  ;;  %v6673_v14 = vld [vmem:[%s6919_s5 + $0x128] sm:$0xff]   ;;  %6955 = vst [vmem:[#allocation10_spill] sm:$0xff] %v6691_v19 }
 0x1ed   : > { %5350 = vmatpush3.bf16.msra.mxu0 %v6447_v59  ;;  %v6661_v10 = vld [vmem:[%s6919_s5 + $0x1a0] sm:$0xff]   ;;  %6952 = vst [vmem:[#allocation7_spill] sm:$0xff] %v6673_v14  ;;  %v6685_v17 = vld [vmem:[%s6919_s5 + $0x1a8] sm:$0xff]   ;;  %v6703_v22 = vld [vmem:[%s6919_s5 + $0x178] sm:$0xff]  }
 0x1ee   : > { %5372 = vmatpush3.bf16.msra.mxu1 %v6453_v60  ;;  %5351 = vmatprep.subr.bf16.mxu0 %v6459_v61  ;;  %6950 = vst [vmem:[#allocation5_spill] sm:$0xff] %v6661_v10  ;;  %6954 = vst [vmem:[#allocation9_spill] sm:$0xff] %v6685_v17 }
 0x1ef   : > { %5373 = vmatprep.subr.bf16.mxu1 %v6465_v62 }
 0x1f1   : > { %5352 = vmatpush3.bf16.msra.mxu0 %v6471_v63 }
 0x1f2   : > { %5374 = vmatpush3.bf16.msra.mxu1 %v6477_v0  ;;  %5353 = vmatprep.subr.bf16.mxu0 %v6483_v1 }
 0x1f3   : > { %5375 = vmatprep.subr.bf16.mxu1 %v6489_v2 }
 0x1f5   : > { %5354 = vmatpush3.bf16.msra.mxu0 %v6495_v3 }
 0x1f6   : > { %5376 = vmatpush3.bf16.msra.mxu1 %v6501_v4  ;;  %5355 = vmatprep.subr.bf16.mxu0 %v6507_v5 }
 0x1f7   : > { %5377 = vmatprep.subr.bf16.mxu1 %v6513_v6 }
 0x1f9   : > { %5356 = vmatpush3.bf16.msra.mxu0 %v6519_v7 }
 0x1fa   : > { %5378 = vmatpush3.bf16.msra.mxu1 %v6525_v8  ;;  %5385 = vmatprep.subr.bf16.mxu0 %v6536_v12 }
 0x1fb   : > { %5407 = vmatprep.subr.bf16.mxu1 %v6541_v13 }
 0x1fc   : > { %3723 = vmatmul.mubr.bf16.vlgmr.msra.gmra.mrb[0].mxu0 %v3272_v15  ;;  %v6679_v15 = vld [vmem:[%s6919_s5 + $0x170] sm:$0xff]  }
 0x1fd   : > { %5386 = vmatpush3.bf16.msra.mxu0 %v6553_v18  ;;  %3763 = vmatmul.mubr.bf16.vlgmr.msra.gmra.mrb[0].mxu1 %v3294_v20  ;;  %6953 = vst [vmem:[#allocation8_spill] sm:$0xff] %v6679_v15  ;;  %v6697_v20 = vld [vmem:[%s6919_s5 + $0x130] sm:$0xff]  }
 0x1fe   : > { %5387 = vmatprep.subr.bf16.mxu0 %v6560_v21  ;;  %5408 = vmatpush3.bf16.msra.mxu1 %v6565_v23  ;;  %6956 = vst [vmem:[#allocation11_spill] sm:$0xff] %v6697_v20 }
 0x1ff   : > { %3802 = vmatprep.mubr.bf16.mxu0 %v3293_v24  ;;  %5409 = vmatprep.subr.bf16.mxu1 %v6571_v25  ;;  %v6709_v24 = vld [vmem:[%s6919_s5 + $0x1b0] sm:$0xff]  }
 0x200   : > { %3842 = vmatprep.mubr.bf16.mxu1 %v3297_v27  ;;  %v6715_v27 = vld [vmem:[%s6919_s5 + $0x1f8] sm:$0xff]  }
 0x201   : > { %5388 = vmatpush3.bf16.msra.mxu0 %v6577_v26 }
 0x202   : > { %5389 = vmatprep.subr.bf16.mxu0 %v6583_v28  ;;  %5410 = vmatpush3.bf16.msra.mxu1 %v6589_v29 }
 0x203   : > { %5411 = vmatprep.subr.bf16.mxu1 %v6595_v30 }
 0x205   : > { %5390 = vmatpush3.bf16.msra.mxu0 %v6601_v31 }
 0x206   : > { %5391 = vmatprep.subr.bf16.mxu0 %v6607_v32  ;;  %5412 = vmatpush3.bf16.msra.mxu1 %v6613_v33 }
 0x207   : > { %5413 = vmatprep.subr.bf16.mxu1 %v6619_v34 }
 0x209   : > { %5392 = vmatpush3.bf16.msra.mxu0 %v6625_v35 }
 0x20a   : > { %5393 = vmatprep.subr.bf16.mxu0 %v6631_v36  ;;  %5414 = vmatpush3.bf16.msra.mxu1 %v6637_v37 }
 0x20b   : > { %5415 = vmatprep.subr.bf16.mxu1 %v6643_v38 }
 0x20d   : > { %5394 = vmatpush3.bf16.msra.mxu0 %v6649_v39 }
 0x20e   : > { %5395 = vmatprep.subr.bf16.mxu0 %v6655_v9  ;;  %5416 = vmatpush3.bf16.msra.mxu1 %v6661_v10 }
 0x20f   : > { %5417 = vmatprep.subr.bf16.mxu1 %v6667_v11  ;;  %v3279_v11 = vrot.slane %v6546_v16, %v6114_v43 }
 0x211   : > { %5396 = vmatpush3.bf16.msra.mxu0 %v6673_v14  ;;  %v6727_v14 = vld [vmem:[%s6919_s5 + $0x138] sm:$0xff]  }
 0x212   : > { %5397 = vmatprep.subr.bf16.mxu0 %v6679_v15  ;;  %5418 = vmatpush3.bf16.msra.mxu1 %v6685_v17  ;;  %v3850_v15 = vld [vmem:[%s6957_s24] sm:$0xff] }
 0x213   : > { %5419 = vmatprep.subr.bf16.mxu1 %v6691_v19  ;;  %v5029_v17 = vld [vmem:[%s6921_s7] ss:$0 sm:$0xff]  ;;  %v3859_v19 = vrot.slane %v3850_v15, %v6114_v43 }
 0x214   : > { %4086 = vrot.lane.b32.xlu0 %v5029_v17, %s5947_s28  ;;  %v3295_v17 = vcombine.high %v3279_v11, %v3279_v11 }
 0x215   : > { %5398 = vmatpush3.bf16.msra.mxu0 %v6697_v20  ;;  %v6737_v20 = vld [vmem:[%s6919_s5 + $0x1b8] sm:$0xff]   ;;  %v3867_v10 = vcombine.high %v3859_v19, %v3859_v19 }
 0x216   : > { %5399 = vmatprep.subr.bf16.mxu0 %v6703_v22  ;;  %5420 = vmatpush3.bf16.msra.mxu1 %v6709_v24 }
 0x217   : > { %5421 = vmatprep.subr.bf16.mxu1 %v6715_v27  ;;  %v3889_v9 = vrot.slane %v3867_v10, %v6114_v43 }
 0x219   : > { %5400 = vmatpush3.bf16.msra.mxu0 %v6727_v14  ;;  %v3899_v16 = vcombine.high %v3889_v9, %v3889_v9 }
 0x21a   : > { %5429 = vmatprep.subr.bf16.mxu0 %v6340_v40  ;;  %5422 = vmatpush3.bf16.msra.mxu1 %v6737_v20  ;;  %v3852_v40 = vcombine.high %v3850_v15, %v3850_v15 }
 0x21b   : > { %5451 = vmatprep.subr.bf16.mxu1 %v6345_v41 }
 0x21c   : > { %3803 = vmatmul.mubr.bf16.vlgmr.msra.gmra.mrb[4].mxu0 %v3279_v11  ;;  %v3866_v41 = vrot.slane %v3852_v40, %v6114_v43 }
 0x21d   : > { %5430 = vmatpush3.bf16.msra.mxu0 %v6351_v42  ;;  %3941 = vmatprep.mubr.bf16.mxu0 %v3889_v9 }
 0x21e   : > { %3843 = vmatmul.mubr.bf16.vlgmr.msra.gmra.mrb[4].mxu1 %v3295_v17  ;;  %5431 = vmatprep.subr.bf16.mxu0 %v6363_v45  ;;  %v3868_v42 = vcombine.high %v3866_v41, %v3866_v41 }
 0x21f   : > { %5452 = vmatpush3.bf16.msra.mxu1 %v6357_v44  ;;  %3981 = vmatprep.mubr.bf16.mxu1 %v3899_v16  ;;  %v3875_v44 = vrot.slane %v3859_v19, %v6114_v43 }
 0x220   : > { %5453 = vmatprep.subr.bf16.mxu1 %v6369_v46  ;;  %v3896_v45 = vrot.slane %v3868_v42, %v6114_v43 }
 0x221   : > { %5432 = vmatpush3.bf16.msra.mxu0 %v6375_v47  ;;  %v3897_v46 = vcombine.high %v3875_v44, %v3875_v44 }
 0x222   : > { %5433 = vmatprep.subr.bf16.mxu0 %v6387_v49  ;;  %v3900_v47 = vcombine.high %v3896_v45, %v3896_v45  ;;  %v6959_v49 = vld [vmem:[#allocation5_spill] sm:$0xff] }
 0x223   : > { %5454 = vmatpush3.bf16.msra.mxu1 %v6381_v48  ;;  %v6958_v48 = vld [vmem:[#allocation4_spill] sm:$0xff] }
 0x224   : > { %5455 = vmatprep.subr.bf16.mxu1 %v6393_v50  ;;  %v6960_v50 = vld [vmem:[#allocation6_spill] sm:$0xff] }
 0x225   : > { %5434 = vmatpush3.bf16.msra.mxu0 %v6399_v51  ;;  %v6961_v51 = vld [vmem:[#allocation7_spill] sm:$0xff] }
 0x226   : > { %5435 = vmatprep.subr.bf16.mxu0 %v6411_v53  ;;  %v6963_v53 = vld [vmem:[#allocation9_spill] sm:$0xff] }
 0x227   : > { %5456 = vmatpush3.bf16.msra.mxu1 %v6405_v52  ;;  %v6962_v52 = vld [vmem:[#allocation8_spill] sm:$0xff] }
 0x228   : > { %5457 = vmatprep.subr.bf16.mxu1 %v6417_v54  ;;  %v6964_v54 = vld [vmem:[#allocation10_spill] sm:$0xff] }
 0x229   : > { %5436 = vmatpush3.bf16.msra.mxu0 %v6423_v55  ;;  %v6965_v55 = vld [vmem:[#allocation11_spill] sm:$0xff] }
 0x22a   : > { %5437 = vmatprep.subr.bf16.mxu0 %v6435_v57 }
 0x22b   : > { %5458 = vmatpush3.bf16.msra.mxu1 %v6429_v56  ;;  %v3882_v56 = vrot.slane %v3866_v41, %v6114_v43  ;;  %v4131_v43 = vld [vmem:[%s6925_s11 + $0x8] sm:$0xff] }
 0x22c   : > { %5459 = vmatprep.subr.bf16.mxu1 %v6441_v58  ;;  %v4105_v58 = vld [vmem:[%s6918_s4] sm:$0x3] }
 0x22d   : > { %5438 = vmatpush3.bf16.msra.mxu0 %v6447_v59  ;;  %v3898_v57 = vcombine.high %v3882_v56, %v3882_v56  ;;  %v5948_v59 = vmov 0  }
 0x22e   : > { %5439 = vmatprep.subr.bf16.mxu0 %v6459_v61  ;;  %5868 = vset.pattern.permute.xlu0 %v5948_v59  ;;  %v4132_v61 = vld [vmem:[%s6925_s11 + $0x10] sm:$0xff]  ;;  %v5032_v59 = vld [vmem:[%s6924_s10] ss:$0 sm:$0xff] }
 0x22f   : > { %5460 = vmatpush3.bf16.msra.mxu1 %v6453_v60  ;;  %4109 = vperm.xlu0 %5868, %v4105_v58   ;;  %v5949_v60 = vmov 0.0  }
 0x230   : > { %5461 = vmatprep.subr.bf16.mxu1 %v6465_v62 }
 0x231   : > { %5440 = vmatpush3.bf16.msra.mxu0 %v6471_v63 }
 0x232   : > { %5441 = vmatprep.subr.bf16.mxu0 %v6483_v1 }
 0x233   : > { %5462 = vmatpush3.bf16.msra.mxu1 %v6477_v0 }
 0x234   : > { %5463 = vmatprep.subr.bf16.mxu1 %v6489_v2 }
 0x235   : > { %5442 = vmatpush3.bf16.msra.mxu0 %v6495_v3 }
 0x236   : > { %5443 = vmatprep.subr.bf16.mxu0 %v6507_v5 }
 0x237   : > { %5464 = vmatpush3.bf16.msra.mxu1 %v6501_v4 }
 0x238   : > { %5465 = vmatprep.subr.bf16.mxu1 %v6513_v6 }
 0x239   : > { %5444 = vmatpush3.bf16.msra.mxu0 %v6519_v7 }
 0x23a   : > { %5473 = vmatprep.subr.bf16.mxu0 %v6536_v12 }
 0x23b   : > { %5466 = vmatpush3.bf16.msra.mxu1 %v6525_v8 }
 0x23c   : > { %3942 = vmatmul.mubr.bf16.vlgmr.msra.gmra.mrb[8].mxu0 %v3875_v44  ;;  %5495 = vmatprep.subr.bf16.mxu1 %v6541_v13 }
 0x23d   : > { %5474 = vmatpush3.bf16.msra.mxu0 %v6553_v18  ;;  %4021 = vmatprep.mubr.bf16.mxu0 %v3896_v45 }
 0x23e   : > { %3982 = vmatmul.mubr.bf16.vlgmr.msra.gmra.mrb[8].mxu1 %v3897_v46  ;;  %5475 = vmatprep.subr.bf16.mxu0 %v6560_v21 }
 0x23f   : > { %5496 = vmatpush3.bf16.msra.mxu1 %v6565_v23  ;;  %4061 = vmatprep.mubr.bf16.mxu1 %v3900_v47 }
 0x240   : > { %5497 = vmatprep.subr.bf16.mxu1 %v6571_v25 }
 0x241   : > { %5476 = vmatpush3.bf16.msra.mxu0 %v6577_v26 }
 0x242   : > { %5477 = vmatprep.subr.bf16.mxu0 %v6583_v28 }
 0x243   : > { %5498 = vmatpush3.bf16.msra.mxu1 %v6589_v29 }
 0x244   : > { %5499 = vmatprep.subr.bf16.mxu1 %v6595_v30 }
 0x245   : > { %5478 = vmatpush3.bf16.msra.mxu0 %v6601_v31 }
 0x246   : > { %5479 = vmatprep.subr.bf16.mxu0 %v6607_v32 }
 0x247   : > { %5500 = vmatpush3.bf16.msra.mxu1 %v6613_v33 }
 0x248   : > { %5501 = vmatprep.subr.bf16.mxu1 %v6619_v34 }
 0x249   : > { %5480 = vmatpush3.bf16.msra.mxu0 %v6625_v35 }
 0x24a   : > { %5481 = vmatprep.subr.bf16.mxu0 %v6631_v36 }
 0x24b   : > { %5502 = vmatpush3.bf16.msra.mxu1 %v6637_v37 }
 0x24c   : > { %5503 = vmatprep.subr.bf16.mxu1 %v6643_v38 }
 0x24d   : > { %5482 = vmatpush3.bf16.msra.mxu0 %v6649_v39 }
 0x24e   : > { %5483 = vmatprep.subr.bf16.mxu0 %v6958_v48 }
 0x24f   : > { %5504 = vmatpush3.bf16.msra.mxu1 %v6959_v49 }
 0x250   : > { %5505 = vmatprep.subr.bf16.mxu1 %v6960_v50 }
 0x251   : > { %5484 = vmatpush3.bf16.msra.mxu0 %v6961_v51 }
 0x252   : > { %5485 = vmatprep.subr.bf16.mxu0 %v6962_v52 }
 0x253   : > { %5506 = vmatpush3.bf16.msra.mxu1 %v6963_v53 }
 0x254   : > { %5507 = vmatprep.subr.bf16.mxu1 %v6964_v54  ;;  %v5028_v54 = vld [vmem:[%s6920_s6] ss:$0 sm:$0xff] }
 0x255   : > { %5486 = vmatpush3.bf16.msra.mxu0 %v6965_v55  ;;  %v5031_v55 = vld [vmem:[%s6923_s9] ss:$0 sm:$0xff] }
 0x256   : > { %5487 = vmatprep.subr.bf16.mxu0 %v6703_v22  ;;  %v5030_v22 = vld [vmem:[%s6922_s8] ss:$0 sm:$0xff] }
 0x257   : > { %5508 = vmatpush3.bf16.msra.mxu1 %v6709_v24 }
 0x258   : > { %5509 = vmatprep.subr.bf16.mxu1 %v6715_v27 }
 0x259   : > { %5488 = vmatpush3.bf16.msra.mxu0 %v6727_v14 }
 0x25a   : > { %5570 = vmatprep.subr.mxu0 %v5949_v60 }
 0x25b   : > { %5510 = vmatpush3.bf16.msra.mxu1 %v6737_v20  ;;  %v4093_v20 = vld [vmem:[#allocation2] sm:$0x3] }
 0x25c   : > { %4022 = vmatmul.mubr.bf16.vlgmr.msra.gmra.mrb[12].mxu0 %v3882_v56  ;;  %5560 = vmatprep.subr.mxu1 %v5949_v60  ;;  %v4101_v16 = vadd.f32 %v5030_v22, %v4093_v20 }
 0x25d   : > { %5571 = vmatpush3.msra.mxu0 %v4132_v61  ;;  %5572 = vmatprep.mubr.msk.f32.mxu0 %vm5950_vm3, %v5949_v60 }
 0x25e   : > { %4062 = vmatmul.mubr.bf16.vlgmr.msra.gmra.mrb[12].mxu1 %v3898_v57  ;;  %v4103_v46 = vmul.f32 0.01, %v4101_v16  ;;  %vm4102_vm4 = vcmp.ge.f32.partialorder %v4101_v16, 0.0 }
 0x25f   : > { %5561 = vmatpush3.msra.mxu1 %v4131_v43  ;;  %5562 = vmatprep.mubr.msk.f32.mxu1 %vm5950_vm3, %v5949_v60  ;;  %v4130_v43 = vld [vmem:[%s6925_s11] sm:$0xff] }
 0x260   : > { %5565 = vmatprep.subr.mxu1 %v5949_v60  ;;  %v4104_v50 = vsel %vm4102_vm4, %v4101_v16, %v4103_v46 }
 0x264   : > { %5573 = vmatmul.mubr.msk.f32.vlgmr.msra.gmra.mrb[16].mxu0 %vm4137_vm5, %v4104_v50  ;;  %v5042_v50 = vld [vmem:[#allocation3] ss:$0 sm:$0xff] }
 0x265   : > { %5588 = vmatprep.mubr.msk.f32.mxu0 %vm5950_vm3, %v5949_v60 }
 0x286   : > { %v4087_v48 = vpop.permute.xlu0 %4086 }
 0x2ae   : > { %v4110_v56 = vpop.permute.xlu0 %4109 }
 0x2af   : > { %v4118_v58 = vmul.f32 %v5031_v55, %v4110_v56 }
 0x2cf   : > { %v5357_v62 = vpop.f32.mrb[0].mxu0 }
 0x2d0   : > { %v5358_v63 = vpop.f32.mrb[1].mxu0  ;;  %v5379_v0 = vpop.f32.mrb[0].mxu1 }
 0x2d1   : > { %v5359_v1 = vadd.f32 %v5358_v63, %v5357_v62  ;;  %v5360_v2 = vpop.f32.mrb[2].mxu0  ;;  %v5380_v3 = vpop.f32.mrb[1].mxu1  ;;  %v4126_v62 = vadd.f32 %v5032_v59, %v4118_v58 }
 0x2d2   : > { %v5361_v4 = vpop.f32.mrb[3].mxu0  ;;  %v5381_v5 = vadd.f32 %v5380_v3, %v5379_v0  ;;  %v5382_v6 = vpop.f32.mrb[2].mxu1  ;;  %v4133_v0 = vld [vmem:[%s6925_s11 + $0x18] sm:$0xff] }
 0x2d3   : > { %v5383_v7 = vpop.f32.mrb[3].mxu1  ;;  %vm4127_vm8 = vcmp.ge.f32.partialorder %v4126_v62, 0.0  ;;  %v4442_v6 = vld [vmem:[%s6927_s13] sm:$0xff] }
 0x2d4   : > { %v3765_v8 = vadd.f32 %v5381_v5, %v5359_v1  ;;  %v4128_v1 = vmul.f32 0.2, %v4126_v62  ;;  %v4443_v7 = vld [vmem:[%s6927_s13 + $0x8] sm:$0xff] }
 0x2d6   : > { %v4129_v3 = vsel %vm4127_vm8, %v4126_v62, %v4128_v1 }
 0x2ef   : > { %v5401_v12 = vpop.f32.mrb[4].mxu0 }
 0x2f0   : > { %v5402_v13 = vpop.f32.mrb[5].mxu0 }
 0x2f1   : > { %v5423_v18 = vpop.f32.mrb[4].mxu1  ;;  %v5403_v21 = vadd.f32 %v5402_v13, %v5401_v12  ;;  %v5404_v23 = vpop.f32.mrb[6].mxu0  ;;  %v5952_v12 = vmov 0.0|0.0   ;;  %v4444_v13 = vld [vmem:[%s6927_s13 + $0x10] sm:$0xff] }
 0x2f2   : > { %v5424_v25 = vpop.f32.mrb[5].mxu1  ;;  %v5405_v26 = vpop.f32.mrb[7].mxu0  ;;  %5613 = vmatprep.subr.bf16.mxu0 %v5952_v12  ;;  %v4530_v23 = vld [vmem:[%s6929_s15] sm:$0xff] }
 0x2f3   : > { %v3805_v28 = vadd.f32 %v5403_v21, %v3765_v8  ;;  %v5425_v29 = vadd.f32 %v5424_v25, %v5423_v18  ;;  %v5426_v30 = vpop.f32.mrb[6].mxu1  ;;  %v5614_v8 = vpack.c.bf16 %v4443_v7, %v4442_v6  ;;  %v4445_v18 = vld [vmem:[%s6927_s13 + $0x18] sm:$0xff]  ;;  %v4531_v25 = vld [vmem:[%s6929_s15 + $0x8] sm:$0xff] }
 0x2f4   : > { %v5427_v31 = vpop.f32.mrb[7].mxu1  ;;  %v5617_v21 = vpack.c.bf16 %v4445_v18, %v4444_v13  ;;  %v5620_v26 = vpack.c.bf16 %v4531_v25, %v4530_v23 }
 0x2f5   : > { %v3845_v32 = vadd.f32 %v5425_v29, %v3805_v28  ;;  %5615 = vmatpush3.bf16.msra.mxu0 %v5614_v8 }
 0x2f6   : > { %5616 = vmatprep.subr.bf16.mxu0 %v5952_v12 }
 0x2f7   : > { %v4076_v57 = vadd.f32 %v5028_v54, %v3845_v32 }
 0x2f9   : > { %v4078_v61 = vmul.f32 0.2, %v4076_v57  ;;  %vm4077_vm7 = vcmp.ge.f32.partialorder %v4076_v57, 0.0  ;;  %5618 = vmatpush3.bf16.msra.mxu0 %v5617_v21 }
 0x2fa   : > { %5625 = vmatprep.subr.bf16.mxu0 %v5952_v12 }
 0x2fb   : > { %v4079_v2 = vsel %vm4077_vm7, %v4076_v57, %v4078_v61 }
 0x30f   : > { %v5445_v33 = vpop.f32.mrb[8].mxu0 }
 0x310   : > { %v5446_v34 = vpop.f32.mrb[9].mxu0 }
 0x311   : > { %v5467_v35 = vpop.f32.mrb[8].mxu1  ;;  %v5447_v36 = vadd.f32 %v5446_v34, %v5445_v33  ;;  %v5448_v37 = vpop.f32.mrb[10].mxu0 }
 0x312   : > { %v5468_v38 = vpop.f32.mrb[9].mxu1  ;;  %v5449_v39 = vpop.f32.mrb[11].mxu0 }
 0x313   : > { %v5469_v9 = vadd.f32 %v5468_v38, %v5467_v35  ;;  %v5470_v10 = vpop.f32.mrb[10].mxu1  ;;  %v5037_v35 = vld [vmem:[%s6926_s12] ss:$0 sm:$0xff] }
 0x314   : > { %v5471_v11 = vpop.f32.mrb[11].mxu1  ;;  %v4532_v10 = vld [vmem:[%s6929_s15 + $0x10] sm:$0xff] }
 0x315   : > { %v3984_v14 = vadd.f32 %v5469_v9, %v5447_v36  ;;  %v4533_v11 = vld [vmem:[%s6929_s15 + $0x18] sm:$0xff] }
 0x32f   : > { %v5489_v15 = vpop.f32.mrb[12].mxu0 }
 0x330   : > { %v5490_v19 = vpop.f32.mrb[13].mxu0 }
 0x331   : > { %v5511_v24 = vpop.f32.mrb[12].mxu1  ;;  %v5491_v27 = vadd.f32 %v5490_v19, %v5489_v15  ;;  %v5492_v17 = vpop.f32.mrb[14].mxu0  ;;  %v4617_v15 = vld [vmem:[%s6931_s17] sm:$0xff]  ;;  %v4618_v19 = vld [vmem:[%s6931_s17 + $0x8] sm:$0xff] }
 0x332   : > { %v5512_v40 = vpop.f32.mrb[13].mxu1  ;;  %v5493_v41 = vpop.f32.mrb[15].mxu0  ;;  %v5626_v20 = vpack.c.bf16 %v4618_v19, %v4617_v15 }
 0x333   : > { %v4024_v42 = vadd.f32 %v5491_v27, %v3984_v14  ;;  %v5513_v44 = vadd.f32 %v5512_v40, %v5511_v24  ;;  %v5514_v45 = vpop.f32.mrb[14].mxu1  ;;  %v5623_v14 = vpack.c.bf16 %v4533_v11, %v4532_v10  ;;  %v4619_v40 = vld [vmem:[%s6931_s17 + $0x10] sm:$0xff]  ;;  %v4620_v41 = vld [vmem:[%s6931_s17 + $0x18] sm:$0xff] }
 0x334   : > { %v5515_v47 = vpop.f32.mrb[15].mxu1 }
 0x335   : > { %v4064_v49 = vadd.f32 %v5513_v44, %v4024_v42  ;;  %v5629_v42 = vpack.c.bf16 %v4620_v41, %v4619_v40  ;;  %v5040_v44 = vld [vmem:[%s6930_s16] ss:$0 sm:$0xff] }
 0x337   : > { %v4089_v51 = vadd.f32 %v4087_v48, %v4064_v49  ;;  %v4352_v4 = vpop.f32.mrb[16].mxu0 }
 0x338   : > { %v5574_v5 = vpop.f32.mrb[17].mxu0 }
 0x339   : > { %vm4090_vm6 = vcmp.ge.f32.partialorder %v4089_v51, 0.0  ;;  %v4091_v52 = vmul.f32 0.2, %v4089_v51 }
 0x33b   : > { %v4092_v53 = vsel %vm4090_vm6, %v4089_v51, %v4091_v52 }
 0x33c   : > { %4135 = vrot.lane.b32.xlu1 %v4092_v53, %s5951_s25 }
 0x3ae   : > { %v4136_v63 = vpop.permute.xlu1 %4135 }
 0x3af   : > { %5563 = vmatmul.mubr.msk.f32.vlgmr.msra.gmra.mrb[16].mxu1 %vm4137_vm5, %v4136_v63 }
 0x3b0   : > { %5566 = vmatpush3.msra.mxu1 %v4130_v43  ;;  %5567 = vmatprep.mubr.msk.f32.mxu1 %vm5950_vm3, %v5949_v60 }
 0x3b1   : > { %5575 = vmatprep.subr.mxu1 %v5949_v60 }
 0x3b3   : > { %5568 = vmatmul.mubr.msk.f32.vlgmr.msra.gmra.mrb[18].mxu1 %vm4137_vm5, %v4079_v2 }
 0x3b4   : > { %5576 = vmatpush3.msra.mxu1 %v4133_v0  ;;  %5577 = vmatprep.mubr.msk.f32.mxu1 %vm5950_vm3, %v5949_v60 }
 0x3b5   : > { %5619 = vmatprep.subr.bf16.mxu1 %v5952_v12 }
 0x3b7   : > { %5578 = vmatmul.mubr.msk.f32.vlgmr.msra.gmra.mrb[20].mxu1 %vm4137_vm5, %v4129_v3 }
 0x3b8   : > { %5599 = vmatprep.mubr.msk.f32.mxu1 %vm5950_vm3, %v5949_v60  ;;  %5621 = vmatpush3.bf16.msra.mxu1 %v5620_v26 }
 0x3b9   : > { %5622 = vmatprep.subr.bf16.mxu1 %v5952_v12 }
 0x3bc   : > { %5624 = vmatpush3.bf16.msra.mxu1 %v5623_v14 }
 0x482   : > { %v4206_v28 = vpop.f32.mrb[16].mxu1 }
 0x483   : > { %v5564_v29 = vpop.f32.mrb[17].mxu1 }
 0x486   : > { %v4279_v30 = vpop.f32.mrb[18].mxu1 }
 0x487   : > { %v4280_v31 = vadd.f32 %v4279_v30, %v4206_v28  ;;  %v5569_v32 = vpop.f32.mrb[19].mxu1 }
 0x489   : > { %v4356_v33 = vadd.f32 %v4352_v4, %v4280_v31 }
 0x48a   : > { %v4426_v34 = vpop.f32.mrb[20].mxu1 }
 0x48b   : > { %v4430_v36 = vadd.f32 %v4426_v34, %v4356_v33  ;;  %v5579_v37 = vpop.f32.mrb[21].mxu1 }
 0x48d   : > { %v4438_v38 = vadd.f32 %v5037_v35, %v4430_v36 }
 0x48f   : > { %vm4439_vm9 = vcmp.ge.f32.partialorder %v4438_v38, 0.0  ;;  %v4440_v39 = vmul.f32 0.2, %v4438_v38 }
 0x491   : > { %v4441_v9 = vsel %vm4439_vm9, %v4438_v38, %v4440_v39 }
 0x492   : > { %5589 = vmatmul.mubr.msk.f32.vlgmr.msra.gmra.mrb[18].mxu0 %vm4453_vm10, %v4441_v9 }
 0x493   : > { %5610 = vmatprep.mubr.msk.f32.mxu0 %vm5950_vm3, %v5949_v60  ;;  %5627 = vmatpush3.bf16.msra.mxu0 %v5626_v20  ;;  %v5038_v60 = vld [vmem:[%s6928_s14] ss:$0 sm:$0xff] }
 0x494   : > { %5628 = vmatprep.subr.bf16.mxu0 %v5952_v12 }
 0x497   : > { %5630 = vmatpush3.bf16.msra.mxu0 %v5629_v42 }
 0x565   : > { %v4523_v22 = vpop.f32.mrb[18].mxu0 }
 0x566   : > { %v4524_v24 = vadd.f32 %v5038_v60, %v4523_v22  ;;  %v5590_v27 = vpop.f32.mrb[19].mxu0 }
 0x568   : > { %vm4527_vm11 = vcmp.ge.f32.partialorder %v4524_v24, 0.0  ;;  %v4528_v17 = vmul.f32 0.2, %v4524_v24 }
 0x56a   : > { %v4529_v16 = vsel %vm4527_vm11, %v4524_v24, %v4528_v17 }
 0x56b   : > { %5600 = vmatmul.mubr.msk.f32.vlgmr.msra.gmra.mrb[22].mxu1 %vm4453_vm10, %v4529_v16 }
 0x63e   : > { %v4610_v45 = vpop.f32.mrb[22].mxu1 }
 0x63f   : > { %v4611_v46 = vadd.f32 %v5040_v44, %v4610_v45  ;;  %v5601_v47 = vpop.f32.mrb[23].mxu1 }
 0x641   : > { %vm4614_vm12 = vcmp.ge.f32.partialorder %v4611_v46, 0.0  ;;  %v4615_v48 = vmul.f32 0.2, %v4611_v46 }
 0x643   : > { %v4616_v49 = vsel %vm4614_vm12, %v4611_v46, %v4615_v48 }
 0x644   : > { %5611 = vmatmul.mubr.msk.f32.vlgmr.msra.gmra.mrb[20].mxu0 %vm4453_vm10, %v4616_v49 }
 0x717   : > { %v4697_v51 = vpop.f32.mrb[20].mxu0 }
 0x718   : > { %v4698_v52 = vadd.f32 %v5042_v50, %v4697_v51  ;;  %v5612_v53 = vpop.f32.mrb[21].mxu0 }
 0x71a   : > { %4702 = vst.msk [vmem:[%s6933_s19] sm:$0x3] %vm4701_vm13, %v4698_v52 }
 0x71b PF: > { %s31_s20 = sadd.s32 1, %s5941_s20  }
 0x71c   : > { %p28_p7 = scmp.ge.s32.totalorder %s31_s20, 10  }
 0x71e   :  { %30 = sbr.rel (!%p28_p7) target bundleno = 5 (0x5), region = 133 }

</bundles_post_ra>
